<compile_context>
chip_gen: v7x
topology: tpu7x:2x2x1
jax: 0.10.0
libtpu: 0.0.40
codegen_flags: <defaults>
</compile_context>

<pallas_src>
import jax
import jax.numpy as jnp
from jax import lax
from jax.experimental import pallas as pl
from jax.experimental.pallas import tpu as pltpu


def _concat(parts, axis):
    return parts[0] if len(parts) == 1 else jnp.concatenate(parts, axis=axis)


# ----------------------------- Pallas kernel --------------------------------

def fcn_en_kernel(x1_ref, w1_ref, w2_ref, w3_ref,
                  s1_ref, t1_ref, s2_ref, t2_ref, s3_ref, t3_ref,
                  out_ref, pad1_ref):
    """One batch block (Bt elements) per grid step.

    x1_ref  : (Bt*L, 8) f32        im2col'd signal (7 conv1 taps + 1 zero tap)
    w1_ref  : (8, 256) f32         conv1 taps padded 7->8 (row 7 is zero)
    w2_ref  : (1280, 512) bf16     conv2 weights, (K*Cin, Cout)
    w3_ref  : (1536, 128) f32      conv3 weights, (K*Cin, Cout)
    s*/t*   : (1, C) f32           folded BN scale / shift (conv bias included)
    out_ref : (Bt, 128) f32        pooled + flattened output (one dense store)
    pad1_ref: (Bt*(L+16), 256) bf16  conv2 input, zero halos, data at +8
    """
    Bt = out_ref.shape[0]
    C1 = pad1_ref.shape[1]
    Lp = pad1_ref.shape[0] // Bt
    L = Lp - 16
    OFF = 8                           # sublane-aligned activation offset

    # --- conv1 (k=7, Cin=1) as one small MXU matmul + bn1 + relu -------------
    h1 = jnp.dot(x1_ref[...], w1_ref[...], preferred_element_type=jnp.float32)
    h1 = jnp.maximum(h1 * s1_ref[...] + t1_ref[...], 0.0)
    h1 = h1.astype(pad1_ref.dtype)                           # (Bt*L, C1) bf16

    # --- scatter h1 into the halo-padded conv2 input -------------------------
    # Only the 8-row halo slabs are zeroed (re-done each step so megacore grid
    # sharding stays correct); interior rows are fully overwritten.
    for b in range(Bt):               # static unroll (Bt is a Python int)
        base = b * Lp
        pad1_ref[pl.ds(base, OFF), :] = jnp.zeros((OFF, C1), pad1_ref.dtype)
        pad1_ref[pl.ds(base + OFF + L, OFF), :] = jnp.zeros((OFF, C1), pad1_ref.dtype)
        pad1_ref[pl.ds(base + OFF, L), :] = h1[b * L:(b + 1) * L, :]

    # --- conv2 (k=5, pad=2) + bn2 + relu: one K-concatenated bf16 MXU matmul -
    lhs2 = _concat(
        [_concat([pad1_ref[pl.ds(b * Lp + OFF - 2 + k, L), :] for k in range(5)],
                 axis=-1)
         for b in range(Bt)], axis=0)                        # (Bt*L, 5*C1) bf16
    h2 = jnp.dot(lhs2, w2_ref[...], preferred_element_type=jnp.float32)
    h2 = jnp.maximum(h2 * s2_ref[...] + t2_ref[...], 0.0)    # (Bt*L, C2) f32

    # --- conv3 (k=3, pad=1) fused with AdaptiveAvgPool1d(1) ------------------
    # pool and conv3 commute (both linear, no ReLU between), so
    #   pool(conv3(h2)) = (1/L) * [S - h2[L-1] | S | S - h2[0]] @ w3_flat
    # bn3 is affine and the conv3 bias is folded into t3 -> applying s3/t3
    # after the pool is exact.  Dropout(0.5) is the identity in eval mode.
    taps = []
    for b in range(Bt):
        blk = h2[b * L:(b + 1) * L, :]
        col_sum = jnp.sum(blk, axis=0, keepdims=True)        # (1, C2)
        first = blk[0:1, :]
        last = blk[L - 1:L, :]
        taps.append(jnp.concatenate([col_sum - last, col_sum, col_sum - first],
                                    axis=-1))                # (1, 3*C2)
    tap_sums = _concat(taps, axis=0)                         # (Bt, 3*C2) f32
    pooled = jnp.dot(tap_sums, w3_ref[...],
                     preferred_element_type=jnp.float32) * (1.0 / L)
    out_ref[...] = pooled * s3_ref[...] + t3_ref[...]        # single dense store


# ------------------------------ wrapper --------------------------------------

def fcn_en_forward(x, p, batch_block=None):
    """x: (B, L) float32 -> (B, 128) float32 (matches torch forward in eval)."""
    B, L = x.shape
    C1, C2, C3 = 256, 512, 128
    assert L % 8 == 0, "sequence length must be a multiple of 8"

    if batch_block is None:
        if B <= 4 or B % 2 != 0:
            # Tiny batch: one grid step -> weights DMA'd once, MXU sees M=B*L.
            Bt = B
        else:
            # Keep >= 2 "parallel" grid steps so both v7x TensorCores get work.
            Bt = min(8, B // 2)
            while B % Bt != 0:
                Bt -= 1
    else:
        Bt = batch_block
    assert B % Bt == 0

    Lp = L + 16

    # Wrapper-side im2col for conv1 (Cin=1, K=7 padded to 8): row (b*L + l)
    # holds [x[l-3], ..., x[l+3], x[l+4]] with zeros outside [0, L); the 8th
    # column is multiplied by a zero weight row, so its value is irrelevant.
    x_sh = jnp.pad(x, ((0, 0), (3, 4)))                      # (B, L+7)
    x1 = jnp.stack([x_sh[:, k:k + L] for k in range(8)], axis=-1)   # (B, L, 8)
    x1 = x1.reshape(B * L, 8)

    flops = (2 * B * L * 8 * C1            # conv1
             + 2 * B * L * 5 * C1 * C2     # conv2
             + 2 * B * 3 * C2 * C3         # conv3 fused with pool
             + 4 * B * L * (C1 + C2))      # bn + relu
    bytes_accessed = (B * L * 8 * 4 + 8 * C1 * 4 + 5 * C1 * C2 * 2
                      + 3 * C2 * C3 * 4 + 2 * (C1 + C2 + C3) * 4 + B * C3 * 4)

    in_specs = [
        pl.BlockSpec((Bt * L, 8), lambda b: (b, 0)),         # im2col signal
        pl.BlockSpec((8, C1), lambda b: (0, 0)),             # conv1 taps (f32)
        pl.BlockSpec((5 * C1, C2), lambda b: (0, 0)),        # conv2 flat (bf16)
        pl.BlockSpec((3 * C2, C3), lambda b: (0, 0)),        # conv3 flat (f32)
        pl.BlockSpec((1, C1), lambda b: (0, 0)),
        pl.BlockSpec((1, C1), lambda b: (0, 0)),
        pl.BlockSpec((1, C2), lambda b: (0, 0)),
        pl.BlockSpec((1, C2), lambda b: (0, 0)),
        pl.BlockSpec((1, C3), lambda b: (0, 0)),
        pl.BlockSpec((1, C3), lambda b: (0, 0)),
    ]
    out_spec = pl.BlockSpec((Bt, C3), lambda b: (b, 0))

    out = pl.pallas_call(
        fcn_en_kernel,
        out_shape=jax.ShapeDtypeStruct((B, C3), jnp.float32),
        grid_spec=pltpu.PrefetchScalarGridSpec(
            num_scalar_prefetch=0,
            grid=(B // Bt,),
            in_specs=in_specs,
            out_specs=out_spec,
            scratch_shapes=[pltpu.VMEM((Bt * Lp, C1), jnp.bfloat16)]),
        compiler_params=pltpu.CompilerParams(
            dimension_semantics=("parallel",)),
        cost_estimate=pl.CostEstimate(flops=flops, transcendentals=0,
                                      bytes_accessed=bytes_accessed),
    )(x1, p["w1p"], p["w2f"], p["w3f"],
      p["s1"], p["t1"], p["s2"], p["t2"], p["s3"], p["t3"])

    return out                                               # (B, 128)


# ----------------------- deterministic parameter init ------------------------

def init_params(key):
    C1, C2, C3 = 256, 512, 128
    eps = 1e-5
    ks = jax.random.split(key, 18)

    def norm(k, shape, fan_in):
        return jax.random.normal(k, shape, jnp.float32) / jnp.sqrt(fan_in)

    # torch-layout conv weights (Cout, Cin, K) + biases
    w1_t = norm(ks[0], (C1, 1, 7), 1 * 7)
    b1 = norm(ks[1], (C1,), 1 * 7)
    w2_t = norm(ks[2], (C2, C1, 5), C1 * 5)
    b2 = norm(ks[3], (C2,), C1 * 5)
    w3_t = norm(ks[4], (C3, C2, 3), C2 * 3)
    b3 = norm(ks[5], (C3,), C2 * 3)

    def bn(kg, kb, km, kv, c):
        gamma = 1.0 + 0.1 * jax.random.normal(kg, (c,), jnp.float32)
        beta = 0.1 * jax.random.normal(kb, (c,), jnp.float32)
        mean = 0.1 * jax.random.normal(km, (c,), jnp.float32)
        var = 0.5 + jax.random.uniform(kv, (c,), jnp.float32)
        return gamma, beta, mean, var

    bn1 = bn(ks[6], ks[7], ks[8], ks[9], C1)
    bn2 = bn(ks[10], ks[11], ks[12], ks[13], C2)
    bn3 = bn(ks[14], ks[15], ks[16], ks[17], C3)

    def fold(bias, gamma, beta, mean, var):
        scale = gamma / jnp.sqrt(var + eps)
        shift = beta + (bias - mean) * scale
        return scale[None, :], shift[None, :]

    s1, t1 = fold(b1, *bn1)
    s2, t2 = fold(b2, *bn2)
    s3, t3 = fold(b3, *bn3)

    # Kernel-layout weights: (K, Cin, Cout).
    w1_k = jnp.transpose(w1_t, (2, 1, 0))[:, 0, :]                 # (7, 256) f32
    w1_p = jnp.zeros((8, C1), jnp.float32).at[:7, :].set(w1_k)     # K padded 7->8
    w2_k = jnp.transpose(w2_t, (2, 1, 0)).reshape(5 * C1, C2)      # (1280, 512)
    w3_k = jnp.transpose(w3_t, (2, 1, 0)).reshape(3 * C2, C3)      # (1536, 128)

    kernel_params = {
        "w1p": w1_p,
        "w2f": w2_k.astype(jnp.bfloat16),   # big weight -> bf16 MXU matmul
        "w3f": w3_k,                        # fused last layer stays f32
        "s1": s1, "t1": t1, "s2": s2, "t2": t2, "s3": s3, "t3": t3,
    }
    raw = {"w1_t": w1_t, "b1": b1, "bn1": bn1,
           "w2_t": w2_t, "b2": b2, "bn2": bn2,
           "w3_t": w3_t, "b3": b3, "bn3": bn3}
    return kernel_params, raw


# ----------------------------- pure-JAX reference ----------------------------

def ref_forward(x, raw):
    eps = 1e-5
    h = x[:, None, :]                                        # (B, 1, L)

    def block(h, w, b, bn_params, pad, relu):
        gamma, beta, mean, var = bn_params
        h = lax.conv_general_dilated(h, w, window_strides=(1,),
                                     padding=[(pad, pad)],
                                     dimension_numbers=("NCH", "OIH", "NCH"))
        h = h + b[None, :, None]
        h = (gamma[None, :, None] * (h - mean[None, :, None])
             / jnp.sqrt(var[None, :, None] + eps) + beta[None, :, None])
        return jnp.maximum(h, 0.0) if relu else h

    h = block(h, raw["w1_t"], raw["b1"], raw["bn1"], 3, True)
    h = block(h, raw["w2_t"], raw["b2"], raw["bn2"], 2, True)
    h = block(h, raw["w3_t"], raw["b3"], raw["bn3"], 1, False)
    h = jnp.mean(h, axis=2)                                  # pool(1) + flatten
    return h                                                 # dropout = id (eval)


# ---------------------------------- main --------------------------------------

if __name__ == "__main__":
    key = jax.random.PRNGKey(0)
    k_params, k_x = jax.random.split(key)

    B, L = 2, 128                                            # lenth = 128
    params, raw = init_params(k_params)
    x = jax.random.normal(k_x, (B, L), jnp.float32)

    out = jax.block_until_ready(fcn_en_forward(x, params))
    ref = jax.block_until_ready(ref_forward(x, raw))

    assert out.shape == (B, 128)
    err = jnp.max(jnp.abs(out - ref))
    # conv2 runs with bf16 activations/weights on the MXU (f32 accumulation);
    # conv1 and the fused conv3+pool stay in f32.
    assert jnp.allclose(out, ref, atol=2e-2, rtol=2e-2), f"max abs err = {err}"

    print("KERNEL_OK")
</pallas_src>

<mosaic_0001>
module attributes {stable_mosaic.version = 11 : i64} {
  func.func @fcn_en_kernel(%arg0: i32, %arg1: memref<256x8xf32, #tpu.memory_space<vmem>>, %arg2: memref<8x256xf32, #tpu.memory_space<vmem>>, %arg3: memref<1280x512xbf16, #tpu.memory_space<vmem>>, %arg4: memref<1536x128xf32, #tpu.memory_space<vmem>>, %arg5: memref<1x256xf32, #tpu.memory_space<vmem>>, %arg6: memref<1x256xf32, #tpu.memory_space<vmem>>, %arg7: memref<1x512xf32, #tpu.memory_space<vmem>>, %arg8: memref<1x512xf32, #tpu.memory_space<vmem>>, %arg9: memref<1x128xf32, #tpu.memory_space<vmem>>, %arg10: memref<1x128xf32, #tpu.memory_space<vmem>>, %arg11: memref<2x128xf32, #tpu.memory_space<vmem>>, %arg12: memref<288x256xbf16, #tpu.memory_space<vmem>>) attributes {dimension_semantics = [#tpu.dimension_semantics<parallel>], iteration_bounds = array<i64: 1>, scalar_prefetch = 0 : i64, scratch_operands = 1 : i64, tpu.core_type = #tpu.core_type<tc>, window_params = [{transform_indices = @transform_0, window_bounds = array<i64: 256, 8>}, {pipeline_mode = #tpu.pipeline_mode<synchronous>, transform_indices = @transform_1, window_bounds = array<i64: 8, 256>}, {pipeline_mode = #tpu.pipeline_mode<synchronous>, transform_indices = @transform_2, window_bounds = array<i64: 1280, 512>}, {pipeline_mode = #tpu.pipeline_mode<synchronous>, transform_indices = @transform_3, window_bounds = array<i64: 1536, 128>}, {pipeline_mode = #tpu.pipeline_mode<synchronous>, transform_indices = @transform_4, window_bounds = array<i64: 1, 256>}, {pipeline_mode = #tpu.pipeline_mode<synchronous>, transform_indices = @transform_5, window_bounds = array<i64: 1, 256>}, {pipeline_mode = #tpu.pipeline_mode<synchronous>, transform_indices = @transform_6, window_bounds = array<i64: 1, 512>}, {pipeline_mode = #tpu.pipeline_mode<synchronous>, transform_indices = @transform_7, window_bounds = array<i64: 1, 512>}, {pipeline_mode = #tpu.pipeline_mode<synchronous>, transform_indices = @transform_8, window_bounds = array<i64: 1, 128>}, {pipeline_mode = #tpu.pipeline_mode<synchronous>, transform_indices = @transform_9, window_bounds = array<i64: 1, 128>}, {transform_indices = @transform_10, window_bounds = array<i64: 2, 128>}]} {
    %c0 = arith.constant 0 : index
    %c0_0 = arith.constant 0 : index
    %0 = vector.load %arg1[%c0, %c0_0] : memref<256x8xf32, #tpu.memory_space<vmem>>, vector<256x8xf32>
    %c0_1 = arith.constant 0 : index
    %c0_2 = arith.constant 0 : index
    %1 = vector.load %arg2[%c0_1, %c0_2] : memref<8x256xf32, #tpu.memory_space<vmem>>, vector<8x256xf32>
    %cst = arith.constant dense<0.000000e+00> : vector<256x256xf32>
    %2 = tpu.matmul %0, %1, %cst {dimension_numbers = #tpu.dot_dimension_numbers<[1], [0], [0], [1], [0, 0, 1, 1], [], []>} : vector<256x8xf32>, vector<8x256xf32>, vector<256x256xf32> -> vector<256x256xf32>
    %c0_3 = arith.constant 0 : index
    %c0_4 = arith.constant 0 : index
    %3 = vector.load %arg5[%c0_3, %c0_4] : memref<1x256xf32, #tpu.memory_space<vmem>>, vector<1x256xf32>
    %4 = vector.broadcast %3 : vector<1x256xf32> to vector<256x256xf32>
    %5 = arith.mulf %2, %4 : vector<256x256xf32>
    %c0_5 = arith.constant 0 : index
    %c0_6 = arith.constant 0 : index
    %6 = vector.load %arg6[%c0_5, %c0_6] : memref<1x256xf32, #tpu.memory_space<vmem>>, vector<1x256xf32>
    %7 = vector.broadcast %6 : vector<1x256xf32> to vector<256x256xf32>
    %8 = arith.addf %5, %7 : vector<256x256xf32>
    %cst_7 = arith.constant 0.000000e+00 : f32
    %9 = vector.broadcast %cst_7 : f32 to vector<256x256xf32>
    %10 = arith.maximumf %8, %9 : vector<256x256xf32>
    %11 = arith.truncf %10 : vector<256x256xf32> to vector<256x256xbf16>
    %cst_8 = arith.constant 0.000000e+00 : bf16
    %12 = vector.broadcast %cst_8 : bf16 to vector<8x256xbf16>
    %c0_9 = arith.constant 0 : index
    %c0_10 = arith.constant 0 : index
    %13 = vector.load %arg12[%c0_9, %c0_10] : memref<288x256xbf16, #tpu.memory_space<vmem>>, vector<8x256xbf16>
    tpu.vector_store %arg12[%c0_9, %c0_10], %12 {strides = array<i32>} : memref<288x256xbf16, #tpu.memory_space<vmem>>, vector<8x256xbf16>,
    %cst_11 = arith.constant 0.000000e+00 : bf16
    %14 = vector.broadcast %cst_11 : bf16 to vector<8x256xbf16>
    %c136 = arith.constant 136 : index
    %c0_12 = arith.constant 0 : index
    %15 = vector.load %arg12[%c136, %c0_12] : memref<288x256xbf16, #tpu.memory_space<vmem>>, vector<8x256xbf16>
    tpu.vector_store %arg12[%c136, %c0_12], %14 {strides = array<i32>} : memref<288x256xbf16, #tpu.memory_space<vmem>>, vector<8x256xbf16>,
    %16 = vector.extract_strided_slice %11 {offsets = [0, 0], sizes = [128, 256], strides = [1, 1]} : vector<256x256xbf16> to vector<128x256xbf16>
    %c8 = arith.constant 8 : index
    %c0_13 = arith.constant 0 : index
    %17 = vector.load %arg12[%c8, %c0_13] : memref<288x256xbf16, #tpu.memory_space<vmem>>, vector<128x256xbf16>
    tpu.vector_store %arg12[%c8, %c0_13], %16 {strides = array<i32>} : memref<288x256xbf16, #tpu.memory_space<vmem>>, vector<128x256xbf16>,
    %cst_14 = arith.constant 0.000000e+00 : bf16
    %18 = vector.broadcast %cst_14 : bf16 to vector<8x256xbf16>
    %c144 = arith.constant 144 : index
    %c0_15 = arith.constant 0 : index
    %19 = vector.load %arg12[%c144, %c0_15] : memref<288x256xbf16, #tpu.memory_space<vmem>>, vector<8x256xbf16>
    tpu.vector_store %arg12[%c144, %c0_15], %18 {strides = array<i32>} : memref<288x256xbf16, #tpu.memory_space<vmem>>, vector<8x256xbf16>,
    %cst_16 = arith.constant 0.000000e+00 : bf16
    %20 = vector.broadcast %cst_16 : bf16 to vector<8x256xbf16>
    %c280 = arith.constant 280 : index
    %c0_17 = arith.constant 0 : index
    %21 = vector.load %arg12[%c280, %c0_17] : memref<288x256xbf16, #tpu.memory_space<vmem>>, vector<8x256xbf16>
    tpu.vector_store %arg12[%c280, %c0_17], %20 {strides = array<i32>} : memref<288x256xbf16, #tpu.memory_space<vmem>>, vector<8x256xbf16>,
    %22 = vector.extract_strided_slice %11 {offsets = [128, 0], sizes = [128, 256], strides = [1, 1]} : vector<256x256xbf16> to vector<128x256xbf16>
    %c152 = arith.constant 152 : index
    %c0_18 = arith.constant 0 : index
    %23 = vector.load %arg12[%c152, %c0_18] : memref<288x256xbf16, #tpu.memory_space<vmem>>, vector<128x256xbf16>
    tpu.vector_store %arg12[%c152, %c0_18], %22 {strides = array<i32>} : memref<288x256xbf16, #tpu.memory_space<vmem>>, vector<128x256xbf16>,
    %c6 = arith.constant 6 : index
    %c0_19 = arith.constant 0 : index
    %24 = vector.load %arg12[%c6, %c0_19] : memref<288x256xbf16, #tpu.memory_space<vmem>>, vector<128x256xbf16>
    %c7 = arith.constant 7 : index
    %c0_20 = arith.constant 0 : index
    %25 = vector.load %arg12[%c7, %c0_20] : memref<288x256xbf16, #tpu.memory_space<vmem>>, vector<128x256xbf16>
    %c8_21 = arith.constant 8 : index
    %c0_22 = arith.constant 0 : index
    %26 = vector.load %arg12[%c8_21, %c0_22] : memref<288x256xbf16, #tpu.memory_space<vmem>>, vector<128x256xbf16>
    %c9 = arith.constant 9 : index
    %c0_23 = arith.constant 0 : index
    %27 = vector.load %arg12[%c9, %c0_23] : memref<288x256xbf16, #tpu.memory_space<vmem>>, vector<128x256xbf16>
    %c10 = arith.constant 10 : index
    %c0_24 = arith.constant 0 : index
    %28 = vector.load %arg12[%c10, %c0_24] : memref<288x256xbf16, #tpu.memory_space<vmem>>, vector<128x256xbf16>
    %29 = tpu.concatenate %24, %25, %26, %27, %28 in 1 : vector<128x256xbf16>, vector<128x256xbf16>, vector<128x256xbf16>, vector<128x256xbf16>, vector<128x256xbf16> -> vector<128x1280xbf16>
    %c150 = arith.constant 150 : index
    %c0_25 = arith.constant 0 : index
    %30 = vector.load %arg12[%c150, %c0_25] : memref<288x256xbf16, #tpu.memory_space<vmem>>, vector<128x256xbf16>
    %c151 = arith.constant 151 : index
    %c0_26 = arith.constant 0 : index
    %31 = vector.load %arg12[%c151, %c0_26] : memref<288x256xbf16, #tpu.memory_space<vmem>>, vector<128x256xbf16>
    %c152_27 = arith.constant 152 : index
    %c0_28 = arith.constant 0 : index
    %32 = vector.load %arg12[%c152_27, %c0_28] : memref<288x256xbf16, #tpu.memory_space<vmem>>, vector<128x256xbf16>
    %c153 = arith.constant 153 : index
    %c0_29 = arith.constant 0 : index
    %33 = vector.load %arg12[%c153, %c0_29] : memref<288x256xbf16, #tpu.memory_space<vmem>>, vector<128x256xbf16>
    %c154 = arith.constant 154 : index
    %c0_30 = arith.constant 0 : index
    %34 = vector.load %arg12[%c154, %c0_30] : memref<288x256xbf16, #tpu.memory_space<vmem>>, vector<128x256xbf16>
    %35 = tpu.concatenate %30, %31, %32, %33, %34 in 1 : vector<128x256xbf16>, vector<128x256xbf16>, vector<128x256xbf16>, vector<128x256xbf16>, vector<128x256xbf16> -> vector<128x1280xbf16>
    %36 = tpu.concatenate %29, %35 in 0 : vector<128x1280xbf16>, vector<128x1280xbf16> -> vector<256x1280xbf16>
    %c0_31 = arith.constant 0 : index
    %c0_32 = arith.constant 0 : index
    %37 = vector.load %arg3[%c0_31, %c0_32] : memref<1280x512xbf16, #tpu.memory_space<vmem>>, vector<1280x512xbf16>
    %cst_33 = arith.constant dense<0.000000e+00> : vector<256x512xf32>
    %38 = tpu.matmul %36, %37, %cst_33 {dimension_numbers = #tpu.dot_dimension_numbers<[1], [0], [0], [1], [0, 0, 1, 1], [], []>} : vector<256x1280xbf16>, vector<1280x512xbf16>, vector<256x512xf32> -> vector<256x512xf32>
    %c0_34 = arith.constant 0 : index
    %c0_35 = arith.constant 0 : index
    %39 = vector.load %arg7[%c0_34, %c0_35] : memref<1x512xf32, #tpu.memory_space<vmem>>, vector<1x512xf32>
    %40 = vector.broadcast %39 : vector<1x512xf32> to vector<256x512xf32>
    %41 = arith.mulf %38, %40 : vector<256x512xf32>
    %c0_36 = arith.constant 0 : index
    %c0_37 = arith.constant 0 : index
    %42 = vector.load %arg8[%c0_36, %c0_37] : memref<1x512xf32, #tpu.memory_space<vmem>>, vector<1x512xf32>
    %43 = vector.broadcast %42 : vector<1x512xf32> to vector<256x512xf32>
    %44 = arith.addf %41, %43 : vector<256x512xf32>
    %cst_38 = arith.constant 0.000000e+00 : f32
    %45 = vector.broadcast %cst_38 : f32 to vector<256x512xf32>
    %46 = arith.maximumf %44, %45 : vector<256x512xf32>
    %47 = vector.extract_strided_slice %46 {offsets = [0, 0], sizes = [128, 512], strides = [1, 1]} : vector<256x512xf32> to vector<128x512xf32>
    %cst_39 = arith.constant dense<0.000000e+00> : vector<512xf32>
    %48 = vector.multi_reduction <add>, %47, %cst_39 [0] : vector<128x512xf32> to vector<512xf32>
    %49 = vector.shape_cast %48 : vector<512xf32> to vector<1x512xf32>
    %50 = vector.extract_strided_slice %47 {offsets = [0, 0], sizes = [1, 512], strides = [1, 1]} : vector<128x512xf32> to vector<1x512xf32>
    %51 = vector.extract_strided_slice %47 {offsets = [127, 0], sizes = [1, 512], strides = [1, 1]} : vector<128x512xf32> to vector<1x512xf32>
    %52 = arith.subf %49, %51 : vector<1x512xf32>
    %53 = arith.subf %49, %50 : vector<1x512xf32>
    %54 = tpu.concatenate %52, %49, %53 in 1 : vector<1x512xf32>, vector<1x512xf32>, vector<1x512xf32> -> vector<1x1536xf32>
    %55 = vector.extract_strided_slice %46 {offsets = [128, 0], sizes = [128, 512], strides = [1, 1]} : vector<256x512xf32> to vector<128x512xf32>
    %cst_40 = arith.constant dense<0.000000e+00> : vector<512xf32>
    %56 = vector.multi_reduction <add>, %55, %cst_40 [0] : vector<128x512xf32> to vector<512xf32>
    %57 = vector.shape_cast %56 : vector<512xf32> to vector<1x512xf32>
    %58 = vector.extract_strided_slice %55 {offsets = [0, 0], sizes = [1, 512], strides = [1, 1]} : vector<128x512xf32> to vector<1x512xf32>
    %59 = vector.extract_strided_slice %55 {offsets = [127, 0], sizes = [1, 512], strides = [1, 1]} : vector<128x512xf32> to vector<1x512xf32>
    %60 = arith.subf %57, %59 : vector<1x512xf32>
    %61 = arith.subf %57, %58 : vector<1x512xf32>
    %62 = tpu.concatenate %60, %57, %61 in 1 : vector<1x512xf32>, vector<1x512xf32>, vector<1x512xf32> -> vector<1x1536xf32>
    %63 = tpu.concatenate %54, %62 in 0 : vector<1x1536xf32>, vector<1x1536xf32> -> vector<2x1536xf32>
    %c0_41 = arith.constant 0 : index
    %c0_42 = arith.constant 0 : index
    %64 = vector.load %arg4[%c0_41, %c0_42] : memref<1536x128xf32, #tpu.memory_space<vmem>>, vector<1536x128xf32>
    %cst_43 = arith.constant dense<0.000000e+00> : vector<2x128xf32>
    %65 = tpu.matmul %63, %64, %cst_43 {dimension_numbers = #tpu.dot_dimension_numbers<[1], [0], [0], [1], [0, 0, 1, 1], [], []>} : vector<2x1536xf32>, vector<1536x128xf32>, vector<2x128xf32> -> vector<2x128xf32>
    %cst_44 = arith.constant 7.812500e-03 : f32
    %66 = vector.broadcast %cst_44 : f32 to vector<2x128xf32>
    %67 = arith.mulf %65, %66 : vector<2x128xf32>
    %c0_45 = arith.constant 0 : index
    %c0_46 = arith.constant 0 : index
    %68 = vector.load %arg9[%c0_45, %c0_46] : memref<1x128xf32, #tpu.memory_space<vmem>>, vector<1x128xf32>
    %69 = vector.broadcast %68 : vector<1x128xf32> to vector<2x128xf32>
    %70 = arith.mulf %67, %69 : vector<2x128xf32>
    %c0_47 = arith.constant 0 : index
    %c0_48 = arith.constant 0 : index
    %71 = vector.load %arg10[%c0_47, %c0_48] : memref<1x128xf32, #tpu.memory_space<vmem>>, vector<1x128xf32>
    %72 = vector.broadcast %71 : vector<1x128xf32> to vector<2x128xf32>
    %73 = arith.addf %70, %72 : vector<2x128xf32>
    %c0_49 = arith.constant 0 : index
    %c0_50 = arith.constant 0 : index
    %74 = vector.load %arg11[%c0_49, %c0_50] : memref<2x128xf32, #tpu.memory_space<vmem>>, vector<2x128xf32>
    tpu.vector_store %arg11[%c0_49, %c0_50], %73 {strides = array<i32>} : memref<2x128xf32, #tpu.memory_space<vmem>>, vector<2x128xf32>,
    return
  }
  func.func @transform_0(%arg0: i32) -> (i32, i32) {
    %c0_i32 = arith.constant 0 : i32
    %c0_i32_0 = arith.constant 0 : i32
    return %arg0, %c0_i32 : i32, i32
  }
  func.func @transform_1(%arg0: i32) -> (i32, i32) {
    %c0_i32 = arith.constant 0 : i32
    %c0_i32_0 = arith.constant 0 : i32
    %c0_i32_1 = arith.constant 0 : i32
    return %c0_i32, %c0_i32_0 : i32, i32
  }
  func.func @transform_2(%arg0: i32) -> (i32, i32) {
    %c0_i32 = arith.constant 0 : i32
    %c0_i32_0 = arith.constant 0 : i32
    %c0_i32_1 = arith.constant 0 : i32
    return %c0_i32, %c0_i32_0 : i32, i32
  }
  func.func @transform_3(%arg0: i32) -> (i32, i32) {
    %c0_i32 = arith.constant 0 : i32
    %c0_i32_0 = arith.constant 0 : i32
    %c0_i32_1 = arith.constant 0 : i32
    return %c0_i32, %c0_i32_0 : i32, i32
  }
  func.func @transform_4(%arg0: i32) -> (i32, i32) {
    %c0_i32 = arith.constant 0 : i32
    %c0_i32_0 = arith.constant 0 : i32
    %c0_i32_1 = arith.constant 0 : i32
    return %c0_i32, %c0_i32_0 : i32, i32
  }
  func.func @transform_5(%arg0: i32) -> (i32, i32) {
    %c0_i32 = arith.constant 0 : i32
    %c0_i32_0 = arith.constant 0 : i32
    %c0_i32_1 = arith.constant 0 : i32
    return %c0_i32, %c0_i32_0 : i32, i32
  }
  func.func @transform_6(%arg0: i32) -> (i32, i32) {
    %c0_i32 = arith.constant 0 : i32
    %c0_i32_0 = arith.constant 0 : i32
    %c0_i32_1 = arith.constant 0 : i32
    return %c0_i32, %c0_i32_0 : i32, i32
  }
  func.func @transform_7(%arg0: i32) -> (i32, i32) {
    %c0_i32 = arith.constant 0 : i32
    %c0_i32_0 = arith.constant 0 : i32
    %c0_i32_1 = arith.constant 0 : i32
    return %c0_i32, %c0_i32_0 : i32, i32
  }
  func.func @transform_8(%arg0: i32) -> (i32, i32) {
    %c0_i32 = arith.constant 0 : i32
    %c0_i32_0 = arith.constant 0 : i32
    %c0_i32_1 = arith.constant 0 : i32
    return %c0_i32, %c0_i32_0 : i32, i32
  }
  func.func @transform_9(%arg0: i32) -> (i32, i32) {
    %c0_i32 = arith.constant 0 : i32
    %c0_i32_0 = arith.constant 0 : i32
    %c0_i32_1 = arith.constant 0 : i32
    return %c0_i32, %c0_i32_0 : i32, i32
  }
  func.func @transform_10(%arg0: i32) -> (i32, i32) {
    %c0_i32 = arith.constant 0 : i32
    %c0_i32_0 = arith.constant 0 : i32
    return %arg0, %c0_i32 : i32, i32
  }
}

</mosaic_0001>

<bundles_post_ra>
// kernel: tpu_custom_call.1
= control target key start
LH: loop header
LB: loop body
LE: loop exit
PB: predicated region body
PF: predicated region fallthrough
CT: control target
= control target key end

     0   :  { %15 = vsyncpa [#allocation4], 0  ;;  %s11557_s0 = inlined_call_operand.vmem [shape: f32[256,8], index: 0, kind: input, shape index: {}]   ;;  %s11558_s1 = inlined_call_operand.hbm [shape: f32[8,256], index: 1, kind: input, shape index: {}]   ;;  %s11559_s2 = inlined_call_operand.hbm [shape: bf16[1280,512], index: 2, kind: input, shape index: {}]   ;;  %s11560_s3 = inlined_call_operand.hbm [shape: f32[1536,128], index: 3, kind: input, shape index: {}]   ;;  %s11561_s4 = inlined_call_operand.hbm [shape: f32[1,256], index: 4, kind: input, shape index: {}]   ;;  %s11562_s5 = inlined_call_operand.hbm [shape: f32[1,256], index: 5, kind: input, shape index: {}]   ;;  %s11563_s6 = inlined_call_operand.hbm [shape: f32[1,512], index: 6, kind: input, shape index: {}]   ;;  %s11564_s7 = inlined_call_operand.hbm [shape: f32[1,512], index: 7, kind: input, shape index: {}]   ;;  %s11565_s8 = inlined_call_operand.hbm [shape: f32[1,128], index: 8, kind: input, shape index: {}]   ;;  %s11566_s9 = inlined_call_operand.hbm [shape: f32[1,128], index: 9, kind: input, shape index: {}]   ;;  %s11567_s10 = inlined_call_operand.hbm [shape: f32[2,128], index: 10, kind: output, shape index: {}]  }
   0x1   :  { %16 = vsyncpa [#allocation7], 0 }
   0x2   :  { %17 = vsyncpa [#allocation10], 0 }
   0x3   :  { %18 = vsyncpa [#allocation13], 0 }
   0x4   :  { %19 = vsyncpa [#allocation16], 0 }
   0x5   :  { %20 = vsyncpa [#allocation5], 0  ;;  %s9434_s13 = smov [#allocation6]   ;;  %s9202_s17 = scalar_lea.hbm %s11559_s2, 40960 }
   0x6   :  { %s38_s14 = sshll.u32 %s9434_s13, 4  ;;  %p9203_p0 = scmp.ne.s32.totalorder %s11559_s2, %s9202_s17  ;;  %s39_s14 = int_to_ptr.vmem [resolvable:$true] %s38_s14 }
   0x7   :  { %p9206_p1 = scmp.lt.u32.totalorder %s9202_s17, %s11559_s2 }
   0x9   :  { %p9208_p2 = pnand %p9206_p1, %p9203_p0 }
   0xb   :  { %9211 = shalt.err (!%p9208_p2)
}
   0xc   :  { %s9212_s22 = scalar_lea.vmem %s39_s14, 40960  ;;  %p9217_p4 = scmp.lt.s32.totalorder %s39_s14, %s39_s14 }
   0xd   :  { %p9213_p3 = scmp.ne.s32.totalorder %s39_s14, %s9212_s22  ;;  %p9218_p5 = scmp.lt.s32.totalorder %s9212_s22, %s9212_s22 }
   0xf   :  { %p9219_p6 = por %p9218_p5, %p9217_p4 }
  0x11   :  { %p9220_p7 = pnand %p9219_p6, %p9213_p3 }
  0x13   :  { %9223 = shalt.err (!%p9220_p7)
}
  0x14   :  { %s9435_s23 = smov 256   ;;  %s9436_s24 = smov 16  }
  0x15   :  { %44 = dma.hbm_to_vmem [thread:$0]  %s11559_s2, 40960, %s39_s14, [#allocation7], %s9435_s23, %s9435_s23, %s9436_s24  }
  0x16   :  { %s9437_s27 = smov [#allocation9]   ;;  %s9438_s29 = smov [#allocation12]  }
  0x17   :  { %s63_s28 = sshll.u32 %s9437_s27, 4  ;;  %s83_s30 = sshll.u32 %s9438_s29, 4  ;;  %s64_s28 = int_to_ptr.vmem [resolvable:$true] %s63_s28  ;;  %s84_s30 = int_to_ptr.vmem [resolvable:$true] %s83_s30 }
  0x18   :  { %s9224_s13 = scalar_lea.hbm %s11561_s4, 32 }
  0x19   :  { %p9225_p8 = scmp.ne.s32.totalorder %s11561_s4, %s9224_s13  ;;  %p9228_p9 = scmp.lt.u32.totalorder %s9224_s13, %s11561_s4 }
  0x1b   :  { %p9230_p10 = pnand %p9228_p9, %p9225_p8 }
  0x1d   :  { %9233 = shalt.err (!%p9230_p10)
}
  0x1e   :  { %s9234_s2 = scalar_lea.vmem %s64_s28, 32  ;;  %p9239_p12 = scmp.lt.s32.totalorder %s64_s28, %s64_s28 }
  0x1f   :  { %p9235_p11 = scmp.ne.s32.totalorder %s64_s28, %s9234_s2  ;;  %p9240_p13 = scmp.lt.s32.totalorder %s9234_s2, %s9234_s2 }
  0x21   :  { %p9241_p0 = por %p9240_p13, %p9239_p12 }
  0x23   :  { %p9242_p1 = pnand %p9241_p0, %p9235_p11 }
  0x25   :  { %9245 = shalt.err (!%p9242_p1)
}
  0x26   :  { %66 = dma.hbm_to_vmem [thread:$0]  %s11561_s4, 32, %s64_s28, [#allocation10]  }
  0x27   :  { %s9246_s22 = scalar_lea.hbm %s11563_s6, 64 }
  0x28   :  { %p9247_p2 = scmp.ne.s32.totalorder %s11563_s6, %s9246_s22  ;;  %p9250_p3 = scmp.lt.u32.totalorder %s9246_s22, %s11563_s6 }
  0x2a   :  { %p9252_p4 = pnand %p9250_p3, %p9247_p2 }
  0x2c   :  { %9255 = shalt.err (!%p9252_p4)
}
  0x2d   :  { %s9256_s27 = scalar_lea.vmem %s84_s30, 64  ;;  %p9261_p6 = scmp.lt.s32.totalorder %s84_s30, %s84_s30 }
  0x2e   :  { %p9257_p5 = scmp.ne.s32.totalorder %s84_s30, %s9256_s27  ;;  %p9262_p7 = scmp.lt.s32.totalorder %s9256_s27, %s9256_s27 }
  0x30   :  { %p9263_p8 = por %p9262_p7, %p9261_p6 }
  0x32   :  { %p9264_p9 = pnand %p9263_p8, %p9257_p5 }
  0x34   :  { %9267 = shalt.err (!%p9264_p9)
}
  0x35   :  { %86 = dma.hbm_to_vmem [thread:$0]  %s11563_s6, 64, %s84_s30, [#allocation13]  }
  0x36   :  { %s9439_s29 = smov [#allocation15]   ;;  %s9440_s12 = smov [#allocation3]  }
  0x37   :  { %s103_s11 = sshll.u32 %s9439_s29, 4  ;;  %s29_s13 = sshll.u32 %s9440_s12, 4  ;;  %s104_s11 = int_to_ptr.vmem [resolvable:$true] %s103_s11  ;;  %s30_s13 = int_to_ptr.vmem [resolvable:$true] %s29_s13 }
  0x38   :  { %s9268_s17 = scalar_lea.hbm %s11565_s8, 16 }
  0x39   :  { %p9269_p10 = scmp.ne.s32.totalorder %s11565_s8, %s9268_s17  ;;  %p9272_p11 = scmp.lt.u32.totalorder %s9268_s17, %s11565_s8 }
  0x3b   :  { %p9274_p12 = pnand %p9272_p11, %p9269_p10 }
  0x3d   :  { %9277 = shalt.err (!%p9274_p12)
}
  0x3e   :  { %s9278_s6 = scalar_lea.vmem %s104_s11, 16  ;;  %s9282_s30 = scalar_lea.vmem %s104_s11, 32 }
  0x3f   :  { %p9279_p13 = scmp.ne.s32.totalorder %s104_s11, %s9278_s6  ;;  %p9283_p0 = scmp.lt.s32.totalorder %s104_s11, %s104_s11 }
  0x40   :  { %p9284_p1 = scmp.lt.s32.totalorder %s9282_s30, %s9278_s6 }
  0x42   :  { %p9285_p2 = por %p9284_p1, %p9283_p0 }
  0x44   :  { %p9286_p3 = pnand %p9285_p2, %p9279_p13 }
  0x46   :  { %9289 = shalt.err (!%p9286_p3)
}
  0x47   :  { %106 = dma.hbm_to_vmem [thread:$0]  %s11565_s8, 16, %s104_s11, [#allocation16]  }
  0x48   :  { %s9290_s24 = scalar_lea.hbm %s11558_s1, 256 }
  0x49   :  { %p9291_p4 = scmp.ne.s32.totalorder %s11558_s1, %s9290_s24  ;;  %p9294_p5 = scmp.lt.u32.totalorder %s9290_s24, %s11558_s1 }
  0x4b   :  { %p9296_p6 = pnand %p9294_p5, %p9291_p4 }
  0x4d   :  { %9299 = shalt.err (!%p9296_p6)
}
  0x4e   :  { %s9300_s28 = scalar_lea.vmem %s30_s13, 256  ;;  %p9305_p8 = scmp.lt.s32.totalorder %s30_s13, %s30_s13 }
  0x4f   :  { %p9301_p7 = scmp.ne.s32.totalorder %s30_s13, %s9300_s28  ;;  %p9306_p9 = scmp.lt.s32.totalorder %s9300_s28, %s9300_s28 }
  0x51   :  { %p9307_p10 = por %p9306_p9, %p9305_p8 }
  0x53   :  { %p9308_p11 = pnand %p9307_p10, %p9301_p7 }
  0x55   :  { %9311 = shalt.err (!%p9308_p11)
}
  0x56   :  { %32 = dma.hbm_to_vmem [thread:$0]  %s11558_s1, 256, %s30_s13, [#allocation4]  }
  0x57   :  { %s9441_s11 = smov [#allocation8]   ;;  %s9312_s17 = scalar_lea.hbm %s11560_s3, 24576 }
  0x58   :  { %s50_s12 = sshll.u32 %s9441_s11, 4  ;;  %p9313_p12 = scmp.ne.s32.totalorder %s11560_s3, %s9312_s17  ;;  %s51_s12 = int_to_ptr.vmem [resolvable:$true] %s50_s12 }
  0x59   :  { %p9316_p13 = scmp.lt.u32.totalorder %s9312_s17, %s11560_s3 }
  0x5b   :  { %p9318_p0 = pnand %p9316_p13, %p9313_p12 }
  0x5d   :  { %9321 = shalt.err (!%p9318_p0)
}
  0x5e   :  { %s9322_s6 = scalar_lea.vmem %s51_s12, 24576  ;;  %p9327_p2 = scmp.lt.s32.totalorder %s51_s12, %s51_s12 }
  0x5f   :  { %p9323_p1 = scmp.ne.s32.totalorder %s51_s12, %s9322_s6  ;;  %p9328_p3 = scmp.lt.s32.totalorder %s9322_s6, %s9322_s6 }
  0x61   :  { %p9329_p4 = por %p9328_p3, %p9327_p2 }
  0x63   :  { %p9330_p5 = pnand %p9329_p4, %p9323_p1 }
  0x65   :  { %9333 = shalt.err (!%p9330_p5)
}
  0x66   :  { %s9442_s1 = smov 128   ;;  %s9443_s13 = smov 8  }
  0x67   :  { %56 = dma.hbm_to_vmem [thread:$0]  %s11560_s3, 24576, %s51_s12, [#allocation7], %s9442_s1, %s9442_s1, %s9443_s13  }
  0x68   :  { %s9444_s21 = smov [#allocation11]   ;;  %s9445_s23 = smov [#allocation14]  }
  0x69   :  { %s73_s22 = sshll.u32 %s9444_s21, 4  ;;  %s93_s24 = sshll.u32 %s9445_s23, 4  ;;  %s74_s22 = int_to_ptr.vmem [resolvable:$true] %s73_s22  ;;  %s94_s24 = int_to_ptr.vmem [resolvable:$true] %s93_s24 }
  0x6a   :  { %s9334_s27 = scalar_lea.hbm %s11562_s5, 32 }
  0x6b   :  { %p9335_p6 = scmp.ne.s32.totalorder %s11562_s5, %s9334_s27  ;;  %p9338_p7 = scmp.lt.u32.totalorder %s9334_s27, %s11562_s5 }
  0x6d   :  { %p9340_p8 = pnand %p9338_p7, %p9335_p6 }
  0x6f   :  { %9343 = shalt.err (!%p9340_p8)
}
  0x70   :  { %s9344_s3 = scalar_lea.vmem %s74_s22, 32  ;;  %p9349_p10 = scmp.lt.s32.totalorder %s74_s22, %s74_s22 }
  0x71   :  { %p9345_p9 = scmp.ne.s32.totalorder %s74_s22, %s9344_s3  ;;  %p9350_p11 = scmp.lt.s32.totalorder %s9344_s3, %s9344_s3 }
  0x73   :  { %p9351_p12 = por %p9350_p11, %p9349_p10 }
  0x75   :  { %p9352_p13 = pnand %p9351_p12, %p9345_p9 }
  0x77   :  { %9355 = shalt.err (!%p9352_p13)
}
  0x78   :  { %76 = dma.hbm_to_vmem [thread:$0]  %s11562_s5, 32, %s74_s22, [#allocation10]  }
  0x79   :  { %s9356_s17 = scalar_lea.hbm %s11564_s7, 64 }
  0x7a   :  { %p9357_p0 = scmp.ne.s32.totalorder %s11564_s7, %s9356_s17  ;;  %p9360_p1 = scmp.lt.u32.totalorder %s9356_s17, %s11564_s7 }
  0x7c   :  { %p9362_p2 = pnand %p9360_p1, %p9357_p0 }
  0x7e   :  { %9365 = shalt.err (!%p9362_p2)
}
  0x7f   :  { %s9366_s6 = scalar_lea.vmem %s94_s24, 64  ;;  %p9371_p4 = scmp.lt.s32.totalorder %s94_s24, %s94_s24 }
  0x80   :  { %p9367_p3 = scmp.ne.s32.totalorder %s94_s24, %s9366_s6  ;;  %p9372_p5 = scmp.lt.s32.totalorder %s9366_s6, %s9366_s6 }
  0x82   :  { %p9373_p6 = por %p9372_p5, %p9371_p4 }
  0x84   :  { %p9374_p7 = pnand %p9373_p6, %p9367_p3 }
  0x86   :  { %9377 = shalt.err (!%p9374_p7)
}
  0x87   :  { %96 = dma.hbm_to_vmem [thread:$0]  %s11564_s7, 64, %s94_s24, [#allocation13]  }
  0x88   :  { %s9446_s13 = smov [#allocation17]   ;;  %s9378_s22 = scalar_lea.hbm %s11566_s9, 16 }
  0x89   :  { %s113_s30 = sshll.u32 %s9446_s13, 4  ;;  %p9379_p8 = scmp.ne.s32.totalorder %s11566_s9, %s9378_s22  ;;  %s114_s30 = int_to_ptr.vmem [resolvable:$true] %s113_s30 }
  0x8a   :  { %p9382_p9 = scmp.lt.u32.totalorder %s9378_s22, %s11566_s9 }
  0x8c   :  { %p9384_p10 = pnand %p9382_p9, %p9379_p8 }
  0x8e   :  { %9387 = shalt.err (!%p9384_p10)
}
  0x8f   :  { %s9388_s4 = scalar_lea.vmem %s114_s30, 16  ;;  %s9392_s7 = scalar_lea.vmem %s114_s30, 32 }
  0x90   :  { %p9389_p11 = scmp.ne.s32.totalorder %s114_s30, %s9388_s4  ;;  %p9393_p12 = scmp.lt.s32.totalorder %s114_s30, %s114_s30 }
  0x91   :  { %p9394_p13 = scmp.lt.s32.totalorder %s9392_s7, %s9388_s4 }
  0x93   :  { %p9395_p0 = por %p9394_p13, %p9393_p12 }
  0x95   :  { %p9396_p1 = pnand %p9395_p0, %p9389_p11 }
  0x97   :  { %9399 = shalt.err (!%p9396_p1)
}
  0x98   :  { %116 = dma.hbm_to_vmem [thread:$0]  %s11566_s9, 16, %s114_s30, [#allocation16]  }
  0x99   :  { %9422 = dma.done.wait [#allocation4], 256  }
  0x9a   :  { %9423 = vsyncadd [#allocation4], 4294967040 }
  0x9b   :  { %9424 = dma.done.wait [#allocation7], 65536  }
  0x9c   :  { %9425 = vsyncadd [#allocation7], 4294901760 }
  0x9d   :  { %9426 = dma.done.wait [#allocation10], 64  }
  0x9e   :  { %9427 = vsyncadd [#allocation10], 4294967232 }
  0x9f   :  { %9428 = dma.done.wait [#allocation13], 128  }
  0xa0   :  { %9429 = vsyncadd [#allocation13], 4294967168 }
  0xa1   :  { %9430 = dma.done.wait [#allocation16], 32  }
  0xa2   :  { %9431 = vsyncadd [#allocation16], 4294967264  ;;  %v9447_v0 = vmov 0.0   ;;  %v178_v1 = vld [vmem:[#allocation3 + $0x8] sm:$0xff]  ;;  %v177_v2 = vld [vmem:[#allocation3] sm:$0xff]  ;;  %vm179_vm0 = vcmask 64512  }
  0xa3   :  { %340 = vmatprep.mubr.f32.mxu0 %v9447_v0  ;;  %v145_v3 = vld [vmem:[%s11557_s0] sm:$0xff]  ;;  %276 = vmatprep.subr.mxu0 %v178_v1  ;;  %v146_v4 = vld [vmem:[%s11557_s0 + $0x8] sm:$0xff]  ;;  %v147_v5 = vld [vmem:[%s11557_s0 + $0x10] sm:$0xff]  ;;  %vm801_vm1 = vcmask 1043456   ;;  %vm1658_vm2 = vcmask 1044480   ;;  %vm1141_vm4 = vcmask 1046528  }
  0xa4   :  { %277 = vmatpush1.msra.mxu0 %v177_v2  ;;  %v148_v6 = vld [vmem:[%s11557_s0 + $0x18] sm:$0xff]  ;;  %v149_v10 = vld [vmem:[%s11557_s0 + $0x20] sm:$0xff]  ;;  %v150_v14 = vld [vmem:[%s11557_s0 + $0x28] sm:$0xff]  ;;  %vm980_vm3 = vsmask.f32 7424  ;;  %vm1271_vm6 = vcmask 1045504  }
  0xa5   :  { %7367 = vmatmul.mubr.msk.f32.vlgmr.msra.gmra.mrb[0].mxu0 %vm179_vm0, %v145_v3  ;;  %v8659_v7 = vld [vmem:[#allocation6 + $0x8] ss:$16 sps:$4 sm:$0xff]   ;;  %v8661_v8 = vld [vmem:[#allocation6 + $0xc] ss:$16 sps:$4 sm:$0xff]   ;;  %v8671_v13 = vld [vmem:[#allocation6 + $0x4] ss:$16 sps:$4 sm:$0xff]  }
  0xa6   :  { %346 = vmatprep.mubr.f32.mxu0 %v9447_v0  ;;  %v8664_v9 = vld [vmem:[#allocation6 + $0x2c] ss:$16 sps:$4 sm:$0xff]   ;;  %5048 = vmatprep.subr.bf16.mxu0 %v8661_v8  ;;  %v8662_v11 = vld [vmem:[#allocation6 + $0x28] ss:$16 sps:$4 sm:$0xff]   ;;  %v8676_v16 = vld [vmem:[#allocation6] ss:$16 sps:$4 sm:$0xff]  }
  0xa7   :  { %5049 = vmatpush1.bf16.msra.mxu0 %v8659_v7  ;;  %v8667_v12 = vld [vmem:[#allocation6 + $0x4c] ss:$16 sps:$4 sm:$0xff]   ;;  %v8665_v15 = vld [vmem:[#allocation6 + $0x48] ss:$16 sps:$4 sm:$0xff]   ;;  %4083 = vmatprep.subr.bf16.mxu1 %v8671_v13  ;;  %v8677_v18 = vld [vmem:[#allocation6 + $0x24] ss:$16 sps:$4 sm:$0xff]  }
  0xa8   :  { %5050 = vmatprep.subr.bf16.mxu0 %v8664_v9  ;;  %v8670_v17 = vld [vmem:[#allocation6 + $0x6c] ss:$16 sps:$4 sm:$0xff]   ;;  %4084 = vmatpush1.bf16.msra.mxu1 %v8676_v16  ;;  %v8679_v19 = vld [vmem:[#allocation6 + $0x20] ss:$16 sps:$4 sm:$0xff]   ;;  %v8680_v20 = vld [vmem:[#allocation6 + $0x44] ss:$16 sps:$4 sm:$0xff]  }
  0xa9   :  { %7368 = vmatmul.mubr.msk.f32.gmra.mrb[2].mxu0 %vm179_vm0, %v146_v4  ;;  %4085 = vmatprep.subr.bf16.mxu1 %v8677_v18  ;;  %v151_v21 = vld [vmem:[%s11557_s0 + $0x30] sm:$0xff]  ;;  %v8668_v22 = vld [vmem:[#allocation6 + $0x68] ss:$16 sps:$4 sm:$0xff]   ;;  %v8675_v23 = vld [vmem:[#allocation6 + $0x8c] ss:$16 sps:$4 sm:$0xff]   ;;  %vm6705_vm7 = vcmask 1040384  }
  0xaa   :  { %352 = vmatprep.mubr.f32.mxu0 %v9447_v0  ;;  %v8685_v24 = vld [vmem:[#allocation6 + $0x40] ss:$16 sps:$4 sm:$0xff]   ;;  %v8686_v25 = vld [vmem:[#allocation6 + $0x64] ss:$16 sps:$4 sm:$0xff]   ;;  %v152_v26 = vld [vmem:[%s11557_s0 + $0x38] sm:$0xff] }
  0xab   :  { %5051 = vmatpush1.bf16.msra.mxu0 %v8662_v11  ;;  %v8673_v27 = vld [vmem:[#allocation6 + $0x88] ss:$16 sps:$4 sm:$0xff]   ;;  %v8684_v28 = vld [vmem:[#allocation6 + $0xac] ss:$16 sps:$4 sm:$0xff]   ;;  %v8688_v29 = vld [vmem:[#allocation6 + $0x60] ss:$16 sps:$4 sm:$0xff]  }
  0xac   :  { %5052 = vmatprep.subr.bf16.mxu0 %v8667_v12  ;;  %4086 = vmatpush1.bf16.msra.mxu1 %v8679_v19  ;;  %v153_v30 = vld [vmem:[%s11557_s0 + $0x40] sm:$0xff]  ;;  %v8682_v31 = vld [vmem:[#allocation6 + $0xa8] ss:$16 sps:$4 sm:$0xff]   ;;  %v8693_v33 = vld [vmem:[#allocation6 + $0xcc] ss:$16 sps:$4 sm:$0xff]  }
  0xad   :  { %7369 = vmatmul.mubr.msk.f32.gmra.mrb[4].mxu0 %vm179_vm0, %v147_v5  ;;  %4087 = vmatprep.subr.bf16.mxu1 %v8680_v20  ;;  %v8689_v32 = vld [vmem:[#allocation6 + $0x84] ss:$16 sps:$4 sm:$0xff]   ;;  %v8694_v34 = vld [vmem:[#allocation6 + $0x80] ss:$16 sps:$4 sm:$0xff]   ;;  %v154_v36 = vld [vmem:[%s11557_s0 + $0x48] sm:$0xff]  ;;  %v9448_v20 = vmov 0  }
  0xae   :  { %358 = vmatprep.mubr.f32.mxu0 %v9447_v0  ;;  %v8695_v35 = vld [vmem:[#allocation6 + $0xa4] ss:$16 sps:$4 sm:$0xff]   ;;  %v8691_v37 = vld [vmem:[#allocation6 + $0xc8] ss:$16 sps:$4 sm:$0xff]   ;;  %v8697_v38 = vld [vmem:[#allocation6 + $0xa0] ss:$16 sps:$4 sm:$0xff]  }
  0xaf   :  { %5053 = vmatpush1.bf16.msra.mxu0 %v8665_v15  ;;  %v8702_v39 = vld [vmem:[#allocation6 + $0xec] ss:$16 sps:$4 sm:$0xff]   ;;  %v8698_v40 = vld [vmem:[#allocation6 + $0xc4] ss:$16 sps:$4 sm:$0xff]   ;;  %v8700_v42 = vld [vmem:[#allocation6 + $0xe8] ss:$16 sps:$4 sm:$0xff]  }
  0xb0   :  { %5054 = vmatprep.subr.bf16.mxu0 %v8670_v17  ;;  %4088 = vmatpush1.bf16.msra.mxu1 %v8685_v24  ;;  %v155_v41 = vld [vmem:[%s11557_s0 + $0x50] sm:$0xff]  ;;  %v156_v44 = vld [vmem:[%s11557_s0 + $0x58] sm:$0xff]  ;;  %v157_v45 = vld [vmem:[%s11557_s0 + $0x60] sm:$0xff]  ;;  %782 = vst [vmem:[#allocation2 + $0x8] sm:$0xf] %v9448_v20 }
  0xb1   :  { %7370 = vmatmul.mubr.msk.f32.gmra.mrb[6].mxu0 %vm179_vm0, %v148_v6  ;;  %4089 = vmatprep.subr.bf16.mxu1 %v8686_v25  ;;  %v8703_v43 = vld [vmem:[#allocation6 + $0xc0] ss:$16 sps:$4 sm:$0xff]   ;;  %v158_v46 = vld [vmem:[%s11557_s0 + $0x68] sm:$0xff]  ;;  %v160_v48 = vld [vmem:[%s11557_s0 + $0x78] sm:$0xff]  ;;  %781 = vst [vmem:[#allocation2] sm:$0xf] %v9448_v20 }
  0xb2   :  { %364 = vmatprep.mubr.f32.mxu0 %v9447_v0  ;;  %v159_v47 = vld [vmem:[%s11557_s0 + $0x70] sm:$0xff]  ;;  %v161_v49 = vld [vmem:[%s11557_s0 + $0x80] sm:$0xff]  ;;  %v162_v50 = vld [vmem:[%s11557_s0 + $0x88] sm:$0xff]  ;;  %783 = vst [vmem:[#allocation2 + $0x80] sm:$0xf0] %v9448_v20 }
  0xb3   :  { %5055 = vmatpush1.bf16.msra.mxu0 %v8668_v22  ;;  %v163_v51 = vld [vmem:[%s11557_s0 + $0x90] sm:$0xff]  ;;  %v164_v52 = vld [vmem:[%s11557_s0 + $0x98] sm:$0xff]  ;;  %v165_v54 = vld [vmem:[%s11557_s0 + $0xa0] sm:$0xff]  ;;  %784 = vst [vmem:[#allocation2 + $0x88] sm:$0xf0] %v9448_v20 }
  0xb4   :  { %5056 = vmatprep.subr.bf16.mxu0 %v8675_v23  ;;  %4090 = vmatpush1.bf16.msra.mxu1 %v8688_v29  ;;  %v8704_v53 = vld [vmem:[#allocation6 + $0xe4] ss:$16 sps:$4 sm:$0xff]   ;;  %v8706_v55 = vld [vmem:[#allocation6 + $0xe0] ss:$16 sps:$4 sm:$0xff]   ;;  %v8711_v57 = vld [vmem:[#allocation6 + $0x10c] ss:$16 sps:$4 sm:$0xff]  }
  0xb5   :  { %7371 = vmatmul.mubr.msk.f32.gmra.mrb[8].mxu0 %vm179_vm0, %v149_v10  ;;  %4091 = vmatprep.subr.bf16.mxu1 %v8689_v32  ;;  %v8707_v56 = vld [vmem:[#allocation6 + $0x104] ss:$16 sps:$4 sm:$0xff]   ;;  %v8709_v58 = vld [vmem:[#allocation6 + $0x108] ss:$16 sps:$4 sm:$0xff]   ;;  %v8712_v59 = vld [vmem:[#allocation6 + $0x100] ss:$16 sps:$4 sm:$0xff]  }
  0xb6   :  { %370 = vmatprep.mubr.f32.mxu0 %v9447_v0  ;;  %v166_v60 = vld [vmem:[%s11557_s0 + $0xa8] sm:$0xff]  ;;  %v8713_v61 = vld [vmem:[#allocation6 + $0x124] ss:$16 sps:$4 sm:$0xff]   ;;  %v8715_v1 = vld [vmem:[#allocation6 + $0x120] ss:$16 sps:$4 sm:$0xff]  }
  0xb7   :  { %5057 = vmatpush1.bf16.msra.mxu0 %v8673_v27  ;;  %v8718_v62 = vld [vmem:[#allocation6 + $0x12c] ss:$16 sps:$4 sm:$0xff]   ;;  %v167_v63 = vld [vmem:[%s11557_s0 + $0xb0] sm:$0xff]  ;;  %v8716_v2 = vld [vmem:[#allocation6 + $0x128] ss:$16 sps:$4 sm:$0xff]  }
  0xb8   :  { %5058 = vmatprep.subr.bf16.mxu0 %v8684_v28  ;;  %4092 = vmatpush1.bf16.msra.mxu1 %v8694_v34  ;;  %v8719_v3 = vld [vmem:[#allocation6 + $0x144] ss:$16 sps:$4 sm:$0xff]   ;;  %v8724_v4 = vld [vmem:[#allocation6 + $0x14c] ss:$16 sps:$4 sm:$0xff]   ;;  %v8721_v6 = vld [vmem:[#allocation6 + $0x140] ss:$16 sps:$4 sm:$0xff]  }
  0xb9   :  { %7372 = vmatmul.mubr.msk.f32.gmra.mrb[10].mxu0 %vm179_vm0, %v150_v14  ;;  %4093 = vmatprep.subr.bf16.mxu1 %v8695_v35  ;;  %v168_v5 = vld [vmem:[%s11557_s0 + $0xb8] sm:$0xff]  ;;  %v8725_v8 = vld [vmem:[#allocation6 + $0x164] ss:$16 sps:$4 sm:$0xff]   ;;  %v8727_v11 = vld [vmem:[#allocation6 + $0x160] ss:$16 sps:$4 sm:$0xff]  }
  0xba   :  { %376 = vmatprep.mubr.f32.mxu0 %v9447_v0  ;;  %v8722_v7 = vld [vmem:[#allocation6 + $0x148] ss:$16 sps:$4 sm:$0xff]   ;;  %v8730_v9 = vld [vmem:[#allocation6 + $0x16c] ss:$16 sps:$4 sm:$0xff]   ;;  %v169_v10 = vld [vmem:[%s11557_s0 + $0xc0] sm:$0xff] }
  0xbb   :  { %5059 = vmatpush1.bf16.msra.mxu0 %v8682_v31  ;;  %v8728_v12 = vld [vmem:[#allocation6 + $0x168] ss:$16 sps:$4 sm:$0xff]   ;;  %v8731_v13 = vld [vmem:[#allocation6 + $0x184] ss:$16 sps:$4 sm:$0xff]   ;;  %v8736_v14 = vld [vmem:[#allocation6 + $0x18c] ss:$16 sps:$4 sm:$0xff]  }
  0xbc   :  { %5060 = vmatprep.subr.bf16.mxu0 %v8693_v33  ;;  %4094 = vmatpush1.bf16.msra.mxu1 %v8697_v38  ;;  %v170_v15 = vld [vmem:[%s11557_s0 + $0xc8] sm:$0xff]  ;;  %v8733_v16 = vld [vmem:[#allocation6 + $0x180] ss:$16 sps:$4 sm:$0xff]   ;;  %v8737_v18 = vld [vmem:[#allocation6 + $0x1a4] ss:$16 sps:$4 sm:$0xff]  }
  0xbd   :  { %7373 = vmatmul.mubr.msk.f32.gmra.mrb[12].mxu0 %vm179_vm0, %v151_v21  ;;  %4095 = vmatprep.subr.bf16.mxu1 %v8698_v40  ;;  %v8734_v17 = vld [vmem:[#allocation6 + $0x188] ss:$16 sps:$4 sm:$0xff]   ;;  %v8742_v19 = vld [vmem:[#allocation6 + $0x1ac] ss:$16 sps:$4 sm:$0xff]   ;;  %868 = vst [vmem:[#allocation2 + $0x90] sm:$0xf] %v9448_v20 }
  0xbe   :  { %382 = vmatprep.mubr.f32.mxu0 %v9447_v0  ;;  %869 = vst [vmem:[#allocation2 + $0x98] sm:$0xf] %v9448_v20  ;;  %870 = vst [vmem:[#allocation2 + $0x110] sm:$0xf0] %v9448_v20  ;;  %v171_v21 = vld [vmem:[%s11557_s0 + $0xd0] sm:$0xff]  ;;  %v173_v31 = vld [vmem:[%s11557_s0 + $0xe0] sm:$0xff] }
  0xbf   :  { %5061 = vmatpush1.bf16.msra.mxu0 %v8691_v37  ;;  %871 = vst [vmem:[#allocation2 + $0x118] sm:$0xf0] %v9448_v20  ;;  %v8739_v22 = vld [vmem:[#allocation6 + $0x1a0] ss:$16 sps:$4 sm:$0xff]   ;;  %v8740_v23 = vld [vmem:[#allocation6 + $0x1a8] ss:$16 sps:$4 sm:$0xff]  }
  0xc0   :  { %5062 = vmatprep.subr.bf16.mxu0 %v8702_v39  ;;  %4096 = vmatpush1.bf16.msra.mxu1 %v8703_v43  ;;  %v8743_v24 = vld [vmem:[#allocation6 + $0x1c4] ss:$16 sps:$4 sm:$0xff]   ;;  %v8748_v25 = vld [vmem:[#allocation6 + $0x1cc] ss:$16 sps:$4 sm:$0xff]   ;;  %v8745_v27 = vld [vmem:[#allocation6 + $0x1c0] ss:$16 sps:$4 sm:$0xff]   ;;  %v535_v39 = vlaneseq }
  0xc1   :  { %7374 = vmatmul.mubr.msk.f32.gmra.mrb[14].mxu0 %vm179_vm0, %v152_v26  ;;  %4097 = vmatprep.subr.bf16.mxu1 %v8704_v53  ;;  %v172_v26 = vld [vmem:[%s11557_s0 + $0xd8] sm:$0xff]  ;;  %v8749_v29 = vld [vmem:[#allocation6 + $0x1e4] ss:$16 sps:$4 sm:$0xff]   ;;  %v8751_v32 = vld [vmem:[#allocation6 + $0x1e0] ss:$16 sps:$4 sm:$0xff]  }
  0xc2   :  { %388 = vmatprep.mubr.f32.mxu0 %v9447_v0  ;;  %v8746_v28 = vld [vmem:[#allocation6 + $0x1c8] ss:$16 sps:$4 sm:$0xff]   ;;  %v175_v35 = vld [vmem:[%s11557_s0 + $0xf0] sm:$0xff]  ;;  %v8772_v38 = vld [vmem:[#allocation6 + $0x20c] ss:$16 sps:$4 sm:$0xff]   ;;  %v9773_v40 = vshrl.u32 %v535_v39, 7 }
  0xc3   :  { %5063 = vmatpush1.bf16.msra.mxu0 %v8700_v42  ;;  %v8752_v33 = vld [vmem:[#allocation6 + $0x1e8] ss:$16 sps:$4 sm:$0xff]   ;;  %v8757_v37 = vld [vmem:[#allocation6 + $0x204] ss:$16 sps:$4 sm:$0xff]   ;;  %v533_v42 = vld [vmem:[#allocation9] sm:$0x3] }
  0xc4   :  { %4098 = vmatpush1.bf16.msra.mxu1 %v8706_v55  ;;  %5064 = vmatprep.subr.bf16.mxu0 %v8711_v57  ;;  %v174_v34 = vld [vmem:[%s11557_s0 + $0xe8] sm:$0xff]  ;;  %11661 = vst [vmem:[#allocation25_spill] sm:$0xff] %v9773_v40  ;;  %v9779_v43 = vsub.s32 1, %v9773_v40  ;;  %vm1176_vm5 = vsmask.f32 6400 }
  0xc5   :  { %7375 = vmatmul.mubr.msk.f32.gmra.mrb[16].mxu0 %vm179_vm0, %v153_v30  ;;  %4099 = vmatprep.subr.bf16.mxu1 %v8707_v56  ;;  %v8754_v30 = vld [vmem:[#allocation6 + $0x1ec] ss:$16 sps:$4 sm:$0xff]  }
  0xc6   :  { %394 = vmatprep.mubr.f32.mxu0 %v9447_v0  ;;  %11663 = vst [vmem:[#allocation27_spill] sm:$0xff] %v9779_v43 }
  0xc7   :  { %5065 = vmatpush1.bf16.msra.mxu0 %v8709_v58 }
  0xc8   :  { %4100 = vmatpush1.bf16.msra.mxu1 %v8712_v59  ;;  %5066 = vmatprep.subr.bf16.mxu0 %v8718_v62 }
  0xc9   :  { %7376 = vmatmul.mubr.msk.f32.gmra.mrb[18].mxu0 %vm179_vm0, %v154_v36  ;;  %4101 = vmatprep.subr.bf16.mxu1 %v8713_v61  ;;  %v176_v36 = vld [vmem:[%s11557_s0 + $0xf8] sm:$0xff]  ;;  %s9449_s0 = smov [#allocation18]  }
  0xca   :  { %400 = vmatprep.mubr.f32.mxu0 %v9447_v0  ;;  %s7354_s15 = sshll.u32 %s9449_s0, 4  ;;  %s7355_s15 = int_to_ptr.vmem [resolvable:$true] %s7354_s15 }
  0xcb   :  { %5067 = vmatpush1.bf16.msra.mxu0 %v8716_v2  ;;  %s9400_s16 = scalar_lea.vmem %s7355_s15, 32  ;;  %p9405_p3 = scmp.lt.s32.totalorder %s7355_s15, %s7355_s15 }
  0xcc   :  { %4102 = vmatpush1.bf16.msra.mxu1 %v8715_v1  ;;  %5068 = vmatprep.subr.bf16.mxu0 %v8724_v4  ;;  %p9401_p2 = scmp.ne.s32.totalorder %s7355_s15, %s9400_s16  ;;  %p9406_p4 = scmp.lt.s32.totalorder %s9400_s16, %s9400_s16 }
  0xcd   :  { %7377 = vmatmul.mubr.msk.f32.gmra.mrb[20].mxu0 %vm179_vm0, %v155_v41  ;;  %4103 = vmatprep.subr.bf16.mxu1 %v8719_v3  ;;  %v9776_v41 = vsub.s32 0, %v9773_v40 }
  0xce   :  { %406 = vmatprep.mubr.f32.mxu0 %v9447_v0  ;;  %p9407_p5 = por %p9406_p4, %p9405_p3 }
  0xcf   :  { %5069 = vmatpush1.bf16.msra.mxu0 %v8722_v7  ;;  %11662 = vst [vmem:[#allocation26_spill] sm:$0xff] %v9776_v41 }
  0xd0   :  { %4104 = vmatpush1.bf16.msra.mxu1 %v8721_v6  ;;  %5070 = vmatprep.subr.bf16.mxu0 %v8730_v9  ;;  %p9408_p6 = pnand %p9407_p5, %p9401_p2 }
  0xd1   :  { %7378 = vmatmul.mubr.msk.f32.gmra.mrb[22].mxu0 %vm179_vm0, %v156_v44  ;;  %4105 = vmatprep.subr.bf16.mxu1 %v8725_v8  ;;  %v9782_v44 = vrot.slane %v533_v42, %v9776_v41 }
  0xd2   :  { %412 = vmatprep.mubr.f32.mxu0 %v9447_v0 }
  0xd3   :  { %5071 = vmatpush1.bf16.msra.mxu0 %v8728_v12 }
  0xd4   :  { %4106 = vmatpush1.bf16.msra.mxu1 %v8727_v11  ;;  %5072 = vmatprep.subr.bf16.mxu0 %v8736_v14 }
  0xd5   :  { %7379 = vmatmul.mubr.msk.f32.gmra.mrb[24].mxu0 %vm179_vm0, %v157_v45  ;;  %4107 = vmatprep.subr.bf16.mxu1 %v8731_v13  ;;  %v9785_v45 = vrot.slane %v533_v42, %v9779_v43 }
  0xd6   :  { %418 = vmatprep.mubr.f32.mxu0 %v9447_v0 }
  0xd7   :  { %5073 = vmatpush1.bf16.msra.mxu0 %v8734_v17 }
  0xd8   :  { %4108 = vmatpush1.bf16.msra.mxu1 %v8733_v16  ;;  %5074 = vmatprep.subr.bf16.mxu0 %v8742_v19 }
  0xd9   :  { %7380 = vmatmul.mubr.msk.f32.gmra.mrb[26].mxu0 %vm179_vm0, %v158_v46  ;;  %4109 = vmatprep.subr.bf16.mxu1 %v8737_v18 }
  0xda   :  { %424 = vmatprep.mubr.f32.mxu0 %v9447_v0 }
  0xdb   :  { %5075 = vmatpush1.bf16.msra.mxu0 %v8740_v23 }
  0xdc   :  { %4110 = vmatpush1.bf16.msra.mxu1 %v8739_v22  ;;  %5076 = vmatprep.subr.bf16.mxu0 %v8748_v25 }
  0xdd   :  { %7381 = vmatmul.mubr.msk.f32.gmra.mrb[28].mxu0 %vm179_vm0, %v159_v47  ;;  %4111 = vmatprep.subr.bf16.mxu1 %v8743_v24 }
  0xde   :  { %430 = vmatprep.mubr.f32.mxu0 %v9447_v0 }
  0xdf   :  { %5077 = vmatpush1.bf16.msra.mxu0 %v8746_v28 }
  0xe0   :  { %4112 = vmatpush1.bf16.msra.mxu1 %v8745_v27  ;;  %5078 = vmatprep.subr.bf16.mxu0 %v8754_v30 }
  0xe1   :  { %7382 = vmatmul.mubr.msk.f32.gmra.mrb[30].mxu0 %vm179_vm0, %v160_v48  ;;  %4113 = vmatprep.subr.bf16.mxu1 %v8749_v29 }
  0xe2   :  { %436 = vmatprep.mubr.f32.mxu0 %v9447_v0 }
  0xe3   :  { %5079 = vmatpush1.bf16.msra.mxu0 %v8752_v33 }
  0xe4   :  { %4114 = vmatpush1.bf16.msra.mxu1 %v8751_v32  ;;  %5241 = vmatprep.subr.bf16.mxu0 %v8772_v38 }
  0xe5   :  { %7383 = vmatmul.mubr.msk.f32.gmra.mrb[32].mxu0 %vm179_vm0, %v161_v49  ;;  %4276 = vmatprep.subr.bf16.mxu1 %v8757_v37 }
  0xe6   :  { %442 = vmatprep.mubr.f32.mxu0 %v9447_v0 }
  0xe9   :  { %7384 = vmatmul.mubr.msk.f32.gmra.mrb[34].mxu0 %vm179_vm0, %v162_v50 }
  0xea   :  { %448 = vmatprep.mubr.f32.mxu0 %v9447_v0 }
  0xed   :  { %7385 = vmatmul.mubr.msk.f32.gmra.mrb[36].mxu0 %vm179_vm0, %v163_v51 }
  0xee   :  { %454 = vmatprep.mubr.f32.mxu0 %v9447_v0 }
  0xf1   :  { %7386 = vmatmul.mubr.msk.f32.gmra.mrb[38].mxu0 %vm179_vm0, %v164_v52 }
  0xf2   :  { %460 = vmatprep.mubr.f32.mxu0 %v9447_v0 }
  0xf5   :  { %7387 = vmatmul.mubr.msk.f32.gmra.mrb[40].mxu0 %vm179_vm0, %v165_v54 }
  0xf6   :  { %466 = vmatprep.mubr.f32.mxu0 %v9447_v0 }
  0xf9   :  { %7388 = vmatmul.mubr.msk.f32.gmra.mrb[42].mxu0 %vm179_vm0, %v166_v60 }
  0xfa   :  { %472 = vmatprep.mubr.f32.mxu0 %v9447_v0 }
  0xfd   :  { %7389 = vmatmul.mubr.msk.f32.gmra.mrb[44].mxu0 %vm179_vm0, %v167_v63 }
  0xfe   :  { %478 = vmatprep.mubr.f32.mxu0 %v9447_v0 }
 0x101   :  { %7390 = vmatmul.mubr.msk.f32.gmra.mrb[46].mxu0 %vm179_vm0, %v168_v5 }
 0x102   :  { %484 = vmatprep.mubr.f32.mxu0 %v9447_v0 }
 0x105   :  { %7391 = vmatmul.mubr.msk.f32.gmra.mrb[48].mxu0 %vm179_vm0, %v169_v10 }
 0x106   :  { %490 = vmatprep.mubr.f32.mxu0 %v9447_v0 }
 0x109   :  { %7392 = vmatmul.mubr.msk.f32.gmra.mrb[50].mxu0 %vm179_vm0, %v170_v15 }
 0x10a   :  { %496 = vmatprep.mubr.f32.mxu0 %v9447_v0 }
 0x10d   :  { %7393 = vmatmul.mubr.msk.f32.gmra.mrb[52].mxu0 %vm179_vm0, %v171_v21 }
 0x10e   :  { %502 = vmatprep.mubr.f32.mxu0 %v9447_v0 }
 0x111   :  { %7394 = vmatmul.mubr.msk.f32.gmra.mrb[54].mxu0 %vm179_vm0, %v172_v26 }
 0x112   :  { %508 = vmatprep.mubr.f32.mxu0 %v9447_v0 }
 0x115   :  { %7395 = vmatmul.mubr.msk.f32.gmra.mrb[56].mxu0 %vm179_vm0, %v173_v31 }
 0x116   :  { %514 = vmatprep.mubr.f32.mxu0 %v9447_v0 }
 0x119   :  { %7396 = vmatmul.mubr.msk.f32.gmra.mrb[58].mxu0 %vm179_vm0, %v174_v34 }
 0x11a   :  { %520 = vmatprep.mubr.f32.mxu0 %v9447_v0 }
 0x11d   :  { %7397 = vmatmul.mubr.msk.f32.gmra.mrb[60].mxu0 %vm179_vm0, %v175_v35 }
 0x11e   :  { %526 = vmatprep.mubr.f32.mxu0 %v9447_v0  ;;  %v609_v0 = vld [vmem:[#allocation11] sm:$0x3] }
 0x11f   :  { %v9789_v48 = vrot.slane %v609_v0, %v9776_v41  ;;  %v9793_v51 = vrot.slane %v609_v0, %v9779_v43  ;;  %v8893_v41 = vld [vmem:[#allocation6 + $0x520] ss:$16 sps:$4 sm:$0xff]  }
 0x121   :  { %7398 = vmatmul.mubr.msk.f32.gmra.mrb[62].mxu0 %vm179_vm0, %v176_v36 }
 0x178   :  { %v342_v46 = vpop.f32.mrb[0].mxu0 }
 0x179   :  { %v545_v47 = vmul.f32 %v9782_v44, %v342_v46  ;;  %v344_v49 = vpop.f32.mrb[1].mxu0 }
 0x17a   :  { %v546_v50 = vmul.f32 %v9785_v45, %v344_v49 }
 0x17b   :  { %v621_v53 = vadd.f32 %v9789_v48, %v545_v47 }
 0x17c   :  { %v348_v52 = vpop.f32.mrb[2].mxu0  ;;  %v622_v56 = vadd.f32 %v9793_v51, %v546_v50 }
 0x17d   :  { %v547_v54 = vmul.f32 %v9782_v44, %v348_v52  ;;  %v350_v55 = vpop.f32.mrb[3].mxu0  ;;  %v685_v61 = vmax.f32 %v621_v53, 0.0 }
 0x17e   :  { %v548_v57 = vmul.f32 %v9785_v45, %v350_v55  ;;  %v686_v2 = vmax.f32 %v622_v56, 0.0 }
 0x17f   :  { %v623_v58 = vadd.f32 %v9789_v48, %v547_v54 }
 0x180   :  { %v624_v59 = vadd.f32 %v9793_v51, %v548_v57  ;;  %v354_v60 = vpop.f32.mrb[4].mxu0 }
 0x181   :  { %v687_v62 = vmax.f32 %v623_v58, 0.0  ;;  %v549_v63 = vmul.f32 %v9782_v44, %v354_v60  ;;  %v356_v1 = vpop.f32.mrb[5].mxu0 }
 0x182   :  { %v688_v3 = vmax.f32 %v624_v59, 0.0  ;;  %v550_v4 = vmul.f32 %v9785_v45, %v356_v1  ;;  %v8770_v1 = vld [vmem:[#allocation6 + $0x208] ss:$16 sps:$4 sm:$0xff]  }
 0x183   :  { %v749_v5 = vpack.c.bf16 %v687_v62, %v685_v61  ;;  %v625_v9 = vadd.f32 %v9789_v48, %v549_v63  ;;  %v8755_v62 = vld [vmem:[#allocation6 + $0x200] ss:$16 sps:$4 sm:$0xff]  }
 0x184   :  { %v750_v6 = vpack.c.bf16 %v688_v3, %v686_v2  ;;  %v360_v7 = vpop.f32.mrb[6].mxu0  ;;  %v626_v13 = vadd.f32 %v9793_v51, %v550_v4 }
 0x185   :  { %v802_v8 = vrot.slane %v749_v5, 4  ;;  %v551_v10 = vmul.f32 %v9782_v44, %v360_v7  ;;  %v362_v11 = vpop.f32.mrb[7].mxu0  ;;  %v689_v18 = vmax.f32 %v625_v9, 0.0  ;;  %v8778_v7 = vld [vmem:[#allocation6 + $0x22c] ss:$16 sps:$4 sm:$0xff]  }
 0x186   :  { %v803_v12 = vrot.slane %v750_v6, 4  ;;  %v552_v14 = vmul.f32 %v9785_v45, %v362_v11  ;;  %v690_v22 = vmax.f32 %v626_v13, 0.0  ;;  %v8760_v6 = vld [vmem:[#allocation6 + $0x224] ss:$16 sps:$4 sm:$0xff]  }
 0x187   :  { %850 = vst [vmem:[#allocation2] sm:$0xf0] %v802_v8  ;;  %v627_v15 = vadd.f32 %v9789_v48, %v551_v10 }
 0x188   :  { %851 = vst [vmem:[#allocation2 + $0x8] sm:$0xf0] %v803_v12  ;;  %v628_v16 = vadd.f32 %v9793_v51, %v552_v14  ;;  %v366_v17 = vpop.f32.mrb[8].mxu0 }
 0x189   :  { %v691_v19 = vmax.f32 %v627_v15, 0.0  ;;  %v553_v20 = vmul.f32 %v9782_v44, %v366_v17  ;;  %v368_v21 = vpop.f32.mrb[9].mxu0  ;;  %v8758_v17 = vld [vmem:[#allocation6 + $0x220] ss:$16 sps:$4 sm:$0xff]  }
 0x18a   :  { %v692_v23 = vmax.f32 %v628_v16, 0.0  ;;  %v554_v24 = vmul.f32 %v9785_v45, %v368_v21 }
 0x18b   :  { %v751_v25 = vpack.c.bf16 %v691_v19, %v689_v18  ;;  %v629_v27 = vadd.f32 %v9789_v48, %v553_v20  ;;  %v8763_v18 = vld [vmem:[#allocation6 + $0x244] ss:$16 sps:$4 sm:$0xff]  }
 0x18c   :  { %v752_v26 = vpack.c.bf16 %v692_v23, %v690_v22  ;;  %v372_v28 = vpop.f32.mrb[10].mxu0  ;;  %v630_v33 = vadd.f32 %v9793_v51, %v554_v24  ;;  %v8776_v24 = vld [vmem:[#allocation6 + $0x228] ss:$16 sps:$4 sm:$0xff]  }
 0x18d   :  { %v804_v29 = vrot.slane %v751_v25, 4  ;;  %v555_v30 = vmul.f32 %v9782_v44, %v372_v28  ;;  %v374_v31 = vpop.f32.mrb[11].mxu0  ;;  %v693_v39 = vmax.f32 %v629_v27, 0.0 }
 0x18e   :  { %v806_v32 = vrot.slane %v752_v26, 4  ;;  %v556_v34 = vmul.f32 %v9785_v45, %v374_v31  ;;  %v954_v46 = vld [vmem:[#allocation2] sm:$0xf8]  ;;  %v694_v54 = vmax.f32 %v630_v33, 0.0 }
 0x18f   :  { %v9816_v35 = vsel %vm801_vm1, %v802_v8, %v804_v29  ;;  %v631_v36 = vadd.f32 %v9789_v48, %v555_v30  ;;  %v955_v37 = vld [vmem:[#allocation2 + $0x8] sm:$0xf8]  ;;  %v1659_v59 = vrot.slane %v954_v46, 3 }
 0x190   :  { %852 = vst [vmem:[#allocation2 + $0x10] sm:$0xff] %v9816_v35  ;;  %v9821_v38 = vsel %vm801_vm1, %v803_v12, %v806_v32  ;;  %v632_v42 = vadd.f32 %v9793_v51, %v556_v34  ;;  %v378_v0 = vpop.f32.mrb[12].mxu0  ;;  %v1662_v52 = vrot.slane %v955_v37, 3  ;;  %v1660_v63 = vrot.slane %v9816_v35, 3 }
 0x191   :  { %853 = vst [vmem:[#allocation2 + $0x18] sm:$0xff] %v9821_v38  ;;  %v695_v47 = vmax.f32 %v631_v36, 0.0  ;;  %v557_v49 = vmul.f32 %v9782_v44, %v378_v0  ;;  %v380_v50 = vpop.f32.mrb[13].mxu0  ;;  %v1663_v53 = vrot.slane %v9821_v38, 3  ;;  %v8761_v38 = vld [vmem:[#allocation6 + $0x240] ss:$16 sps:$4 sm:$0xff]  }
 0x192   :  { %v696_v55 = vmax.f32 %v632_v42, 0.0  ;;  %v558_v56 = vmul.f32 %v9785_v45, %v380_v50  ;;  %v1661_v11 = vsel %vm1658_vm2, %v1659_v59, %v1660_v63  ;;  %v8790_v50 = vld [vmem:[#allocation6 + $0x26c] ss:$16 sps:$4 sm:$0xff]  }
 0x193   :  { %v9828_v57 = vpack.c.bf16 %v695_v47, %v693_v39  ;;  %v1664_v58 = vsel %vm1658_vm2, %v1662_v52, %v1663_v53  ;;  %v633_v3 = vadd.f32 %v9789_v48, %v557_v49  ;;  %v8782_v39 = vld [vmem:[#allocation6 + $0x248] ss:$16 sps:$4 sm:$0xff]   ;;  %v8766_v49 = vld [vmem:[#allocation6 + $0x264] ss:$16 sps:$4 sm:$0xff]  }
 0x194   :  { %v9831_v60 = vpack.c.bf16 %v696_v55, %v694_v54  ;;  %v384_v61 = vpop.f32.mrb[14].mxu0  ;;  %4115 = vmatprep.mubr.bf16.mxu1 %v1664_v58  ;;  %5080 = vmatprep.mubr.bf16.mxu0 %v1664_v58  ;;  %v634_v9 = vadd.f32 %v9793_v51, %v558_v56  ;;  %v8769_v58 = vld [vmem:[#allocation6 + $0x284] ss:$16 sps:$4 sm:$0xff]  }
 0x195   :  { %v808_v2 = vrot.slane %v9828_v57, 4  ;;  %v559_v4 = vmul.f32 %v9782_v44, %v384_v61  ;;  %v386_v5 = vpop.f32.mrb[15].mxu0  ;;  %4116 = vmatmul.mubr.bf16.vlgmr.msra.gmra.mrb[0].mxu1 %v1661_v11  ;;  %5081 = vmatmul.mubr.bf16.vlgmr.msra.gmra.mrb[64].mxu0 %v1661_v11  ;;  %v697_v19 = vmax.f32 %v633_v3, 0.0  ;;  %v8764_v57 = vld [vmem:[#allocation6 + $0x260] ss:$16 sps:$4 sm:$0xff]  }
 0x196   :  { %v810_v8 = vrot.slane %v9831_v60, 4  ;;  %v560_v10 = vmul.f32 %v9785_v45, %v386_v5  ;;  %4277 = vmatpush1.bf16.msra.mxu1 %v8755_v62  ;;  %5242 = vmatpush1.bf16.msra.mxu0 %v8770_v1  ;;  %v698_v25 = vmax.f32 %v634_v9, 0.0  ;;  %v8788_v1 = vld [vmem:[#allocation6 + $0x268] ss:$16 sps:$4 sm:$0xff]  }
 0x197   :  { %v9842_v12 = vsel %vm801_vm1, %v804_v29, %v808_v2  ;;  %v635_v13 = vadd.f32 %v9789_v48, %v559_v4  ;;  %4278 = vmatprep.subr.bf16.mxu1 %v8760_v6  ;;  %5243 = vmatprep.subr.bf16.mxu0 %v8778_v7  ;;  %v8784_v29 = vld [vmem:[#allocation6 + $0x24c] ss:$16 sps:$4 sm:$0xff]  }
 0x198   :  { %854 = vst [vmem:[#allocation2 + $0x20] sm:$0xff] %v9842_v12  ;;  %v9847_v14 = vsel %vm801_vm1, %v806_v32, %v810_v8  ;;  %v636_v15 = vadd.f32 %v9793_v51, %v560_v10  ;;  %v390_v16 = vpop.f32.mrb[16].mxu0  ;;  %v1689_v28 = vrot.slane %v9842_v12, 3  ;;  %v8796_v6 = vld [vmem:[#allocation6 + $0x28c] ss:$16 sps:$4 sm:$0xff]  }
 0x199   :  { %855 = vst [vmem:[#allocation2 + $0x28] sm:$0xff] %v9847_v14  ;;  %v699_v20 = vmax.f32 %v635_v13, 0.0  ;;  %v561_v21 = vmul.f32 %v9782_v44, %v390_v16  ;;  %v392_v22 = vpop.f32.mrb[17].mxu0  ;;  %v1691_v23 = vrot.slane %v9847_v14, 3  ;;  %v8767_v16 = vld [vmem:[#allocation6 + $0x280] ss:$16 sps:$4 sm:$0xff]  }
 0x19a   :  { %v700_v26 = vmax.f32 %v636_v15, 0.0  ;;  %v562_v27 = vmul.f32 %v9785_v45, %v392_v22  ;;  %4279 = vmatpush1.bf16.msra.mxu1 %v8758_v17  ;;  %5244 = vmatpush1.bf16.msra.mxu0 %v8776_v24  ;;  %v1690_v47 = vsel %vm1658_vm2, %v1660_v63, %v1689_v28  ;;  %v8794_v17 = vld [vmem:[#allocation6 + $0x288] ss:$16 sps:$4 sm:$0xff]   ;;  %v8775_v22 = vld [vmem:[#allocation6 + $0x2a4] ss:$16 sps:$4 sm:$0xff]  }
 0x19b   :  { %v9855_v30 = vpack.c.bf16 %v699_v20, %v697_v19  ;;  %v1692_v31 = vsel %vm1658_vm2, %v1663_v53, %v1691_v23  ;;  %v637_v35 = vadd.f32 %v9789_v48, %v561_v21  ;;  %4280 = vmatprep.subr.bf16.mxu1 %v8763_v18  ;;  %5245 = vmatprep.subr.bf16.mxu0 %v8784_v29  ;;  %v8781_v29 = vld [vmem:[#allocation6 + $0x2c4] ss:$16 sps:$4 sm:$0xff]  }
 0x19c   :  { %v9858_v32 = vpack.c.bf16 %v700_v26, %v698_v25  ;;  %v396_v33 = vpop.f32.mrb[18].mxu0  ;;  %4125 = vmatprep.mubr.bf16.mxu1 %v1692_v31  ;;  %5090 = vmatprep.mubr.bf16.mxu0 %v1692_v31  ;;  %v638_v0 = vadd.f32 %v9793_v51, %v562_v27 }
 0x19d   :  { %v812_v34 = vrot.slane %v9855_v30, 4  ;;  %v563_v36 = vmul.f32 %v9782_v44, %v396_v33  ;;  %v398_v37 = vpop.f32.mrb[19].mxu0  ;;  %4126 = vmatmul.mubr.bf16.gmra.mrb[4].mxu1 %v1690_v47  ;;  %5091 = vmatmul.mubr.bf16.gmra.mrb[68].mxu0 %v1690_v47  ;;  %v701_v59 = vmax.f32 %v637_v35, 0.0  ;;  %v8800_v35 = vld [vmem:[#allocation6 + $0x2a8] ss:$16 sps:$4 sm:$0xff]  }
 0x19e   :  { %v814_v42 = vrot.slane %v9858_v32, 4  ;;  %v564_v46 = vmul.f32 %v9785_v45, %v398_v37  ;;  %4281 = vmatpush1.bf16.msra.mxu1 %v8761_v38  ;;  %5246 = vmatpush1.bf16.msra.mxu0 %v8782_v39 }
 0x19f   :  { %v9872_v52 = vsel %vm801_vm1, %v808_v2, %v812_v34  ;;  %v639_v53 = vadd.f32 %v9789_v48, %v563_v36  ;;  %v702_v2 = vmax.f32 %v638_v0, 0.0  ;;  %4282 = vmatprep.subr.bf16.mxu1 %v8766_v49  ;;  %5247 = vmatprep.subr.bf16.mxu0 %v8790_v50 }
 0x1a0   :  { %856 = vst [vmem:[#allocation2 + $0x30] sm:$0xff] %v9872_v52  ;;  %v9877_v54 = vsel %vm801_vm1, %v810_v8, %v814_v42  ;;  %v640_v55 = vadd.f32 %v9793_v51, %v564_v46  ;;  %v402_v56 = vpop.f32.mrb[20].mxu0  ;;  %v1709_v5 = vrot.slane %v9872_v52, 3 }
 0x1a1   :  { %857 = vst [vmem:[#allocation2 + $0x38] sm:$0xff] %v9877_v54  ;;  %v703_v60 = vmax.f32 %v639_v53, 0.0  ;;  %v565_v61 = vmul.f32 %v9782_v44, %v402_v56  ;;  %v404_v62 = vpop.f32.mrb[21].mxu0  ;;  %v1711_v63 = vrot.slane %v9877_v54, 3  ;;  %v8779_v56 = vld [vmem:[#allocation6 + $0x2c0] ss:$16 sps:$4 sm:$0xff]  }
 0x1a2   :  { %v704_v3 = vmax.f32 %v640_v55, 0.0  ;;  %v566_v4 = vmul.f32 %v9785_v45, %v404_v62  ;;  %4283 = vmatpush1.bf16.msra.mxu1 %v8764_v57  ;;  %5248 = vmatpush1.bf16.msra.mxu0 %v8788_v1  ;;  %v1710_v21 = vsel %vm1658_vm2, %v1689_v28, %v1709_v5  ;;  %v8773_v28 = vld [vmem:[#allocation6 + $0x2a0] ss:$16 sps:$4 sm:$0xff]   ;;  %v8806_v57 = vld [vmem:[#allocation6 + $0x2c8] ss:$16 sps:$4 sm:$0xff]  }
 0x1a3   :  { %v9885_v7 = vpack.c.bf16 %v703_v60, %v701_v59  ;;  %v1712_v8 = vsel %vm1658_vm2, %v1691_v23, %v1711_v63  ;;  %v641_v13 = vadd.f32 %v9789_v48, %v565_v61  ;;  %4284 = vmatprep.subr.bf16.mxu1 %v8769_v58  ;;  %5249 = vmatprep.subr.bf16.mxu0 %v8796_v6  ;;  %v8802_v23 = vld [vmem:[#allocation6 + $0x2ac] ss:$16 sps:$4 sm:$0xff]   ;;  %v8787_v62 = vld [vmem:[#allocation6 + $0x2e4] ss:$16 sps:$4 sm:$0xff]  }
 0x1a4   :  { %v9888_v9 = vpack.c.bf16 %v704_v3, %v702_v2  ;;  %v408_v10 = vpop.f32.mrb[22].mxu0  ;;  %4135 = vmatprep.mubr.bf16.mxu1 %v1712_v8  ;;  %5100 = vmatprep.mubr.bf16.mxu0 %v1712_v8  ;;  %v642_v19 = vadd.f32 %v9793_v51, %v566_v4  ;;  %v8793_v6 = vld [vmem:[#allocation6 + $0x304] ss:$16 sps:$4 sm:$0xff]  }
 0x1a5   :  { %v816_v11 = vrot.slane %v9885_v7, 4  ;;  %v567_v14 = vmul.f32 %v9782_v44, %v408_v10  ;;  %v410_v15 = vpop.f32.mrb[23].mxu0  ;;  %4136 = vmatmul.mubr.bf16.gmra.mrb[8].mxu1 %v1710_v21  ;;  %5101 = vmatmul.mubr.bf16.gmra.mrb[72].mxu0 %v1710_v21  ;;  %v705_v30 = vmax.f32 %v641_v13, 0.0  ;;  %v8812_v13 = vld [vmem:[#allocation6 + $0x2e8] ss:$16 sps:$4 sm:$0xff]  }
 0x1a6   :  { %v818_v18 = vrot.slane %v9888_v9, 4  ;;  %v568_v20 = vmul.f32 %v9785_v45, %v410_v15  ;;  %4285 = vmatpush1.bf16.msra.mxu1 %v8767_v16  ;;  %5250 = vmatpush1.bf16.msra.mxu0 %v8794_v17  ;;  %v706_v36 = vmax.f32 %v642_v19, 0.0 }
 0x1a7   :  { %v9906_v24 = vsel %vm801_vm1, %v812_v34, %v816_v11  ;;  %v643_v25 = vadd.f32 %v9789_v48, %v567_v14  ;;  %4286 = vmatprep.subr.bf16.mxu1 %v8775_v22  ;;  %5251 = vmatprep.subr.bf16.mxu0 %v8802_v23 }
 0x1a8   :  { %858 = vst [vmem:[#allocation2 + $0x40] sm:$0xff] %v9906_v24  ;;  %v9911_v12 = vsel %vm801_vm1, %v814_v42, %v818_v18  ;;  %v644_v26 = vadd.f32 %v9793_v51, %v568_v20  ;;  %v414_v27 = vpop.f32.mrb[24].mxu0  ;;  %v1729_v39 = vrot.slane %v9906_v24, 3  ;;  %v8808_v42 = vld [vmem:[#allocation6 + $0x2cc] ss:$16 sps:$4 sm:$0xff]  }
 0x1a9   :  { %11664 = vst [vmem:[#allocation28_spill] sm:$0xff] %v9911_v12  ;;  %859 = vst [vmem:[#allocation2 + $0x48] sm:$0xff] %v9911_v12  ;;  %v707_v31 = vmax.f32 %v643_v25, 0.0  ;;  %v569_v32 = vmul.f32 %v9782_v44, %v414_v27  ;;  %v416_v33 = vpop.f32.mrb[25].mxu0  ;;  %v1731_v34 = vrot.slane %v9911_v12, 3 }
 0x1aa   :  { %v708_v37 = vmax.f32 %v644_v26, 0.0  ;;  %v570_v38 = vmul.f32 %v9785_v45, %v416_v33  ;;  %4287 = vmatpush1.bf16.msra.mxu1 %v8773_v28  ;;  %5252 = vmatpush1.bf16.msra.mxu0 %v8800_v35  ;;  %v1730_v61 = vsel %vm1658_vm2, %v1709_v5, %v1729_v39  ;;  %v8785_v5 = vld [vmem:[#allocation6 + $0x2e0] ss:$16 sps:$4 sm:$0xff]   ;;  %v8823_v35 = vld [vmem:[#allocation6 + $0x32c] ss:$16 sps:$4 sm:$0xff]  }
 0x1ab   :  { %v9919_v0 = vpack.c.bf16 %v707_v31, %v705_v30  ;;  %v1732_v46 = vsel %vm1658_vm2, %v1711_v63, %v1731_v34  ;;  %v645_v53 = vadd.f32 %v9789_v48, %v569_v32  ;;  %4288 = vmatprep.subr.bf16.mxu1 %v8781_v29  ;;  %5253 = vmatprep.subr.bf16.mxu0 %v8808_v42  ;;  %v8814_v63 = vld [vmem:[#allocation6 + $0x2ec] ss:$16 sps:$4 sm:$0xff]   ;;  %v8791_v28 = vld [vmem:[#allocation6 + $0x300] ss:$16 sps:$4 sm:$0xff]   ;;  %v8818_v29 = vld [vmem:[#allocation6 + $0x308] ss:$16 sps:$4 sm:$0xff]  }
 0x1ac   :  { %v9922_v47 = vpack.c.bf16 %v708_v37, %v706_v36  ;;  %v420_v49 = vpop.f32.mrb[26].mxu0  ;;  %4145 = vmatprep.mubr.bf16.mxu1 %v1732_v46  ;;  %5110 = vmatprep.mubr.bf16.mxu0 %v1732_v46  ;;  %v646_v59 = vadd.f32 %v9793_v51, %v570_v38  ;;  %v8797_v42 = vld [vmem:[#allocation6 + $0x320] ss:$16 sps:$4 sm:$0xff]   ;;  %v8805_v46 = vld [vmem:[#allocation6 + $0x344] ss:$16 sps:$4 sm:$0xff]  }
 0x1ad   :  { %v820_v50 = vrot.slane %v9919_v0, 4  ;;  %v571_v54 = vmul.f32 %v9782_v44, %v420_v49  ;;  %v422_v55 = vpop.f32.mrb[27].mxu0  ;;  %4146 = vmatmul.mubr.bf16.gmra.mrb[12].mxu1 %v1730_v61  ;;  %5111 = vmatmul.mubr.bf16.gmra.mrb[76].mxu0 %v1730_v61  ;;  %v709_v7 = vmax.f32 %v645_v53, 0.0 }
 0x1ae   :  { %v822_v58 = vrot.slane %v9922_v47, 4  ;;  %v572_v60 = vmul.f32 %v9785_v45, %v422_v55  ;;  %4289 = vmatpush1.bf16.msra.mxu1 %v8779_v56  ;;  %5254 = vmatpush1.bf16.msra.mxu0 %v8806_v57  ;;  %v710_v14 = vmax.f32 %v646_v59, 0.0  ;;  %v8829_v59 = vld [vmem:[#allocation6 + $0x34c] ss:$16 sps:$4 sm:$0xff]  }
 0x1af   :  { %v9940_v1 = vsel %vm801_vm1, %v816_v11, %v820_v50  ;;  %v647_v2 = vadd.f32 %v9789_v48, %v571_v54  ;;  %4290 = vmatprep.subr.bf16.mxu1 %v8787_v62  ;;  %5255 = vmatprep.subr.bf16.mxu0 %v8814_v63  ;;  %v8821_v54 = vld [vmem:[#allocation6 + $0x328] ss:$16 sps:$4 sm:$0xff]  }
 0x1b0   :  { %11665 = vst [vmem:[#allocation29_spill] sm:$0xff] %v9940_v1  ;;  %860 = vst [vmem:[#allocation2 + $0x50] sm:$0xff] %v9940_v1  ;;  %v9945_v52 = vsel %vm801_vm1, %v818_v18, %v822_v58  ;;  %v648_v3 = vadd.f32 %v9793_v51, %v572_v60  ;;  %v426_v4 = vpop.f32.mrb[28].mxu0  ;;  %v1749_v17 = vrot.slane %v9940_v1, 3  ;;  %v8820_v18 = vld [vmem:[#allocation6 + $0x30c] ss:$16 sps:$4 sm:$0xff]  }
 0x1b1   :  { %11666 = vst [vmem:[#allocation30_spill] sm:$0xff] %v9945_v52  ;;  %861 = vst [vmem:[#allocation2 + $0x58] sm:$0xff] %v9945_v52  ;;  %v711_v8 = vmax.f32 %v647_v2, 0.0  ;;  %v573_v9 = vmul.f32 %v9782_v44, %v426_v4  ;;  %v428_v10 = vpop.f32.mrb[29].mxu0  ;;  %v1751_v11 = vrot.slane %v9945_v52, 3 }
 0x1b2   :  { %v712_v15 = vmax.f32 %v648_v3, 0.0  ;;  %v574_v16 = vmul.f32 %v9785_v45, %v428_v10  ;;  %4291 = vmatpush1.bf16.msra.mxu1 %v8785_v5  ;;  %5256 = vmatpush1.bf16.msra.mxu0 %v8812_v13  ;;  %v1750_v33 = vsel %vm1658_vm2, %v1729_v39, %v1749_v17  ;;  %v8811_v13 = vld [vmem:[#allocation6 + $0x364] ss:$16 sps:$4 sm:$0xff]  }
 0x1b3   :  { %v9953_v19 = vpack.c.bf16 %v711_v8, %v709_v7  ;;  %v1752_v20 = vsel %vm1658_vm2, %v1731_v34, %v1751_v11  ;;  %v649_v25 = vadd.f32 %v9789_v48, %v573_v9  ;;  %4292 = vmatprep.subr.bf16.mxu1 %v8793_v6  ;;  %v8799_v34 = vld [vmem:[#allocation6 + $0x324] ss:$16 sps:$4 sm:$0xff]   ;;  %5257 = vmatprep.subr.bf16.mxu0 %v8820_v18  ;;  %v8803_v6 = vld [vmem:[#allocation6 + $0x340] ss:$16 sps:$4 sm:$0xff]   ;;  %v8827_v7 = vld [vmem:[#allocation6 + $0x348] ss:$16 sps:$4 sm:$0xff]  }
 0x1b4   :  { %v9956_v21 = vpack.c.bf16 %v712_v15, %v710_v14  ;;  %v432_v22 = vpop.f32.mrb[30].mxu0  ;;  %4155 = vmatprep.mubr.bf16.mxu1 %v1752_v20  ;;  %5120 = vmatprep.mubr.bf16.mxu0 %v1752_v20  ;;  %v650_v31 = vadd.f32 %v9793_v51, %v574_v16  ;;  %v8832_v14 = vld [vmem:[#allocation6 + $0x36c] ss:$16 sps:$4 sm:$0xff]  }
 0x1b5   :  { %v824_v23 = vrot.slane %v9953_v19, 4  ;;  %v575_v26 = vmul.f32 %v9782_v44, %v432_v22  ;;  %v434_v27 = vpop.f32.mrb[31].mxu0  ;;  %4156 = vmatmul.mubr.bf16.gmra.mrb[16].mxu1 %v1750_v33  ;;  %5121 = vmatmul.mubr.bf16.gmra.mrb[80].mxu0 %v1750_v33  ;;  %v713_v0 = vmax.f32 %v649_v25, 0.0  ;;  %v8809_v19 = vld [vmem:[#allocation6 + $0x360] ss:$16 sps:$4 sm:$0xff]  }
 0x1b6   :  { %v826_v30 = vrot.slane %v9956_v21, 4  ;;  %v576_v32 = vmul.f32 %v9785_v45, %v434_v27  ;;  %4293 = vmatpush1.bf16.msra.mxu1 %v8791_v28  ;;  %5258 = vmatpush1.bf16.msra.mxu0 %v8818_v29  ;;  %v714_v55 = vmax.f32 %v650_v31, 0.0  ;;  %v8817_v22 = vld [vmem:[#allocation6 + $0x384] ss:$16 sps:$4 sm:$0xff]   ;;  %v8830_v21 = vld [vmem:[#allocation6 + $0x368] ss:$16 sps:$4 sm:$0xff]  }
 0x1b7   :  { %v9974_v36 = vsel %vm801_vm1, %v820_v50, %v824_v23  ;;  %v651_v37 = vadd.f32 %v9789_v48, %v575_v26  ;;  %4294 = vmatprep.subr.bf16.mxu1 %v8799_v34  ;;  %5259 = vmatprep.subr.bf16.mxu0 %v8823_v35  ;;  %v8838_v33 = vld [vmem:[#allocation6 + $0x38c] ss:$16 sps:$4 sm:$0xff]  }
 0x1b8   :  { %11667 = vst [vmem:[#allocation31_spill] sm:$0xff] %v9974_v36  ;;  %862 = vst [vmem:[#allocation2 + $0x60] sm:$0xff] %v9974_v36  ;;  %v9981_v24 = vsel %vm801_vm1, %v822_v58, %v826_v30  ;;  %v652_v38 = vadd.f32 %v9793_v51, %v576_v32  ;;  %v438_v39 = vpop.f32.mrb[32].mxu0  ;;  %v1769_v58 = vrot.slane %v9974_v36, 3 }
 0x1b9   :  { %11668 = vst [vmem:[#allocation32_spill] sm:$0xff] %v9981_v24  ;;  %863 = vst [vmem:[#allocation2 + $0x68] sm:$0xff] %v9981_v24  ;;  %v715_v47 = vmax.f32 %v651_v37, 0.0  ;;  %v577_v49 = vmul.f32 %v9782_v44, %v438_v39  ;;  %v440_v50 = vpop.f32.mrb[33].mxu0  ;;  %v1771_v53 = vrot.slane %v9981_v24, 3 }
 0x1ba   :  { %v716_v56 = vmax.f32 %v652_v38, 0.0  ;;  %v578_v57 = vmul.f32 %v9785_v45, %v440_v50  ;;  %4295 = vmatpush1.bf16.msra.mxu1 %v8797_v42  ;;  %5260 = vmatpush1.bf16.msra.mxu0 %v8821_v54  ;;  %v8836_v50 = vld [vmem:[#allocation6 + $0x388] ss:$16 sps:$4 sm:$0xff]  }
 0x1bb   :  { %v763_v60 = vpack.c.bf16 %v715_v47, %v713_v0  ;;  %v1772_v61 = vsel %vm1658_vm2, %v1751_v11, %v1771_v53  ;;  %v653_v3 = vadd.f32 %v9789_v48, %v577_v49  ;;  %v1770_v11 = vsel %vm1658_vm2, %v1749_v17, %v1769_v58  ;;  %4296 = vmatprep.subr.bf16.mxu1 %v8805_v46  ;;  %v8815_v49 = vld [vmem:[#allocation6 + $0x380] ss:$16 sps:$4 sm:$0xff]  }
 0x1bc   :  { %v764_v62 = vpack.c.bf16 %v716_v56, %v714_v55  ;;  %v444_v63 = vpop.f32.mrb[34].mxu0  ;;  %4165 = vmatprep.mubr.bf16.mxu1 %v1772_v61  ;;  %5130 = vmatprep.mubr.bf16.mxu0 %v1772_v61  ;;  %v654_v9 = vadd.f32 %v9793_v51, %v578_v57  ;;  %v8826_v56 = vld [vmem:[#allocation6 + $0x3a4] ss:$16 sps:$4 sm:$0xff]   ;;  %v8841_v57 = vld [vmem:[#allocation6 + $0x3ac] ss:$16 sps:$4 sm:$0xff]  }
 0x1bd   :  { %v828_v2 = vrot.slane %v763_v60, 4  ;;  %v579_v4 = vmul.f32 %v9782_v44, %v444_v63  ;;  %v446_v5 = vpop.f32.mrb[35].mxu0  ;;  %5261 = vmatprep.subr.bf16.mxu0 %v8829_v59  ;;  %4166 = vmatmul.mubr.bf16.gmra.mrb[20].mxu1 %v1770_v11 }
 0x1be   :  { %v830_v8 = vrot.slane %v764_v62, 4  ;;  %v580_v10 = vmul.f32 %v9785_v45, %v446_v5  ;;  %5131 = vmatmul.mubr.bf16.gmra.mrb[84].mxu0 %v1770_v11  ;;  %4297 = vmatpush1.bf16.msra.mxu1 %v8803_v6  ;;  %v718_v29 = vmax.f32 %v654_v9, 0.0 }
 0x1bf   :  { %v10004_v15 = vsel %vm801_vm1, %v824_v23, %v828_v2  ;;  %866 = vst [vmem:[#allocation2 + $0x80] sm:$0xf] %v828_v2  ;;  %v655_v16 = vadd.f32 %v9789_v48, %v579_v4  ;;  %v717_v23 = vmax.f32 %v653_v3, 0.0  ;;  %5262 = vmatpush1.bf16.msra.mxu0 %v8827_v7  ;;  %4298 = vmatprep.subr.bf16.mxu1 %v8811_v13  ;;  %v8824_v3 = vld [vmem:[#allocation6 + $0x3a0] ss:$16 sps:$4 sm:$0xff]  }
 0x1c0   :  { %11669 = vst [vmem:[#allocation33_spill] sm:$0xff] %v10004_v15  ;;  %864 = vst [vmem:[#allocation2 + $0x70] sm:$0xff] %v10004_v15  ;;  %v10011_v17 = vsel %vm801_vm1, %v826_v30, %v830_v8  ;;  %v656_v18 = vadd.f32 %v9793_v51, %v580_v10  ;;  %v450_v20 = vpop.f32.mrb[36].mxu0  ;;  %v1789_v32 = vrot.slane %v10004_v15, 3  ;;  %5263 = vmatprep.subr.bf16.mxu0 %v8832_v14  ;;  %v8835_v14 = vld [vmem:[#allocation6 + $0x3c4] ss:$16 sps:$4 sm:$0xff]  }
 0x1c1   :  { %11670 = vst [vmem:[#allocation34_spill] sm:$0xff] %v10011_v17  ;;  %867 = vst [vmem:[#allocation2 + $0x88] sm:$0xf] %v830_v8  ;;  %v719_v25 = vmax.f32 %v655_v16, 0.0  ;;  %v581_v26 = vmul.f32 %v9782_v44, %v450_v20  ;;  %v452_v27 = vpop.f32.mrb[37].mxu0  ;;  %v1791_v28 = vrot.slane %v10011_v17, 3 }
 0x1c2   :  { %865 = vst [vmem:[#allocation2 + $0x78] sm:$0xff] %v10011_v17  ;;  %v720_v30 = vmax.f32 %v656_v18, 0.0  ;;  %v582_v31 = vmul.f32 %v9785_v45, %v452_v27  ;;  %4299 = vmatpush1.bf16.msra.mxu1 %v8809_v19  ;;  %v1790_v55 = vsel %vm1658_vm2, %v1769_v58, %v1789_v32  ;;  %v8839_v8 = vld [vmem:[#allocation6 + $0x3a8] ss:$16 sps:$4 sm:$0xff]   ;;  %v8847_v16 = vld [vmem:[#allocation6 + $0x3cc] ss:$16 sps:$4 sm:$0xff]  }
 0x1c3   :  { %v10019_v34 = vpack.c.bf16 %v719_v25, %v717_v23  ;;  %v1792_v35 = vsel %vm1658_vm2, %v1771_v53, %v1791_v28  ;;  %v657_v42 = vadd.f32 %v9789_v48, %v581_v26  ;;  %5264 = vmatpush1.bf16.msra.mxu0 %v8830_v21  ;;  %4300 = vmatprep.subr.bf16.mxu1 %v8817_v22  ;;  %v8833_v27 = vld [vmem:[#allocation6 + $0x3c0] ss:$16 sps:$4 sm:$0xff]  }
 0x1c4   :  { %v10024_v37 = vpack.c.bf16 %v720_v30, %v718_v29  ;;  %v456_v38 = vpop.f32.mrb[38].mxu0  ;;  %4175 = vmatprep.mubr.bf16.mxu1 %v1792_v35  ;;  %5140 = vmatprep.mubr.bf16.mxu0 %v1792_v35  ;;  %v658_v46 = vadd.f32 %v9793_v51, %v582_v31  ;;  %v8850_v35 = vld [vmem:[#allocation6 + $0x3ec] ss:$16 sps:$4 sm:$0xff]  }
 0x1c5   :  { %v888_v39 = vrot.slane %v10019_v34, 4  ;;  %v583_v0 = vmul.f32 %v9782_v44, %v456_v38  ;;  %v458_v47 = vpop.f32.mrb[39].mxu0  ;;  %5265 = vmatprep.subr.bf16.mxu0 %v8838_v33  ;;  %4176 = vmatmul.mubr.bf16.gmra.mrb[24].mxu1 %v1790_v55  ;;  %v721_v58 = vmax.f32 %v657_v42, 0.0  ;;  %v8844_v33 = vld [vmem:[#allocation6 + $0x3e4] ss:$16 sps:$4 sm:$0xff]  }
 0x1c6   :  { %v889_v53 = vrot.slane %v10024_v37, 4  ;;  %v584_v54 = vmul.f32 %v9785_v45, %v458_v47  ;;  %5141 = vmatmul.mubr.bf16.gmra.mrb[88].mxu0 %v1790_v55  ;;  %v970_v61 = vld [vmem:[#allocation2 + $0x80] sm:$0x7]  ;;  %v722_v4 = vmax.f32 %v658_v46, 0.0  ;;  %4301 = vmatpush1.bf16.msra.mxu1 %v8815_v49 }
 0x1c7   :  { %936 = vst [vmem:[#allocation2 + $0x90] sm:$0xf0] %v888_v39  ;;  %v659_v59 = vadd.f32 %v9789_v48, %v583_v0  ;;  %5266 = vmatpush1.bf16.msra.mxu0 %v8836_v50  ;;  %v1809_v13 = vrot.slane %v970_v61, 3  ;;  %4302 = vmatprep.subr.bf16.mxu1 %v8826_v56  ;;  %v8842_v34 = vld [vmem:[#allocation6 + $0x3e0] ss:$16 sps:$4 sm:$0xff]  }
 0x1c8   :  { %v971_v60 = vld [vmem:[#allocation2 + $0x88] sm:$0x7]  ;;  %937 = vst [vmem:[#allocation2 + $0x98] sm:$0xf0] %v889_v53  ;;  %v660_v62 = vadd.f32 %v9793_v51, %v584_v54  ;;  %v462_v63 = vpop.f32.mrb[40].mxu0  ;;  %5267 = vmatprep.subr.bf16.mxu0 %v8841_v57  ;;  %v10383_v43 = vld [vmem:[#allocation2 + $0x70] sm:$0xff] }
 0x1c9   :  { %v1811_v2 = vrot.slane %v971_v60, 3  ;;  %v723_v5 = vmax.f32 %v659_v59, 0.0  ;;  %v585_v6 = vmul.f32 %v9782_v44, %v462_v63  ;;  %v464_v7 = vpop.f32.mrb[41].mxu0  ;;  %v1810_v31 = vsel %vm1658_vm2, %v1789_v32, %v1809_v13  ;;  %v8853_v61 = vld [vmem:[#allocation6 + $0x404] ss:$16 sps:$4 sm:$0xff]  }
 0x1ca   :  { %v724_v9 = vmax.f32 %v660_v62, 0.0  ;;  %v586_v10 = vmul.f32 %v9785_v45, %v464_v7  ;;  %4303 = vmatpush1.bf16.msra.mxu1 %v8824_v3  ;;  %v8868_v62 = vld [vmem:[#allocation6 + $0x40c] ss:$16 sps:$4 sm:$0xff]  }
 0x1cb   :  { %v1812_v11 = vsel %vm1658_vm2, %v1791_v28, %v1811_v2  ;;  %v10044_v18 = vpack.c.bf16 %v723_v5, %v721_v58  ;;  %v661_v19 = vadd.f32 %v9789_v48, %v585_v6  ;;  %5268 = vmatpush1.bf16.msra.mxu0 %v8839_v8  ;;  %v8845_v28 = vld [vmem:[#allocation6 + $0x3c8] ss:$16 sps:$4 sm:$0xff]   ;;  %4304 = vmatprep.subr.bf16.mxu1 %v8835_v14 }
 0x1cc   :  { %4185 = vmatprep.mubr.bf16.mxu1 %v1812_v11  ;;  %5150 = vmatprep.mubr.bf16.mxu0 %v1812_v11  ;;  %v10046_v20 = vpack.c.bf16 %v724_v9, %v722_v4  ;;  %v468_v22 = vpop.f32.mrb[42].mxu0  ;;  %v662_v29 = vadd.f32 %v9793_v51, %v586_v10 }
 0x1cd   :  { %v890_v23 = vrot.slane %v10044_v18, 4  ;;  %v587_v25 = vmul.f32 %v9782_v44, %v468_v22  ;;  %v470_v26 = vpop.f32.mrb[43].mxu0  ;;  %5269 = vmatprep.subr.bf16.mxu0 %v8847_v16  ;;  %4186 = vmatmul.mubr.bf16.gmra.mrb[28].mxu1 %v1810_v31  ;;  %v725_v46 = vmax.f32 %v661_v19, 0.0 }
 0x1ce   :  { %v892_v21 = vrot.slane %v10046_v20, 4  ;;  %v588_v30 = vmul.f32 %v9785_v45, %v470_v26  ;;  %5151 = vmatmul.mubr.bf16.gmra.mrb[92].mxu0 %v1810_v31  ;;  %v10072_v49 = vld [vmem:[#allocation2 + $0x90] sm:$0xf8]  ;;  %4305 = vmatpush1.bf16.msra.mxu1 %v8833_v27  ;;  %v726_v57 = vmax.f32 %v662_v29, 0.0 }
 0x1cf   :  { %v10062_v37 = vsel %vm801_vm1, %v888_v39, %v890_v23  ;;  %v663_v38 = vadd.f32 %v9789_v48, %v587_v25  ;;  %v10065_v42 = vld [vmem:[#allocation2 + $0x98] sm:$0xf8]  ;;  %5270 = vmatpush1.bf16.msra.mxu0 %v8845_v28  ;;  %4306 = vmatprep.subr.bf16.mxu1 %v8844_v33  ;;  %v1913_v3 = vrot.slane %v10072_v49, 3 }
 0x1d0   :  { %938 = vst [vmem:[#allocation2 + $0xa0] sm:$0xff] %v10062_v37  ;;  %v10069_v32 = vsel %vm801_vm1, %v889_v53, %v892_v21  ;;  %v664_v0 = vadd.f32 %v9793_v51, %v588_v30  ;;  %v474_v47 = vpop.f32.mrb[44].mxu0  ;;  %v1916_v55 = vrot.slane %v10065_v42, 3  ;;  %v8848_v53 = vld [vmem:[#allocation6 + $0x3e8] ss:$16 sps:$4 sm:$0xff]   ;;  %5271 = vmatprep.subr.bf16.mxu0 %v8850_v35  ;;  %v1914_v5 = vrot.slane %v10062_v37, 3 }
 0x1d1   :  { %939 = vst [vmem:[#allocation2 + $0xa8] sm:$0xff] %v10069_v32  ;;  %v727_v39 = vmax.f32 %v663_v38, 0.0  ;;  %v589_v50 = vmul.f32 %v9782_v44, %v474_v47  ;;  %v476_v54 = vpop.f32.mrb[45].mxu0  ;;  %v1917_v56 = vrot.slane %v10069_v32, 3 }
 0x1d2   :  { %v728_v59 = vmax.f32 %v664_v0, 0.0  ;;  %v590_v60 = vmul.f32 %v9785_v45, %v476_v54  ;;  %4307 = vmatpush1.bf16.msra.mxu1 %v8842_v34  ;;  %v1915_v14 = vsel %vm1658_vm2, %v1913_v3, %v1914_v5 }
 0x1d3   :  { %v769_v63 = vpack.c.bf16 %v727_v39, %v725_v46  ;;  %v1918_v2 = vsel %vm1658_vm2, %v1916_v55, %v1917_v56  ;;  %v665_v7 = vadd.f32 %v9789_v48, %v589_v50  ;;  %5272 = vmatpush1.bf16.msra.mxu0 %v8848_v53  ;;  %4469 = vmatprep.subr.bf16.mxu1 %v8853_v61 }
 0x1d4   :  { %v770_v58 = vpack.c.bf16 %v728_v59, %v726_v57  ;;  %v480_v4 = vpop.f32.mrb[46].mxu0  ;;  %4195 = vmatprep.mubr.bf16.mxu1 %v1918_v2  ;;  %5160 = vmatprep.mubr.bf16.mxu0 %v1918_v2  ;;  %v666_v11 = vadd.f32 %v9793_v51, %v590_v60 }
 0x1d5   :  { %v894_v6 = vrot.slane %v769_v63, 4  ;;  %v591_v8 = vmul.f32 %v9782_v44, %v480_v4  ;;  %v482_v9 = vpop.f32.mrb[47].mxu0  ;;  %5434 = vmatprep.subr.bf16.mxu0 %v8868_v62  ;;  %4196 = vmatmul.mubr.bf16.gmra.mrb[32].mxu1 %v1915_v14  ;;  %v729_v26 = vmax.f32 %v665_v7, 0.0 }
 0x1d6   :  { %v896_v10 = vrot.slane %v770_v58, 4  ;;  %v592_v13 = vmul.f32 %v9785_v45, %v482_v9  ;;  %5161 = vmatmul.mubr.bf16.gmra.mrb[96].mxu0 %v1915_v14  ;;  %v730_v29 = vmax.f32 %v666_v11, 0.0 }
 0x1d7   :  { %v10090_v16 = vsel %vm801_vm1, %v890_v23, %v894_v6  ;;  %v667_v20 = vadd.f32 %v9789_v48, %v591_v8 }
 0x1d8   :  { %940 = vst [vmem:[#allocation2 + $0xb0] sm:$0xff] %v10090_v16  ;;  %v10095_v19 = vsel %vm801_vm1, %v892_v21, %v896_v10  ;;  %v668_v22 = vadd.f32 %v9793_v51, %v592_v13  ;;  %v486_v25 = vpop.f32.mrb[48].mxu0  ;;  %v1943_v33 = vrot.slane %v10090_v16, 3 }
 0x1d9   :  { %941 = vst [vmem:[#allocation2 + $0xb8] sm:$0xff] %v10095_v19  ;;  %v731_v27 = vmax.f32 %v667_v20, 0.0  ;;  %v593_v18 = vmul.f32 %v9782_v44, %v486_v25  ;;  %v488_v23 = vpop.f32.mrb[49].mxu0  ;;  %v1945_v28 = vrot.slane %v10095_v19, 3 }
 0x1da   :  { %v732_v30 = vmax.f32 %v668_v22, 0.0  ;;  %v594_v31 = vmul.f32 %v9785_v45, %v488_v23  ;;  %v1944_v53 = vsel %vm1658_vm2, %v1914_v5, %v1943_v33 }
 0x1db   :  { %v771_v21 = vpack.c.bf16 %v731_v27, %v729_v26  ;;  %v1946_v35 = vsel %vm1658_vm2, %v1917_v56, %v1945_v28  ;;  %v669_v47 = vadd.f32 %v9789_v48, %v593_v18 }
 0x1dc   :  { %v772_v38 = vpack.c.bf16 %v732_v30, %v730_v29  ;;  %v492_v46 = vpop.f32.mrb[50].mxu0  ;;  %4205 = vmatprep.mubr.bf16.mxu1 %v1946_v35  ;;  %5170 = vmatprep.mubr.bf16.mxu0 %v1946_v35  ;;  %v670_v54 = vadd.f32 %v9793_v51, %v594_v31 }
 0x1dd   :  { %v898_v0 = vrot.slane %v771_v21, 4  ;;  %v595_v34 = vmul.f32 %v9782_v44, %v492_v46  ;;  %v494_v39 = vpop.f32.mrb[51].mxu0  ;;  %4206 = vmatmul.mubr.bf16.gmra.mrb[36].mxu1 %v1944_v53  ;;  %v733_v62 = vmax.f32 %v669_v47, 0.0 }
 0x1de   :  { %v900_v50 = vrot.slane %v772_v38, 4  ;;  %v596_v55 = vmul.f32 %v9785_v45, %v494_v39  ;;  %5171 = vmatmul.mubr.bf16.gmra.mrb[100].mxu0 %v1944_v53  ;;  %v734_v4 = vmax.f32 %v670_v54, 0.0 }
 0x1df   :  { %v10110_v57 = vsel %vm801_vm1, %v894_v6, %v898_v0  ;;  %v671_v56 = vadd.f32 %v9789_v48, %v595_v34 }
 0x1e0   :  { %942 = vst [vmem:[#allocation2 + $0xc0] sm:$0xff] %v10110_v57  ;;  %v10115_v59 = vsel %vm801_vm1, %v896_v10, %v900_v50  ;;  %v672_v60 = vadd.f32 %v9793_v51, %v596_v55  ;;  %v498_v61 = vpop.f32.mrb[52].mxu0  ;;  %v1963_v7 = vrot.slane %v10110_v57, 3 }
 0x1e1   :  { %943 = vst [vmem:[#allocation2 + $0xc8] sm:$0xff] %v10115_v59  ;;  %v735_v63 = vmax.f32 %v671_v56, 0.0  ;;  %v597_v2 = vmul.f32 %v9782_v44, %v498_v61  ;;  %v500_v3 = vpop.f32.mrb[53].mxu0  ;;  %v1965_v58 = vrot.slane %v10115_v59, 3 }
 0x1e2   :  { %v736_v5 = vmax.f32 %v672_v60, 0.0  ;;  %v598_v6 = vmul.f32 %v9785_v45, %v500_v3  ;;  %v1964_v18 = vsel %vm1658_vm2, %v1943_v33, %v1963_v7 }
 0x1e3   :  { %v773_v8 = vpack.c.bf16 %v735_v63, %v733_v62  ;;  %v1966_v9 = vsel %vm1658_vm2, %v1945_v28, %v1965_v58  ;;  %v673_v14 = vadd.f32 %v9789_v48, %v597_v2 }
 0x1e4   :  { %v774_v10 = vpack.c.bf16 %v736_v5, %v734_v4  ;;  %v504_v11 = vpop.f32.mrb[54].mxu0  ;;  %4215 = vmatprep.mubr.bf16.mxu1 %v1966_v9  ;;  %5180 = vmatprep.mubr.bf16.mxu0 %v1966_v9  ;;  %v674_v26 = vadd.f32 %v9793_v51, %v598_v6 }
 0x1e5   :  { %v902_v13 = vrot.slane %v773_v8, 4  ;;  %v599_v20 = vmul.f32 %v9782_v44, %v504_v11  ;;  %v506_v22 = vpop.f32.mrb[55].mxu0  ;;  %4216 = vmatmul.mubr.bf16.gmra.mrb[40].mxu1 %v1964_v18  ;;  %v737_v21 = vmax.f32 %v673_v14, 0.0 }
 0x1e6   :  { %v904_v25 = vrot.slane %v774_v10, 4  ;;  %v600_v27 = vmul.f32 %v9785_v45, %v506_v22  ;;  %5181 = vmatmul.mubr.bf16.gmra.mrb[104].mxu0 %v1964_v18 }
 0x1e7   :  { %v10130_v23 = vsel %vm801_vm1, %v898_v0, %v902_v13  ;;  %v675_v28 = vadd.f32 %v9789_v48, %v599_v20  ;;  %v738_v0 = vmax.f32 %v674_v26, 0.0 }
 0x1e8   :  { %944 = vst [vmem:[#allocation2 + $0xd0] sm:$0xff] %v10130_v23  ;;  %v10135_v29 = vsel %vm801_vm1, %v900_v50, %v904_v25  ;;  %v676_v30 = vadd.f32 %v9793_v51, %v600_v27  ;;  %v510_v31 = vpop.f32.mrb[56].mxu0  ;;  %v1983_v39 = vrot.slane %v10130_v23, 3 }
 0x1e9   :  { %945 = vst [vmem:[#allocation2 + $0xd8] sm:$0xff] %v10135_v29  ;;  %v739_v35 = vmax.f32 %v675_v28, 0.0  ;;  %v601_v33 = vmul.f32 %v9782_v44, %v510_v31  ;;  %v512_v38 = vpop.f32.mrb[57].mxu0  ;;  %v1985_v46 = vrot.slane %v10135_v29, 3 }
 0x1ea   :  { %v740_v47 = vmax.f32 %v676_v30, 0.0  ;;  %v602_v34 = vmul.f32 %v9785_v45, %v512_v38  ;;  %v1984_v4 = vsel %vm1658_vm2, %v1963_v7, %v1983_v39 }
 0x1eb   :  { %v775_v50 = vpack.c.bf16 %v739_v35, %v737_v21  ;;  %v1986_v54 = vsel %vm1658_vm2, %v1965_v58, %v1985_v46  ;;  %v677_v60 = vadd.f32 %v9789_v48, %v601_v33 }
 0x1ec   :  { %v776_v55 = vpack.c.bf16 %v740_v47, %v738_v0  ;;  %v516_v53 = vpop.f32.mrb[58].mxu0  ;;  %4225 = vmatprep.mubr.bf16.mxu1 %v1986_v54  ;;  %5190 = vmatprep.mubr.bf16.mxu0 %v1986_v54  ;;  %v678_v2 = vadd.f32 %v9793_v51, %v602_v34 }
 0x1ed   :  { %v906_v56 = vrot.slane %v775_v50, 4  ;;  %v603_v61 = vmul.f32 %v9782_v44, %v516_v53  ;;  %v518_v62 = vpop.f32.mrb[59].mxu0  ;;  %4226 = vmatmul.mubr.bf16.gmra.mrb[44].mxu1 %v1984_v4  ;;  %v741_v10 = vmax.f32 %v677_v60, 0.0 }
 0x1ee   :  { %v908_v63 = vrot.slane %v776_v55, 4  ;;  %v604_v3 = vmul.f32 %v9785_v45, %v518_v62  ;;  %5191 = vmatmul.mubr.bf16.gmra.mrb[108].mxu0 %v1984_v4  ;;  %v742_v20 = vmax.f32 %v678_v2, 0.0  ;;  %v9139_v2 = vld [vmem:[#allocation2 + $0x8] sm:$0xf8] }
 0x1ef   :  { %v10150_v5 = vsel %vm801_vm1, %v902_v13, %v906_v56  ;;  %v679_v58 = vadd.f32 %v9789_v48, %v603_v61 }
 0x1f0   :  { %11671 = vst [vmem:[#allocation35_spill] sm:$0xff] %v10150_v5  ;;  %946 = vst [vmem:[#allocation2 + $0xe0] sm:$0xff] %v10150_v5  ;;  %v10155_v6 = vsel %vm801_vm1, %v904_v25, %v908_v63  ;;  %v680_v8 = vadd.f32 %v9793_v51, %v604_v3  ;;  %v522_v9 = vpop.f32.mrb[60].mxu0  ;;  %v2003_v27 = vrot.slane %v10150_v5, 3  ;;  %v996_v3 = vshll.u32 %v9139_v2, 16 }
 0x1f1   :  { %11672 = vst [vmem:[#allocation36_spill] sm:$0xff] %v10155_v6  ;;  %947 = vst [vmem:[#allocation2 + $0xe8] sm:$0xff] %v10155_v6  ;;  %v743_v11 = vmax.f32 %v679_v58, 0.0  ;;  %v605_v7 = vmul.f32 %v9782_v44, %v522_v9  ;;  %v524_v13 = vpop.f32.mrb[61].mxu0  ;;  %v2005_v14 = vrot.slane %v10155_v6, 3  ;;  %v10183_v58 = vld [vmem:[#allocation2 + $0x18] sm:$0xff] }
 0x1f2   :  { %v744_v22 = vmax.f32 %v680_v8, 0.0  ;;  %v606_v26 = vmul.f32 %v9785_v45, %v524_v13  ;;  %v2004_v34 = vsel %vm1658_vm2, %v1983_v39, %v2003_v27  ;;  %v11577_v8 = vshll.u32 %v10183_v58, 16 }
 0x1f3   :  { %v777_v25 = vpack.c.bf16 %v743_v11, %v741_v10  ;;  %v2006_v18 = vsel %vm1658_vm2, %v1985_v46, %v2005_v14  ;;  %v681_v21 = vadd.f32 %v9789_v48, %v605_v7  ;;  %v10193_v11 = vld [vmem:[#allocation2 + $0x28] sm:$0xff] }
 0x1f4   :  { %v778_v28 = vpack.c.bf16 %v744_v22, %v742_v20  ;;  %v528_v30 = vpop.f32.mrb[62].mxu0  ;;  %4235 = vmatprep.mubr.bf16.mxu1 %v2006_v18  ;;  %5200 = vmatprep.mubr.bf16.mxu0 %v2006_v18  ;;  %v682_v0 = vadd.f32 %v9793_v51, %v606_v26  ;;  %v11582_v7 = vshll.u32 %v10193_v11, 16  ;;  %v1003_v22 = vrot.slane %v11577_v8, 1  ;;  %v8890_v8 = vld [vmem:[#allocation6 + $0x488] ss:$16 sps:$4 sm:$0xff]  }
 0x1f5   :  { %v910_v31 = vrot.slane %v777_v25, 4  ;;  %v607_v35 = vmul.f32 %v9782_v44, %v528_v30  ;;  %v530_v33 = vpop.f32.mrb[63].mxu0  ;;  %4236 = vmatmul.mubr.bf16.gmra.mrb[48].mxu1 %v2004_v34  ;;  %v745_v55 = vmax.f32 %v681_v21, 0.0  ;;  %v11581_v25 = vshrl.u32 %v10183_v58, 16 }
 0x1f6   :  { %v912_v38 = vrot.slane %v778_v28, 4  ;;  %v608_v47 = vmul.f32 %v9785_v45, %v530_v33  ;;  %5201 = vmatmul.mubr.bf16.gmra.mrb[112].mxu0 %v2004_v34  ;;  %v746_v53 = vmax.f32 %v682_v0, 0.0  ;;  %v1019_v18 = vrot.slane %v11582_v7, 1  ;;  %v9142_v28 = vld [vmem:[#allocation2] sm:$0xf8] }
 0x1f7   :  { %v10170_v50 = vsel %vm801_vm1, %v906_v56, %v910_v31  ;;  %v683_v46 = vadd.f32 %v9789_v48, %v607_v35  ;;  %v984_v30 = vshll.u32 %v9142_v28, 16  ;;  %v10211_v34 = vld [vmem:[#allocation2 + $0x20] sm:$0xff]  ;;  %v11587_v7 = vshrl.u32 %v9981_v24, 16 }
 0x1f8   :  { %948 = vst [vmem:[#allocation2 + $0xf0] sm:$0xff] %v10170_v50  ;;  %v10175_v54 = vsel %vm801_vm1, %v908_v63, %v912_v38  ;;  %v684_v44 = vadd.f32 %v9793_v51, %v608_v47  ;;  %v2023_v60 = vrot.slane %v10170_v50, 3 }
 0x1f9   :  { %949 = vst [vmem:[#allocation2 + $0xf8] sm:$0xff] %v10175_v54  ;;  %v747_v45 = vmax.f32 %v683_v46, 0.0  ;;  %v2025_v39 = vrot.slane %v10175_v54, 3  ;;  %v11588_v46 = vshll.u32 %v10211_v34, 16 }
 0x1fa   :  { %v748_v56 = vmax.f32 %v684_v44, 0.0  ;;  %v2024_v4 = vsel %vm1658_vm2, %v2003_v27, %v2023_v60  ;;  %v994_v27 = vshrl.u32 %v9139_v2, 16 }
 0x1fb   :  { %v779_v48 = vpack.c.bf16 %v747_v45, %v745_v55  ;;  %v2026_v61 = vsel %vm1658_vm2, %v2005_v14, %v2025_v39  ;;  %v998_v14 = vrot.slane %v996_v3, 1  ;;  %v10215_v45 = vld [vmem:[#allocation2 + $0x38] sm:$0xff]  ;;  %v1011_v3 = vrot.slane %v11588_v46, 1 }
 0x1fc   :  { %v780_v62 = vpack.c.bf16 %v748_v56, %v746_v53  ;;  %4245 = vmatprep.mubr.bf16.mxu1 %v2026_v61  ;;  %5210 = vmatprep.mubr.bf16.mxu0 %v2026_v61  ;;  %v986_v53 = vrot.slane %v984_v30, 1 }
 0x1fd   :  { %v914_v63 = vrot.slane %v779_v48, 4  ;;  %4246 = vmatmul.mubr.bf16.gmra.mrb[52].mxu1 %v2024_v4  ;;  %v999_v33 = vor.u32 %v998_v14, %v994_v27 }
 0x1fe   :  { %v916_v51 = vrot.slane %v780_v62, 4  ;;  %5211 = vmatmul.mubr.bf16.gmra.mrb[116].mxu0 %v2024_v4  ;;  %v982_v62 = vshrl.u32 %v9142_v28, 16 }
 0x1ff   :  { %v10187_v9 = vsel %vm801_vm1, %v910_v31, %v914_v63  ;;  %952 = vst [vmem:[#allocation2 + $0x110] sm:$0xf] %v914_v63  ;;  %v10205_v31 = vld [vmem:[#allocation2 + $0x10] sm:$0xff]  ;;  %v1004_v61 = vsel %vm980_vm3, %v999_v33, %v1003_v22 }
 0x200   :  { %11673 = vst [vmem:[#allocation37_spill] sm:$0xff] %v10187_v9  ;;  %950 = vst [vmem:[#allocation2 + $0x100] sm:$0xff] %v10187_v9  ;;  %v10191_v10 = vsel %vm801_vm1, %v912_v38, %v916_v51  ;;  %v2043_v20 = vrot.slane %v10187_v9, 3  ;;  %v11589_v21 = vshll.u32 %v10205_v31, 16  ;;  %v1015_v38 = vor.u32 %v11581_v25, %v1003_v22 }
 0x201   :  { %11674 = vst [vmem:[#allocation38_spill] sm:$0xff] %v10191_v10  ;;  %953 = vst [vmem:[#allocation2 + $0x118] sm:$0xf] %v916_v51  ;;  %v2045_v13 = vrot.slane %v10191_v10, 3  ;;  %v11593_v2 = vshrl.u32 %v10205_v31, 16  ;;  %v11586_v51 = vshrl.u32 %v10193_v11, 16  ;;  %v987_v14 = vor.u32 %v986_v53, %v982_v62 }
 0x202   :  { %951 = vst [vmem:[#allocation2 + $0x108] sm:$0xff] %v10191_v10  ;;  %v2044_v35 = vsel %vm1658_vm2, %v2023_v60, %v2043_v20  ;;  %v1020_v55 = vsel %vm980_vm3, %v1015_v38, %v1019_v18  ;;  %v991_v56 = vrot.slane %v11589_v21, 1  ;;  %v8851_v53 = vld [vmem:[#allocation6 + $0x400] ss:$16 sps:$4 sm:$0xff]   ;;  %v8856_v62 = vld [vmem:[#allocation6 + $0x424] ss:$16 sps:$4 sm:$0xff]  }
 0x203   :  { %v2046_v26 = vsel %vm1658_vm2, %v2025_v39, %v2045_v13  ;;  %v11571_v39 = vshll.u32 %v10215_v45, 16  ;;  %v1669_v63 = vrot.slane %v1020_v55, 3  ;;  %v1031_v27 = vor.u32 %v11586_v51, %v1019_v18 }
 0x204   :  { %4255 = vmatprep.mubr.bf16.mxu1 %v2046_v26  ;;  %5220 = vmatprep.mubr.bf16.mxu0 %v2046_v26  ;;  %v1668_v26 = vrot.slane %v1004_v61, 3 }
 0x205   :  { %4256 = vmatmul.mubr.bf16.gmra.mrb[56].mxu1 %v2044_v35  ;;  %v1035_v4 = vrot.slane %v11571_v39, 1 }
 0x206   :  { %5221 = vmatmul.mubr.bf16.gmra.mrb[120].mxu0 %v2044_v35  ;;  %v1322_v47 = vld [vmem:[#allocation2 + $0x110] sm:$0x7]  ;;  %v1670_v28 = vsel %vm1658_vm2, %v1668_v26, %v1669_v63 }
 0x207   :  { %v2063_v48 = vrot.slane %v1322_v47, 3  ;;  %v10235_v35 = vld [vmem:[#allocation2 + $0x30] sm:$0xff]  ;;  %v1036_v38 = vsel %vm980_vm3, %v1031_v27, %v1035_v4 }
 0x208   :  { %v1323_v0 = vld [vmem:[#allocation2 + $0x118] sm:$0x7]  ;;  %v11569_v33 = vshll.u32 %v10235_v35, 16  ;;  %v1695_v18 = vrot.slane %v1036_v38, 3  ;;  %v8874_v38 = vld [vmem:[#allocation6 + $0x42c] ss:$16 sps:$4 sm:$0xff]  }
 0x209   :  { %v2065_v44 = vrot.slane %v1323_v0, 3  ;;  %v2064_v22 = vsel %vm1658_vm2, %v2043_v20, %v2063_v48  ;;  %v11568_v0 = vshll.u32 %v9911_v12, 16  ;;  %v992_v20 = vsel %vm980_vm3, %v987_v14, %v991_v56 }
 0x20a   :  { %v1027_v55 = vrot.slane %v11569_v33, 1  ;;  %v11573_v48 = vshrl.u32 %v10215_v45, 16  ;;  %v11685_v12 = vshll.u32 %v10205_v31, 16 }
 0x20b   :  { %v2066_v60 = vsel %vm1658_vm2, %v2045_v13, %v2065_v44  ;;  %v1007_v13 = vor.u32 %v11593_v2, %v991_v56  ;;  %v11595_v44 = vshrl.u32 %v10211_v34, 16  ;;  %v1051_v61 = vrot.slane %v11568_v0, 1 }
 0x20c   :  { %4265 = vmatprep.mubr.bf16.mxu1 %v2066_v60  ;;  %5230 = vmatprep.mubr.bf16.mxu0 %v2066_v60  ;;  %v1665_v60 = vrot.slane %v992_v20, 3  ;;  %v1047_v14 = vor.u32 %v11573_v48, %v1035_v4  ;;  %v11572_v4 = vshll.u32 %v9945_v52, 16  ;;  %v11575_v0 = vshrl.u32 %v10235_v35, 16  ;;  %v8886_v48 = vld [vmem:[#allocation6 + $0x46c] ss:$16 sps:$4 sm:$0xff]  }
 0x20d   :  { %4266 = vmatmul.mubr.bf16.gmra.mrb[60].mxu1 %v2064_v22  ;;  %v1012_v30 = vsel %vm980_vm3, %v1007_v13, %v1011_v3  ;;  %v1023_v26 = vor.u32 %v11595_v44, %v1011_v3  ;;  %v8866_v13 = vld [vmem:[#allocation6 + $0x408] ss:$16 sps:$4 sm:$0xff]   ;;  %v8854_v3 = vld [vmem:[#allocation6 + $0x420] ss:$16 sps:$4 sm:$0xff]   ;;  %v1520_v2 = vrot.slane %v10191_v10, 1 }
 0x20e   :  { %5231 = vmatmul.mubr.bf16.gmra.mrb[124].mxu0 %v2064_v22  ;;  %4308 = vmatprep.mubr.bf16.mxu1 %v1670_v28  ;;  %v1666_v47 = vrot.slane %v1012_v30, 3  ;;  %v1696_v22 = vsel %vm1658_vm2, %v1669_v63, %v1695_v18  ;;  %v10260_v20 = vsel %vm980_vm3, %v1047_v14, %v1051_v61  ;;  %v10268_v14 = vld [vmem:[#allocation2 + $0x48] sm:$0xff] }
 0x20f   :  { %5273 = vmatprep.mubr.bf16.mxu0 %v1670_v28  ;;  %v10254_v27 = vsel %vm980_vm3, %v1023_v26, %v1027_v55  ;;  %v10256_v28 = vld [vmem:[#allocation2 + $0x40] sm:$0xff]  ;;  %v8872_v26 = vld [vmem:[#allocation6 + $0x428] ss:$16 sps:$4 sm:$0xff]   ;;  %v11574_v33 = vshrl.u32 %v10268_v14, 16 }
 0x210   :  { %v1667_v56 = vsel %vm1658_vm2, %v1665_v60, %v1666_v47  ;;  %v11570_v30 = vshll.u32 %v10256_v28, 16  ;;  %v8859_v60 = vld [vmem:[#allocation6 + $0x444] ss:$16 sps:$4 sm:$0xff]   ;;  %v1693_v63 = vrot.slane %v10254_v27, 3  ;;  %v8880_v27 = vld [vmem:[#allocation6 + $0x44c] ss:$16 sps:$4 sm:$0xff]  }
 0x215   :  { %4309 = vmatmul.mubr.bf16.vlgmr.msra.gmra.mrb[0].mxu1 %v1667_v56 }
 0x216   :  { %5274 = vmatmul.mubr.bf16.vlgmr.msra.gmra.mrb[64].mxu0 %v1667_v56  ;;  %4470 = vmatpush1.bf16.msra.mxu1 %v8851_v53  ;;  %v1715_v56 = vrot.slane %v10260_v20, 3  ;;  %v1043_v53 = vrot.slane %v11570_v30, 1  ;;  %v1694_v20 = vsel %vm1658_vm2, %v1666_v47, %v1693_v63  ;;  %v1063_v30 = vor.u32 %v11574_v33, %v1051_v61  ;;  %v8860_v61 = vld [vmem:[#allocation6 + $0x460] ss:$16 sps:$4 sm:$0xff]  }
 0x217   :  { %4318 = vmatprep.mubr.bf16.mxu1 %v1696_v22  ;;  %5283 = vmatprep.mubr.bf16.mxu0 %v1696_v22  ;;  %v8857_v22 = vld [vmem:[#allocation6 + $0x440] ss:$16 sps:$4 sm:$0xff]   ;;  %v11579_v33 = vshrl.u32 %v10256_v28, 16 }
 0x218   :  { %4471 = vmatprep.subr.bf16.mxu1 %v8856_v62  ;;  %5435 = vmatpush1.bf16.msra.mxu0 %v8866_v13  ;;  %v1067_v62 = vrot.slane %v11572_v4, 1  ;;  %v1039_v13 = vor.u32 %v11575_v0, %v1027_v55  ;;  %v1716_v39 = vsel %vm1658_vm2, %v1695_v18, %v1715_v56  ;;  %v11578_v55 = vshll.u32 %v9981_v24, 16  ;;  %v8865_v18 = vld [vmem:[#allocation6 + $0x484] ss:$16 sps:$4 sm:$0xff]  }
 0x219   :  { %5436 = vmatprep.subr.bf16.mxu0 %v8874_v38  ;;  %v8862_v38 = vld [vmem:[#allocation6 + $0x464] ss:$16 sps:$4 sm:$0xff]  }
 0x21a   :  { %4472 = vmatpush1.bf16.msra.mxu1 %v8854_v3  ;;  %v8878_v3 = vld [vmem:[#allocation6 + $0x448] ss:$16 sps:$4 sm:$0xff]   ;;  %v10280_v4 = vsel %vm980_vm3, %v1039_v13, %v1043_v53  ;;  %v10284_v47 = vsel %vm980_vm3, %v1063_v30, %v1067_v62  ;;  %v10401_v24 = vld [vmem:[#allocation2] sm:$0xf0] }
 0x21b   :  { %4473 = vmatprep.subr.bf16.mxu1 %v8859_v60  ;;  %v11576_v60 = vshll.u32 %v9940_v1, 16  ;;  %v8884_v13 = vld [vmem:[#allocation6 + $0x468] ss:$16 sps:$4 sm:$0xff]  }
 0x21c   :  { %5437 = vmatpush1.bf16.msra.mxu0 %v8872_v26  ;;  %v1713_v26 = vrot.slane %v10280_v4, 3  ;;  %v10292_v30 = vld [vmem:[#allocation2 + $0x58] sm:$0xff]  ;;  %v1055_v4 = vor.u32 %v11579_v33, %v1043_v53 }
 0x21d   :  { %4319 = vmatmul.mubr.bf16.gmra.mrb[4].mxu1 %v1694_v20  ;;  %5438 = vmatprep.subr.bf16.mxu0 %v8880_v27  ;;  %v1083_v27 = vrot.slane %v11578_v55, 1 }
 0x21e   :  { %5284 = vmatmul.mubr.bf16.gmra.mrb[68].mxu0 %v1694_v20  ;;  %4328 = vmatprep.mubr.bf16.mxu1 %v1716_v39  ;;  %v1735_v20 = vrot.slane %v10284_v47, 3  ;;  %v8892_v47 = vld [vmem:[#allocation6 + $0x48c] ss:$16 sps:$4 sm:$0xff]   ;;  %v1714_v0 = vsel %vm1658_vm2, %v1693_v63, %v1713_v26  ;;  %v11585_v63 = vshll.u32 %v10011_v17, 16 }
 0x21f   :  { %5293 = vmatprep.mubr.bf16.mxu0 %v1716_v39  ;;  %4474 = vmatpush1.bf16.msra.mxu1 %v8857_v22  ;;  %v1059_v39 = vrot.slane %v11576_v60, 1  ;;  %v11580_v22 = vshrl.u32 %v10292_v30, 16  ;;  %v8871_v60 = vld [vmem:[#allocation6 + $0x4a4] ss:$16 sps:$4 sm:$0xff]  }
 0x220   :  { %4475 = vmatprep.subr.bf16.mxu1 %v8862_v38  ;;  %5439 = vmatpush1.bf16.msra.mxu0 %v8878_v3  ;;  %v8863_v38 = vld [vmem:[#allocation6 + $0x480] ss:$16 sps:$4 sm:$0xff]   ;;  %v11583_v3 = vshll.u32 %v9974_v36, 16  ;;  %v1736_v55 = vsel %vm1658_vm2, %v1715_v56, %v1735_v20  ;;  %v11677_v36 = vshrl.u32 %v10383_v43, 16 }
 0x221   :  { %5440 = vmatprep.subr.bf16.mxu0 %v8886_v48  ;;  %v1079_v48 = vor.u32 %v11580_v22, %v1067_v62  ;;  %v10305_v53 = vsel %vm980_vm3, %v1055_v4, %v1059_v39  ;;  %v10311_v62 = vld [vmem:[#allocation2 + $0x50] sm:$0xff] }
 0x222   :  { %v8869_v56 = vld [vmem:[#allocation6 + $0x4a0] ss:$16 sps:$4 sm:$0xff]   ;;  %v1733_v4 = vrot.slane %v10305_v53, 3 }
 0x223   :  { %4476 = vmatpush1.bf16.msra.mxu1 %v8860_v61  ;;  %v8898_v61 = vld [vmem:[#allocation6 + $0x4ac] ss:$16 sps:$4 sm:$0xff]   ;;  %v10308_v33 = vsel %vm980_vm3, %v1079_v48, %v1083_v27  ;;  %v8896_v48 = vld [vmem:[#allocation6 + $0x4a8] ss:$16 sps:$4 sm:$0xff]   ;;  %v8875_v53 = vld [vmem:[#allocation6 + $0x4c0] ss:$16 sps:$4 sm:$0xff]  }
 0x224   :  { %4477 = vmatprep.subr.bf16.mxu1 %v8865_v18  ;;  %5441 = vmatpush1.bf16.msra.mxu0 %v8884_v13  ;;  %v11584_v18 = vshrl.u32 %v10311_v62, 16  ;;  %v8877_v13 = vld [vmem:[#allocation6 + $0x4c4] ss:$16 sps:$4 sm:$0xff]   ;;  %v1755_v22 = vrot.slane %v10308_v33, 3  ;;  %v1734_v33 = vsel %vm1658_vm2, %v1713_v26, %v1733_v4 }
 0x225   :  { %4329 = vmatmul.mubr.bf16.gmra.mrb[8].mxu1 %v1714_v0  ;;  %5442 = vmatprep.subr.bf16.mxu0 %v8892_v47  ;;  %v10338_v26 = vld [vmem:[#allocation2 + $0x60] sm:$0xff] }
 0x226   :  { %5294 = vmatmul.mubr.bf16.gmra.mrb[72].mxu0 %v1714_v0  ;;  %4338 = vmatprep.mubr.bf16.mxu1 %v1736_v55  ;;  %v1075_v0 = vrot.slane %v11583_v3, 1  ;;  %v1071_v25 = vor.u32 %v11584_v18, %v1059_v39  ;;  %v8904_v3 = vld [vmem:[#allocation6 + $0x4cc] ss:$16 sps:$4 sm:$0xff]   ;;  %v1095_v39 = vor.u32 %v11587_v7, %v1083_v27  ;;  %v8902_v18 = vld [vmem:[#allocation6 + $0x4c8] ss:$16 sps:$4 sm:$0xff]   ;;  %v11591_v27 = vshrl.u32 %v10338_v26, 16 }
 0x227   :  { %5303 = vmatprep.mubr.bf16.mxu0 %v1736_v55  ;;  %4478 = vmatpush1.bf16.msra.mxu1 %v8863_v38  ;;  %v10317_v55 = vld [vmem:[#allocation2 + $0x88] sm:$0xf]  ;;  %v1099_v38 = vrot.slane %v11585_v63, 1  ;;  %v8910_v63 = vld [vmem:[#allocation6 + $0x4ec] ss:$16 sps:$4 sm:$0xff]  }
 0x228   :  { %4479 = vmatprep.subr.bf16.mxu1 %v8871_v60  ;;  %5443 = vmatpush1.bf16.msra.mxu0 %v8890_v8  ;;  %v10326_v47 = vsel %vm980_vm3, %v1071_v25, %v1075_v0  ;;  %v11590_v60 = vshll.u32 %v10004_v15, 16  ;;  %v1113_v8 = vshll.u32 %v10317_v55, 16  ;;  %v1756_v25 = vsel %vm1658_vm2, %v1735_v20, %v1755_v22  ;;  %v8881_v20 = vld [vmem:[#allocation6 + $0x4e0] ss:$16 sps:$4 sm:$0xff]   ;;  %v8889_v7 = vld [vmem:[#allocation6 + $0x504] ss:$16 sps:$4 sm:$0xff]  }
 0x229   :  { %5444 = vmatprep.subr.bf16.mxu0 %v8898_v61  ;;  %v8883_v61 = vld [vmem:[#allocation6 + $0x4e4] ss:$16 sps:$4 sm:$0xff]   ;;  %v10336_v51 = vsel %vm980_vm3, %v1095_v39, %v1099_v38  ;;  %v8908_v39 = vld [vmem:[#allocation6 + $0x4e8] ss:$16 sps:$4 sm:$0xff]   ;;  %v1087_v21 = vor.u32 %v11591_v27, %v1075_v0  ;;  %v11679_v52 = vrot.slane %v10326_v47, 3 }
 0x22a   :  { %v11598_v46 = vrot.slane %v10336_v51, 3  ;;  %v8895_v27 = vld [vmem:[#allocation6 + $0x524] ss:$16 sps:$4 sm:$0xff]  }
 0x22b   :  { %4480 = vmatpush1.bf16.msra.mxu1 %v8869_v56  ;;  %v11594_v56 = vrot.slane %v10326_v47, 3 }
 0x22c   :  { %4481 = vmatprep.subr.bf16.mxu1 %v8877_v13  ;;  %5445 = vmatpush1.bf16.msra.mxu0 %v8896_v48  ;;  %v1091_v13 = vrot.slane %v11590_v60, 1  ;;  %v11592_v48 = vshrl.u32 %v10011_v17, 16 }
 0x22d   :  { %4339 = vmatmul.mubr.bf16.gmra.mrb[12].mxu1 %v1734_v33  ;;  %5446 = vmatprep.subr.bf16.mxu0 %v8904_v3  ;;  %v1754_v3 = vsel %vm1658_vm2, %v1733_v4, %v11594_v56  ;;  %v1518_v4 = vrot.slane %v10187_v9, 1  ;;  %v10373_v56 = vld [vmem:[#allocation2 + $0x110] sm:$0xf] }
 0x22e   :  { %5304 = vmatmul.mubr.bf16.gmra.mrb[76].mxu0 %v1734_v33  ;;  %4348 = vmatprep.mubr.bf16.mxu1 %v1756_v25  ;;  %v10344_v33 = vrot.slane %v1113_v8, 1  ;;  %v1111_v60 = vor.u32 %v11592_v48, %v1099_v38  ;;  %v10353_v8 = vld [vmem:[#allocation2 + $0x118] sm:$0xf]  ;;  %v8916_v38 = vld [vmem:[#allocation6 + $0x50c] ss:$16 sps:$4 sm:$0xff]   ;;  %v11601_v48 = vrot.slane %v10175_v54, 1 }
 0x22f   :  { %5313 = vmatprep.mubr.bf16.mxu0 %v1756_v25  ;;  %4482 = vmatpush1.bf16.msra.mxu1 %v8875_v53  ;;  %v10346_v25 = vld [vmem:[#allocation2 + $0x80] sm:$0xf] }
 0x230   :  { %4483 = vmatprep.subr.bf16.mxu1 %v8883_v61  ;;  %5447 = vmatpush1.bf16.msra.mxu0 %v8902_v18  ;;  %v8887_v53 = vld [vmem:[#allocation6 + $0x500] ss:$16 sps:$4 sm:$0xff]   ;;  %v10359_v61 = vsel %vm980_vm3, %v1087_v21, %v1091_v13  ;;  %v10363_v18 = vsel %vm980_vm3, %v1111_v60, %v10344_v33  ;;  %v1105_v0 = vshll.u32 %v10346_v25, 16  ;;  %v1524_v21 = vrot.slane %v10353_v8, 1 }
 0x231   :  { %5448 = vmatprep.subr.bf16.mxu0 %v8910_v63  ;;  %v8914_v63 = vld [vmem:[#allocation6 + $0x508] ss:$16 sps:$4 sm:$0xff]   ;;  %v1776_v60 = vsel %vm1658_vm2, %v1755_v22, %v11598_v46 }
 0x232   :  { %v10386_v46 = vrot.slane %v1105_v0, 1  ;;  %v1525_v44 = vsel %vm1141_vm4, %v1520_v2, %v1524_v21  ;;  %v1522_v0 = vrot.slane %v10373_v56, 1  ;;  %v2073_v22 = vrot.slane %v1524_v21, 3 }
 0x233   :  { %4484 = vmatpush1.bf16.msra.mxu1 %v8881_v20  ;;  %v8919_v20 = vld [vmem:[#allocation6 + $0x52c] ss:$16 sps:$4 sm:$0xff]   ;;  %v2053_v15 = vrot.slane %v1525_v44, 3 }
 0x234   :  { %4485 = vmatprep.subr.bf16.mxu1 %v8889_v7  ;;  %5449 = vmatpush1.bf16.msra.mxu0 %v8908_v39  ;;  %v8901_v7 = vld [vmem:[#allocation6 + $0x544] ss:$16 sps:$4 sm:$0xff]   ;;  %v1523_v44 = vsel %vm1141_vm4, %v1518_v4, %v1522_v0  ;;  %v2071_v21 = vrot.slane %v1522_v0, 3 }
 0x235   :  { %4349 = vmatmul.mubr.bf16.gmra.mrb[16].mxu1 %v1754_v3  ;;  %5450 = vmatprep.subr.bf16.mxu0 %v8916_v38  ;;  %v11676_v38 = vshrl.u32 %v10211_v34, 16  ;;  %v2051_v1 = vrot.slane %v1523_v44, 3  ;;  %v1178_v44 = vshrl.u32 %v10401_v24, 16 }
 0x236   :  { %5314 = vmatmul.mubr.bf16.gmra.mrb[80].mxu0 %v1754_v3  ;;  %4358 = vmatprep.mubr.bf16.mxu1 %v1776_v60  ;;  %v10381_v3 = vsel %vm1141_vm4, %v11601_v48, %v1520_v2  ;;  %v8917_v48 = vld [vmem:[#allocation6 + $0x528] ss:$16 sps:$4 sm:$0xff]   ;;  %v8899_v2 = vld [vmem:[#allocation6 + $0x540] ss:$16 sps:$4 sm:$0xff]  }
 0x237   :  { %5323 = vmatprep.mubr.bf16.mxu0 %v1776_v60  ;;  %4486 = vmatpush1.bf16.msra.mxu1 %v8887_v53  ;;  %v11675_v60 = vrot.slane %v10170_v50, 1  ;;  %v11611_v40 = vrot.slane %v10381_v3, 3  ;;  %v1347_v53 = vshll.u32 %v10065_v42, 16  ;;  %v1201_v17 = vrot.slane %v11676_v38, 1 }
 0x238   :  { %4487 = vmatprep.subr.bf16.mxu1 %v8895_v27  ;;  %5451 = vmatpush1.bf16.msra.mxu0 %v8914_v63  ;;  %v10410_v63 = vsel %vm1658_vm2, %v2053_v15, %v2073_v22  ;;  %v11681_v22 = vrot.slane %v10336_v51, 3  ;;  %v10437_v51 = vsel %vm1658_vm2, %v2051_v1, %v2071_v21 }
 0x239   :  { %v10391_v39 = vsel %vm1141_vm4, %v11675_v60, %v1518_v4  ;;  %v1103_v60 = vor.u32 %v11677_v36, %v1091_v13  ;;  %5452 = vmatprep.subr.bf16.mxu0 %v8919_v20  ;;  %v10406_v27 = vsel %vm1658_vm2, %v11611_v40, %v2053_v15  ;;  %v1120_v36 = vshrl.u32 %v10317_v55, 16  ;;  %v8925_v13 = vld [vmem:[#allocation6 + $0x54c] ss:$16 sps:$4 sm:$0xff]   ;;  %v8923_v55 = vld [vmem:[#allocation6 + $0x548] ss:$16 sps:$4 sm:$0xff]   ;;  %11683 = vst [vmem:[#allocation39_spill] sm:$0xff] %v10437_v51 }
 0x23a   :  { %v11678_v40 = vrot.slane %v10359_v61, 3  ;;  %v11680_v15 = vrot.slane %v10363_v18, 3  ;;  %v8928_v20 = vld [vmem:[#allocation6 + $0x56c] ss:$16 sps:$4 sm:$0xff]  }
 0x23b   :  { %v10414_v38 = vsel %vm980_vm3, %v1103_v60, %v10386_v46  ;;  %4488 = vmatpush1.bf16.msra.mxu1 %v8893_v41  ;;  %v8907_v41 = vld [vmem:[#allocation6 + $0x564] ss:$16 sps:$4 sm:$0xff]   ;;  %v1122_v47 = vor.u32 %v1120_v36, %v10344_v33  ;;  %v8905_v36 = vld [vmem:[#allocation6 + $0x560] ss:$16 sps:$4 sm:$0xff]  }
 0x23c   :  { %v1774_v4 = vsel %vm1658_vm2, %v11679_v52, %v11678_v40  ;;  %v1796_v0 = vsel %vm1658_vm2, %v11681_v22, %v11680_v15  ;;  %4489 = vmatprep.subr.bf16.mxu1 %v8901_v7  ;;  %5453 = vmatpush1.bf16.msra.mxu0 %v8917_v48  ;;  %v11682_v40 = vrot.slane %v10391_v39, 3  ;;  %v1181_v7 = vshll.u32 %v10401_v24, 16  ;;  %v8913_v22 = vld [vmem:[#allocation6 + $0x584] ss:$16 sps:$4 sm:$0xff]  }
 0x23d   :  { %4359 = vmatmul.mubr.bf16.gmra.mrb[20].mxu1 %v1774_v4  ;;  %v1349_v15 = vrot.slane %v1347_v53, 1  ;;  %v1335_v48 = vshll.u32 %v10072_v49, 16  ;;  %5454 = vmatprep.subr.bf16.mxu0 %v8925_v13  ;;  %v1186_v53 = vrot.slane %v11685_v12, 2  ;;  %v11686_v49 = vshll.u32 %v10069_v32, 16 }
 0x23e   :  { %5324 = vmatmul.mubr.bf16.gmra.mrb[84].mxu0 %v1774_v4  ;;  %v10434_v52 = vsel %vm1658_vm2, %v11682_v40, %v2051_v1  ;;  %4368 = vmatprep.mubr.bf16.mxu1 %v1796_v0  ;;  %v1180_v40 = vrot.slane %v1178_v44, 1  ;;  %v1183_v60 = vrot.slane %v1181_v7, 2  ;;  %v11684_v1 = vshrl.u32 %v10205_v31, 16 }
 0x23f   :  { %5333 = vmatprep.mubr.bf16.mxu0 %v1796_v0  ;;  %4490 = vmatpush1.bf16.msra.mxu1 %v8899_v2  ;;  %v1354_v51 = vrot.slane %v11686_v49, 1  ;;  %v8926_v0 = vld [vmem:[#allocation6 + $0x568] ss:$16 sps:$4 sm:$0xff]   ;;  %v11687_v4 = vshll.u32 %v10211_v34, 16  ;;  %v1815_v33 = vrot.slane %v1122_v47, 3  ;;  %v1117_v13 = vshrl.u32 %v10346_v25, 16 }
 0x240   :  { %v1185_v21 = vrot.slane %v11684_v1, 1  ;;  %4491 = vmatprep.subr.bf16.mxu1 %v8907_v41  ;;  %5455 = vmatpush1.bf16.msra.mxu0 %v8923_v55  ;;  %v1184_v44 = vor.u32 %v1183_v60, %v1180_v40  ;;  %v1345_v1 = vshrl.u32 %v10065_v42, 16  ;;  %v1364_v12 = vshrl.u32 %v10069_v32, 16  ;;  %v8911_v60 = vld [vmem:[#allocation6 + $0x580] ss:$16 sps:$4 sm:$0xff]  }
 0x241   :  { %v1202_v2 = vrot.slane %v11687_v4, 2  ;;  %5456 = vmatprep.subr.bf16.mxu0 %v8928_v20  ;;  %v11688_v31 = vshll.u32 %v10095_v19, 16  ;;  %v11689_v55 = vrot.slane %v10414_v38, 3  ;;  %v11690_v34 = vrot.slane %v10359_v61, 3  ;;  %v8934_v42 = vld [vmem:[#allocation6 + $0x58c] ss:$16 sps:$4 sm:$0xff]  }
 0x242   :  { %v1187_v7 = vor.u32 %v1186_v53, %v1185_v21  ;;  %v1119_v25 = vor.u32 %v1117_v13, %v10386_v46  ;;  %v11622_v20 = vshll.u32 %v10062_v37, 16  ;;  %v1350_v40 = vor.u32 %v1349_v15, %v1345_v1  ;;  %v8922_v21 = vld [vmem:[#allocation6 + $0x5a4] ss:$16 sps:$4 sm:$0xff]   ;;  %v8932_v53 = vld [vmem:[#allocation6 + $0x588] ss:$16 sps:$4 sm:$0xff]  }
 0x243   :  { %v1370_v49 = vrot.slane %v11688_v31, 1  ;;  %v10456_v41 = vor.u32 %v1202_v2, %v1201_v17  ;;  %v1794_v47 = vsel %vm1658_vm2, %v11690_v34, %v11689_v55  ;;  %4492 = vmatpush1.bf16.msra.mxu1 %v8905_v36  ;;  %v1366_v17 = vor.u32 %v1364_v12, %v1354_v51  ;;  %v8937_v15 = vld [vmem:[#allocation6 + $0x5ac] ss:$16 sps:$4 sm:$0xff]   ;;  %v8931_v34 = vld [vmem:[#allocation6 + $0x5c4] ss:$16 sps:$4 sm:$0xff]  }
 0x244   :  { %v1188_v4 = vsel %vm1176_vm5, %v1184_v44, %v1187_v7  ;;  %4493 = vmatprep.subr.bf16.mxu1 %v8913_v22  ;;  %5457 = vmatpush1.bf16.msra.mxu0 %v8926_v0  ;;  %v11691_v46 = vrot.slane %v10363_v18, 3  ;;  %v11617_v2 = vshll.u32 %v10090_v16, 16  ;;  %v11616_v0 = vshll.u32 %v10115_v59, 16  ;;  %v8920_v18 = vld [vmem:[#allocation6 + $0x5a0] ss:$16 sps:$4 sm:$0xff]  }
 0x245   :  { %v10470_v61 = vsel %vm1176_vm5, %v1187_v7, %v10456_v41  ;;  %4369 = vmatmul.mubr.bf16.gmra.mrb[24].mxu1 %v1794_v47  ;;  %v1677_v13 = vrot.slane %v1188_v4, 3  ;;  %v10478_v22 = vsel %vm980_vm3, %v1366_v17, %v1370_v49  ;;  %v1337_v7 = vrot.slane %v1335_v48, 1  ;;  %5458 = vmatprep.subr.bf16.mxu0 %v8934_v42  ;;  %v9153_v4 = vld [vmem:[#allocation2 + $0x90] sm:$0xf8] }
 0x246   :  { %5334 = vmatmul.mubr.bf16.gmra.mrb[88].mxu0 %v1794_v47  ;;  %v1816_v36 = vsel %vm1658_vm2, %v11691_v46, %v1815_v33  ;;  %v11615_v44 = vrot.slane %v10470_v61, 3  ;;  %v1342_v1 = vrot.slane %v11622_v20, 1  ;;  %v1813_v31 = vrot.slane %v1119_v25, 3  ;;  %v8935_v47 = vld [vmem:[#allocation6 + $0x5a8] ss:$16 sps:$4 sm:$0xff]   ;;  %v10490_v46 = vld [vmem:[#allocation2 + $0xa0] sm:$0xff] }
 0x247   :  { %4378 = vmatprep.mubr.bf16.mxu1 %v1816_v36  ;;  %5343 = vmatprep.mubr.bf16.mxu0 %v1816_v36  ;;  %v1355_v55 = vsel %vm980_vm3, %v1350_v40, %v1354_v51  ;;  %v1333_v48 = vshrl.u32 %v9153_v4, 16  ;;  %v1923_v17 = vrot.slane %v10478_v22, 3  ;;  %v1362_v42 = vrot.slane %v11617_v2, 1  ;;  %v8929_v36 = vld [vmem:[#allocation6 + $0x5c0] ss:$16 sps:$4 sm:$0xff]  }
 0x248   :  { %4494 = vmatpush1.bf16.msra.mxu1 %v8911_v60  ;;  %v10486_v33 = vsel %vm1658_vm2, %v1677_v13, %v11615_v44  ;;  %5459 = vmatpush1.bf16.msra.mxu0 %v8932_v53  ;;  %v11623_v60 = vshrl.u32 %v10490_v46, 16  ;;  %v1380_v25 = vshrl.u32 %v10095_v19, 16  ;;  %v1386_v51 = vrot.slane %v11616_v0, 1  ;;  %v8943_v13 = vld [vmem:[#allocation6 + $0x5cc] ss:$16 sps:$4 sm:$0xff]  }
 0x249   :  { %4495 = vmatprep.subr.bf16.mxu1 %v8922_v21  ;;  %5460 = vmatprep.subr.bf16.mxu0 %v8937_v15  ;;  %v1922_v40 = vrot.slane %v1355_v55, 3  ;;  %v1338_v21 = vor.u32 %v1337_v7, %v1333_v48  ;;  %v11692_v22 = vrot.slane %v10414_v38, 3  ;;  %v11618_v44 = vshll.u32 %v10110_v57, 16  ;;  %v8940_v0 = vld [vmem:[#allocation6 + $0x5e4] ss:$16 sps:$4 sm:$0xff]  }
 0x24a   :  { %v1358_v53 = vor.u32 %v11623_v60, %v1342_v1  ;;  %v1382_v15 = vor.u32 %v1380_v25, %v1370_v49  ;;  %v8941_v55 = vld [vmem:[#allocation6 + $0x5c8] ss:$16 sps:$4 sm:$0xff]   ;;  %v11619_v38 = vshll.u32 %v10135_v29, 16  ;;  %v8946_v48 = vld [vmem:[#allocation6 + $0x5ec] ss:$16 sps:$4 sm:$0xff]  }
 0x24b   :  { %v1814_v4 = vsel %vm1658_vm2, %v11692_v22, %v1813_v31  ;;  %v1924_v7 = vsel %vm1658_vm2, %v1922_v40, %v1923_v17  ;;  %v1343_v31 = vsel %vm980_vm3, %v1338_v21, %v1342_v1  ;;  %v8938_v22 = vld [vmem:[#allocation6 + $0x5e0] ss:$16 sps:$4 sm:$0xff]   ;;  %v10522_v21 = vld [vmem:[#allocation2 + $0x98] sm:$0xf0] }
 0x24c   :  { %4496 = vmatpush1.bf16.msra.mxu1 %v8920_v18  ;;  %5461 = vmatpush1.bf16.msra.mxu0 %v8935_v47  ;;  %v10508_v18 = vsel %vm980_vm3, %v1358_v53, %v1362_v42  ;;  %v1387_v49 = vsel %vm980_vm3, %v1382_v15, %v1386_v51  ;;  %v1378_v53 = vrot.slane %v11618_v44, 1  ;;  %v11620_v15 = vshrl.u32 %v10115_v59, 16 }
 0x24d   :  { %4497 = vmatprep.subr.bf16.mxu1 %v8931_v34  ;;  %4379 = vmatmul.mubr.bf16.gmra.mrb[28].mxu1 %v1814_v4  ;;  %v10513_v34 = vld [vmem:[#allocation2 + $0xb0] sm:$0xff]  ;;  %v1920_v40 = vrot.slane %v10508_v18, 3  ;;  %v1949_v2 = vrot.slane %v1387_v49, 3  ;;  %v1402_v1 = vrot.slane %v11619_v38, 1  ;;  %v11624_v44 = vshll.u32 %v10130_v23, 16 }
 0x24e   :  { %5344 = vmatmul.mubr.bf16.gmra.mrb[92].mxu0 %v1814_v4  ;;  %4388 = vmatprep.mubr.bf16.mxu1 %v1924_v7  ;;  %v11621_v47 = vshrl.u32 %v10513_v34, 16  ;;  %v8944_v4 = vld [vmem:[#allocation6 + $0x5e8] ss:$16 sps:$4 sm:$0xff]   ;;  %v1398_v18 = vor.u32 %v11620_v15, %v1386_v51  ;;  %v1542_v51 = vshll.u32 %v10522_v21, 16  ;;  %v11693_v15 = vshll.u32 %v10069_v32, 16 }
 0x24f   :  { %5353 = vmatprep.mubr.bf16.mxu0 %v1924_v7  ;;  %5462 = vmatprep.subr.bf16.mxu0 %v8943_v13  ;;  %v8949_v7 = vld [vmem:[#allocation6 + $0x604] ss:$16 sps:$4 sm:$0xff]  }
 0x250   :  { %4498 = vmatpush1.bf16.msra.mxu1 %v8929_v36  ;;  %5463 = vmatpush1.bf16.msra.mxu0 %v8941_v55  ;;  %v1919_v36 = vrot.slane %v1343_v31, 3  ;;  %v1374_v13 = vor.u32 %v11621_v47, %v1362_v42  ;;  %v1950_v42 = vsel %vm1658_vm2, %v1923_v17, %v1949_v2  ;;  %v10536_v31 = vsel %vm980_vm3, %v1398_v18, %v1402_v1  ;;  %v10546_v17 = vld [vmem:[#allocation2 + $0x90] sm:$0xf0] }
 0x251   :  { %4499 = vmatprep.subr.bf16.mxu1 %v8940_v0  ;;  %5464 = vmatprep.subr.bf16.mxu0 %v8946_v48  ;;  %v8964_v0 = vld [vmem:[#allocation6 + $0x60c] ss:$16 sps:$4 sm:$0xff]   ;;  %v1539_v48 = vshrl.u32 %v10522_v21, 16  ;;  %v1969_v38 = vrot.slane %v10536_v31, 3  ;;  %v1547_v47 = vrot.slane %v11693_v15, 2  ;;  %v11694_v31 = vshll.u32 %v10095_v19, 16 }
 0x252   :  { %v1921_v55 = vsel %vm1658_vm2, %v1919_v36, %v1920_v40  ;;  %v10530_v49 = vsel %vm980_vm3, %v1374_v13, %v1378_v53  ;;  %v1546_v36 = vrot.slane %v1364_v12, 1  ;;  %v1554_v12 = vrot.slane %v1380_v25, 1 }
 0x253   :  { %v1541_v18 = vrot.slane %v1539_v48, 1  ;;  %v1555_v60 = vrot.slane %v11694_v31, 2  ;;  %v1530_v15 = vshll.u32 %v10546_v17, 16 }
 0x254   :  { %4500 = vmatpush1.bf16.msra.mxu1 %v8938_v22  ;;  %5465 = vmatpush1.bf16.msra.mxu0 %v8944_v4  ;;  %v11626_v22 = vshll.u32 %v10155_v6, 16  ;;  %v1947_v4 = vrot.slane %v10530_v49, 3 }
 0x255   :  { %4662 = vmatprep.subr.bf16.mxu1 %v8949_v7  ;;  %4389 = vmatmul.mubr.bf16.gmra.mrb[32].mxu1 %v1921_v55  ;;  %v10543_v7 = vld [vmem:[#allocation2 + $0xc0] sm:$0xff]  ;;  %v10572_v19 = vor.u32 %v1555_v60, %v1554_v12  ;;  %v1532_v31 = vrot.slane %v1530_v15, 2 }
 0x256   :  { %5354 = vmatmul.mubr.bf16.gmra.mrb[96].mxu0 %v1921_v55  ;;  %4398 = vmatprep.mubr.bf16.mxu1 %v1950_v42  ;;  %v11625_v13 = vshrl.u32 %v10543_v7, 16  ;;  %v1544_v55 = vrot.slane %v1542_v51, 2  ;;  %v1418_v48 = vrot.slane %v11626_v22, 1  ;;  %v1548_v51 = vor.u32 %v1547_v47, %v1546_v36 }
 0x257   :  { %5363 = vmatprep.mubr.bf16.mxu0 %v1950_v42  ;;  %5627 = vmatprep.subr.bf16.mxu0 %v8964_v0  ;;  %v1394_v42 = vrot.slane %v11624_v44, 1  ;;  %v11627_v0 = vshrl.u32 %v10135_v29, 16  ;;  %v1527_v44 = vshrl.u32 %v10546_v17, 16  ;;  %v1948_v32 = vsel %vm1658_vm2, %v1920_v40, %v1947_v4 }
 0x258   :  { %v1390_v49 = vor.u32 %v11625_v13, %v1378_v53  ;;  %v1545_v20 = vor.u32 %v1544_v55, %v1541_v18  ;;  %v11695_v53 = vshrl.u32 %v10490_v46, 16  ;;  %v1970_v18 = vsel %vm1658_vm2, %v1949_v2, %v1969_v38 }
 0x259   :  { %v1414_v25 = vor.u32 %v11627_v0, %v1402_v1  ;;  %v11628_v40 = vshll.u32 %v10150_v5, 16  ;;  %v1529_v36 = vrot.slane %v1527_v44, 1  ;;  %v11696_v1 = vshll.u32 %v10062_v37, 16 }
 0x25a   :  { %v1534_v13 = vrot.slane %v11695_v53, 1  ;;  %v1395_v55 = vsel %vm980_vm3, %v1390_v49, %v1394_v42  ;;  %v1549_v47 = vsel %vm1176_vm5, %v1545_v20, %v1548_v51  ;;  %v10581_v20 = vsel %vm1176_vm5, %v1548_v51, %v10572_v19 }
 0x25b   :  { %v1535_v22 = vrot.slane %v11696_v1, 2  ;;  %v1419_v53 = vsel %vm980_vm3, %v1414_v25, %v1418_v48  ;;  %v1934_v60 = vrot.slane %v1549_v47, 3  ;;  %v11637_v12 = vrot.slane %v10581_v20, 3  ;;  %v10586_v1 = vld [vmem:[#allocation2 + $0xd0] sm:$0xff] }
 0x25c   :  { %v1533_v49 = vor.u32 %v1532_v31, %v1529_v36  ;;  %v11697_v44 = vshrl.u32 %v10513_v34, 16  ;;  %v1967_v37 = vrot.slane %v1395_v55, 3  ;;  %v11698_v25 = vshll.u32 %v10090_v16, 16 }
 0x25d   :  { %4399 = vmatmul.mubr.bf16.gmra.mrb[36].mxu1 %v1948_v32  ;;  %v1989_v2 = vrot.slane %v1419_v53, 3  ;;  %v1410_v51 = vrot.slane %v11628_v40, 1  ;;  %v10596_v47 = vsel %vm1658_vm2, %v1934_v60, %v11637_v12  ;;  %v11699_v55 = vshll.u32 %v10175_v54, 16  ;;  %v10624_v40 = vld [vmem:[#allocation2 + $0xe0] sm:$0xff] }
 0x25e   :  { %5364 = vmatmul.mubr.bf16.gmra.mrb[100].mxu0 %v1948_v32  ;;  %4408 = vmatprep.mubr.bf16.mxu1 %v1970_v18  ;;  %v1536_v32 = vor.u32 %v1535_v22, %v1534_v13  ;;  %v1550_v15 = vrot.slane %v11697_v44, 1  ;;  %v1551_v0 = vrot.slane %v11698_v25, 2  ;;  %v11632_v13 = vshrl.u32 %v10155_v6, 16 }
 0x25f   :  { %5373 = vmatprep.mubr.bf16.mxu0 %v1970_v18  ;;  %v11635_v18 = vshrl.u32 %v10586_v1, 16  ;;  %v1434_v36 = vrot.slane %v11699_v55, 1  ;;  %v1968_v53 = vsel %vm1658_vm2, %v1947_v4, %v1967_v37  ;;  %v11630_v60 = vshll.u32 %v10170_v50, 16 }
 0x260   :  { %v1537_v22 = vsel %vm1176_vm5, %v1533_v49, %v1536_v32  ;;  %v10602_v31 = vor.u32 %v1551_v0, %v1550_v15  ;;  %v1430_v44 = vor.u32 %v11632_v13, %v1418_v48  ;;  %v1990_v25 = vsel %vm1658_vm2, %v1969_v38, %v1989_v2 }
 0x261   :  { %v1406_v16 = vor.u32 %v11635_v18, %v1394_v42  ;;  %v1931_v15 = vrot.slane %v1537_v22, 3  ;;  %v11631_v48 = vshll.u32 %v10191_v10, 16  ;;  %v11633_v38 = vshrl.u32 %v10624_v40, 16 }
 0x262   :  { %v10612_v49 = vsel %vm1176_vm5, %v1536_v32, %v10602_v31  ;;  %v1435_v4 = vsel %vm980_vm3, %v1430_v44, %v1434_v36  ;;  %v1426_v22 = vrot.slane %v11630_v60, 1  ;;  %v11636_v60 = vshll.u32 %v10187_v9, 16 }
 0x263   :  { %11700 = vst [vmem:[#allocation40_spill] sm:$0xff] %v10612_v49  ;;  %v1411_v0 = vsel %vm980_vm3, %v1406_v16, %v1410_v51  ;;  %v11629_v42 = vrot.slane %v10612_v49, 3  ;;  %v11634_v16 = vshrl.u32 %v10175_v54, 16  ;;  %v1450_v44 = vrot.slane %v11631_v48, 1  ;;  %v8968_v49 = vld [vmem:[#allocation6 + $0x628] ss:$16 sps:$4 sm:$0xff]  }
 0x264   :  { %v1987_v55 = vrot.slane %v1411_v0, 3  ;;  %v1464_v13 = vshll.u32 %v10353_v8, 16  ;;  %v1456_v18 = vshll.u32 %v10373_v56, 16 }
 0x265   :  { %4409 = vmatmul.mubr.bf16.gmra.mrb[40].mxu1 %v1968_v53  ;;  %v10622_v32 = vsel %vm1658_vm2, %v1931_v15, %v11629_v42  ;;  %v1446_v0 = vor.u32 %v11634_v16, %v1434_v36 }
 0x266   :  { %5374 = vmatmul.mubr.bf16.gmra.mrb[104].mxu0 %v1968_v53  ;;  %4418 = vmatprep.mubr.bf16.mxu1 %v1990_v25  ;;  %v2009_v53 = vrot.slane %v1435_v4, 3  ;;  %v1988_v15 = vsel %vm1658_vm2, %v1967_v37, %v1987_v55  ;;  %v10642_v37 = vld [vmem:[#allocation2 + $0xf0] sm:$0xff] }
 0x267   :  { %5383 = vmatprep.mubr.bf16.mxu0 %v1990_v25  ;;  %v1422_v25 = vor.u32 %v11633_v38, %v1410_v51  ;;  %v1451_v48 = vsel %vm980_vm3, %v1446_v0, %v1450_v44  ;;  %v11640_v36 = vshrl.u32 %v10642_v37, 16 }
 0x268   :  { %v2010_v4 = vsel %vm1658_vm2, %v1989_v2, %v2009_v53  ;;  %v2029_v38 = vrot.slane %v1451_v48, 3  ;;  %v11638_v2 = vshrl.u32 %v10191_v10, 16  ;;  %v8970_v10 = vld [vmem:[#allocation6 + $0x62c] ss:$16 sps:$4 sm:$0xff]  }
 0x269   :  { %v1427_v42 = vsel %vm980_vm3, %v1422_v25, %v1426_v22  ;;  %v1466_v25 = vrot.slane %v1464_v13, 1  ;;  %v1438_v16 = vor.u32 %v11640_v36, %v1426_v22  ;;  %v11639_v22 = vshrl.u32 %v10187_v9, 16  ;;  %v9161_v36 = vld [vmem:[#allocation2 + $0x18] sm:$0xff] }
 0x26a   :  { %v2007_v51 = vrot.slane %v1427_v42, 3  ;;  %v1462_v0 = vor.u32 %v11638_v2, %v1450_v44  ;;  %v2030_v42 = vsel %vm1658_vm2, %v2009_v53, %v2029_v38 }
 0x26c   :  { %v1467_v13 = vsel %vm980_vm3, %v1462_v0, %v1466_v25 }
 0x26d   :  { %4419 = vmatmul.mubr.bf16.gmra.mrb[44].mxu1 %v1988_v15  ;;  %v2049_v12 = vrot.slane %v1467_v13, 3  ;;  %v10664_v13 = vld [vmem:[#allocation2 + $0x8] sm:$0xf0] }
 0x26e   :  { %5384 = vmatmul.mubr.bf16.gmra.mrb[108].mxu0 %v1988_v15  ;;  %4428 = vmatprep.mubr.bf16.mxu1 %v2010_v4  ;;  %v1442_v15 = vrot.slane %v11636_v60, 1 }
 0x26f   :  { %5393 = vmatprep.mubr.bf16.mxu0 %v2010_v4  ;;  %v2008_v4 = vsel %vm1658_vm2, %v1987_v55, %v2007_v51  ;;  %v1458_v55 = vrot.slane %v1456_v18, 1  ;;  %v1468_v18 = vshrl.u32 %v10373_v56, 16 }
 0x270   :  { %v1443_v48 = vsel %vm980_vm3, %v1438_v16, %v1442_v15  ;;  %v1454_v44 = vor.u32 %v11639_v22, %v1442_v15  ;;  %v2050_v16 = vsel %vm1658_vm2, %v2029_v38, %v2049_v12  ;;  %v9160_v15 = vld [vmem:[#allocation2 + $0x28] sm:$0xff]  ;;  %v1146_v38 = vrot.slane %v9161_v36, 1  ;;  %v9163_v36 = vld [vmem:[#allocation2 + $0x10] sm:$0xff] }
 0x271   :  { %v2027_v60 = vrot.slane %v1443_v48, 3  ;;  %v1150_v22 = vrot.slane %v9160_v15, 1  ;;  %v1143_v15 = vrot.slane %v9163_v36, 1  ;;  %v1328_v36 = vld [vmem:[#allocation2 + $0x110] sm:$0x1f] }
 0x273   :  { %v2028_v53 = vsel %vm1658_vm2, %v2007_v51, %v2027_v60  ;;  %v1470_v51 = vor.u32 %v1468_v18, %v1458_v55  ;;  %v1142_v18 = vrot.slane %v10401_v24, 1 }
 0x275   :  { %4429 = vmatmul.mubr.bf16.gmra.mrb[48].mxu1 %v2008_v4 }
 0x276   :  { %5394 = vmatmul.mubr.bf16.gmra.mrb[112].mxu0 %v2008_v4  ;;  %4438 = vmatprep.mubr.bf16.mxu1 %v2030_v42  ;;  %v1471_v4 = vshrl.u32 %v10353_v8, 16 }
 0x277   :  { %5403 = vmatprep.mubr.bf16.mxu0 %v2030_v42  ;;  %v1459_v42 = vsel %vm980_vm3, %v1454_v44, %v1458_v55  ;;  %v2067_v44 = vrot.slane %v1470_v51, 3 }
 0x278   :  { %v1473_v2 = vor.u32 %v1471_v4, %v1466_v25  ;;  %v2047_v0 = vrot.slane %v1459_v42, 3 }
 0x27a   :  { %v2069_v48 = vrot.slane %v1473_v2, 3  ;;  %v2048_v8 = vsel %vm1658_vm2, %v2027_v60, %v2047_v0  ;;  %v1151_v2 = vsel %vm1141_vm4, %v1146_v38, %v1150_v22  ;;  %v1154_v60 = vrot.slane %v10215_v45, 1 }
 0x27b   :  { %v1675_v4 = vrot.slane %v1151_v2, 3  ;;  %v8947_v2 = vld [vmem:[#allocation6 + $0x600] ss:$16 sps:$4 sm:$0xff]  }
 0x27c   :  { %v2070_v25 = vsel %vm1658_vm2, %v2049_v12, %v2069_v48  ;;  %v10680_v51 = vsel %vm1141_vm4, %v1150_v22, %v1154_v60  ;;  %v9165_v22 = vld [vmem:[#allocation2 + $0x108] sm:$0xff] }
 0x27d   :  { %4439 = vmatmul.mubr.bf16.gmra.mrb[52].mxu1 %v2028_v53 }
 0x27e   :  { %5404 = vmatmul.mubr.bf16.gmra.mrb[116].mxu0 %v2028_v53  ;;  %4448 = vmatprep.mubr.bf16.mxu1 %v2050_v16  ;;  %v1145_v53 = vrot.slane %v10664_v13, 1 }
 0x27f   :  { %5413 = vmatprep.mubr.bf16.mxu0 %v2050_v16  ;;  %v9162_v16 = vld [vmem:[#allocation2 + $0x20] sm:$0xff] }
 0x280   :  { %v1147_v56 = vsel %vm1141_vm4, %v1145_v53, %v1146_v38  ;;  %v1148_v42 = vrot.slane %v9162_v16, 1  ;;  %v1144_v53 = vsel %vm1141_vm4, %v1142_v18, %v1143_v15  ;;  %v8952_v16 = vld [vmem:[#allocation6 + $0x624] ss:$16 sps:$4 sm:$0xff]  }
 0x281   :  { %v1674_v55 = vrot.slane %v1147_v56, 3 }
 0x282   :  { %v10677_v48 = vsel %vm1141_vm4, %v1143_v15, %v1148_v42  ;;  %v8962_v15 = vld [vmem:[#allocation6 + $0x608] ss:$16 sps:$4 sm:$0xff]  }
 0x283   :  { %v1676_v12 = vsel %vm1658_vm2, %v1674_v55, %v1675_v4  ;;  %v1672_v24 = vrot.slane %v10677_v48, 3  ;;  %v10687_v55 = vld [vmem:[#allocation2 + $0xf8] sm:$0xff] }
 0x284   :  { %11701 = vst [vmem:[#allocation41_spill] sm:$0xff] %v10687_v55 }
 0x285   :  { %4449 = vmatmul.mubr.bf16.gmra.mrb[56].mxu1 %v2048_v8 }
 0x286   :  { %5414 = vmatmul.mubr.bf16.gmra.mrb[120].mxu0 %v2048_v8  ;;  %4458 = vmatprep.mubr.bf16.mxu1 %v2070_v25  ;;  %v2068_v8 = vsel %vm1658_vm2, %v2047_v0, %v2067_v44  ;;  %v1152_v0 = vrot.slane %v10235_v35, 1  ;;  %v1671_v44 = vrot.slane %v1144_v53, 3  ;;  %v11702_v53 = vrot.slane %v10680_v51, 3 }
 0x287   :  { %5423 = vmatprep.mubr.bf16.mxu0 %v2070_v25  ;;  %v1329_v25 = vld [vmem:[#allocation2 + $0x118] sm:$0x1f] }
 0x288   :  { %v1673_v18 = vsel %vm1658_vm2, %v1671_v44, %v1672_v24  ;;  %v1652_v38 = vrot.slane %v1329_v25, 2  ;;  %v1700_v56 = vsel %vm1658_vm2, %v1675_v4, %v11702_v53  ;;  %v10695_v9 = vsel %vm1141_vm4, %v1148_v42, %v1152_v0  ;;  %v8955_v53 = vld [vmem:[#allocation6 + $0x644] ss:$16 sps:$4 sm:$0xff]  }
 0x289   :  { %v11704_v25 = vrot.slane %v10268_v14, 1  ;;  %v11650_v4 = vrot.slane %v10642_v37, 2 }
 0x28a   :  { %v2081_v6 = vrot.slane %v1652_v38, 3 }
 0x28d   :  { %4459 = vmatmul.mubr.bf16.gmra.mrb[60].mxu1 %v2068_v8 }
 0x28e   :  { %5424 = vmatmul.mubr.bf16.gmra.mrb[124].mxu0 %v2068_v8  ;;  %4501 = vmatprep.mubr.bf16.mxu1 %v1676_v12  ;;  %v1648_v8 = vrot.slane %v9165_v22, 2  ;;  %v11703_v22 = vrot.slane %v10687_v55, 2  ;;  %v1156_v55 = vrot.slane %v10256_v28, 1 }
 0x28f   :  { %5466 = vmatprep.mubr.bf16.mxu0 %v1676_v12  ;;  %v9166_v12 = vld [vmem:[#allocation2 + $0x100] sm:$0xff] }
 0x290   :  { %v1646_v48 = vrot.slane %v9166_v12, 2  ;;  %v10700_v44 = vsel %vm1271_vm6, %v11703_v22, %v1648_v8  ;;  %v8950_v12 = vld [vmem:[#allocation6 + $0x620] ss:$16 sps:$4 sm:$0xff]   ;;  %v1653_v42 = vsel %vm1271_vm6, %v1648_v8, %v1652_v38  ;;  %v8976_v38 = vld [vmem:[#allocation6 + $0x64c] ss:$16 sps:$4 sm:$0xff]  }
 0x291   :  { %v11651_v22 = vrot.slane %v10700_v44, 3  ;;  %v2061_v5 = vrot.slane %v1653_v42, 3 }
 0x295   :  { %4502 = vmatmul.mubr.bf16.vlgmr.msra.gmra.mrb[0].mxu1 %v1673_v18 }
 0x296   :  { %5467 = vmatmul.mubr.bf16.vlgmr.msra.gmra.mrb[64].mxu0 %v1673_v18  ;;  %4663 = vmatpush1.bf16.msra.mxu1 %v8947_v2  ;;  %v10705_v18 = vsel %vm1141_vm4, %v1154_v60, %v11704_v25  ;;  %v1697_v2 = vrot.slane %v10695_v9, 3  ;;  %v10715_v60 = vsel %vm1271_vm6, %v11650_v4, %v1646_v48  ;;  %v1650_v25 = vrot.slane %v1328_v36, 2  ;;  %v8953_v4 = vld [vmem:[#allocation6 + $0x640] ss:$16 sps:$4 sm:$0xff]  }
 0x297   :  { %4511 = vmatprep.mubr.bf16.mxu1 %v1700_v56  ;;  %5476 = vmatprep.mubr.bf16.mxu0 %v1700_v56  ;;  %v1719_v56 = vrot.slane %v10705_v18, 3  ;;  %v1162_v9 = vrot.slane %v10292_v30, 1  ;;  %v11653_v36 = vrot.slane %v10715_v60, 3 }
 0x298   :  { %4664 = vmatprep.subr.bf16.mxu1 %v8952_v16  ;;  %5628 = vmatpush1.bf16.msra.mxu0 %v8962_v15  ;;  %v10721_v16 = vsel %vm1658_vm2, %v11651_v22, %v2061_v5  ;;  %v1651_v8 = vsel %vm1271_vm6, %v1646_v48, %v1650_v25  ;;  %v10726_v15 = vsel %vm1658_vm2, %v2061_v5, %v2081_v6  ;;  %v2079_v42 = vrot.slane %v1650_v25, 3  ;;  %v8982_v6 = vld [vmem:[#allocation6 + $0x66c] ss:$16 sps:$4 sm:$0xff]  }
 0x299   :  { %5629 = vmatprep.subr.bf16.mxu0 %v8970_v10  ;;  %11705 = vst [vmem:[#allocation42_spill] sm:$0xff] %v10721_v16  ;;  %11706 = vst [vmem:[#allocation43_spill] sm:$0xff] %v10726_v15  ;;  %v2059_v10 = vrot.slane %v1651_v8, 3  ;;  %v1698_v18 = vsel %vm1658_vm2, %v1672_v24, %v1697_v2  ;;  %v1157_v22 = vsel %vm1141_vm4, %v1152_v0, %v1156_v55  ;;  %v8958_v16 = vld [vmem:[#allocation6 + $0x664] ss:$16 sps:$4 sm:$0xff]   ;;  %v11707_v48 = vrot.slane %v10680_v51, 3 }
 0x29a   :  { %4665 = vmatpush1.bf16.msra.mxu1 %v8950_v12  ;;  %v8974_v12 = vld [vmem:[#allocation6 + $0x648] ss:$16 sps:$4 sm:$0xff]   ;;  %v8956_v0 = vld [vmem:[#allocation6 + $0x660] ss:$16 sps:$4 sm:$0xff]   ;;  %v1717_v51 = vrot.slane %v1157_v22, 3 }
 0x29b   :  { %4666 = vmatprep.subr.bf16.mxu1 %v8955_v53  ;;  %v1720_v5 = vsel %vm1658_vm2, %v11707_v48, %v1719_v56  ;;  %v10737_v53 = vsel %vm1658_vm2, %v11653_v36, %v2059_v10  ;;  %v10740_v25 = vsel %vm1658_vm2, %v2059_v10, %v2079_v42  ;;  %v8961_v8 = vld [vmem:[#allocation6 + $0x684] ss:$16 sps:$4 sm:$0xff]   ;;  %v1160_v36 = vrot.slane %v10311_v62, 1  ;;  %v9167_v42 = vld [vmem:[#allocation2 + $0x68] sm:$0xff] }
 0x29c   :  { %5630 = vmatpush1.bf16.msra.mxu0 %v8968_v49  ;;  %11708 = vst [vmem:[#allocation44_spill] sm:$0xff] %v10740_v25  ;;  %v11709_v49 = vrot.slane %v10268_v14, 1  ;;  %v1166_v10 = vrot.slane %v9167_v42, 1  ;;  %v8988_v25 = vld [vmem:[#allocation6 + $0x68c] ss:$16 sps:$4 sm:$0xff]   ;;  %v1718_v15 = vsel %vm1658_vm2, %v1697_v2, %v1717_v51 }
 0x29d   :  { %4512 = vmatmul.mubr.bf16.gmra.mrb[4].mxu1 %v1698_v18  ;;  %5631 = vmatprep.subr.bf16.mxu0 %v8976_v38  ;;  %v8986_v38 = vld [vmem:[#allocation6 + $0x688] ss:$16 sps:$4 sm:$0xff]   ;;  %v8973_v2 = vld [vmem:[#allocation6 + $0x6c4] ss:$16 sps:$4 sm:$0xff]   ;;  %v9000_v42 = vld [vmem:[#allocation6 + $0x6cc] ss:$16 sps:$4 sm:$0xff]  }
 0x29e   :  { %5477 = vmatmul.mubr.bf16.gmra.mrb[68].mxu0 %v1698_v18  ;;  %4521 = vmatprep.mubr.bf16.mxu1 %v1720_v5  ;;  %v1163_v24 = vsel %vm1141_vm4, %v11709_v49, %v1162_v9  ;;  %v8980_v18 = vld [vmem:[#allocation6 + $0x668] ss:$16 sps:$4 sm:$0xff]   ;;  %v8965_v49 = vld [vmem:[#allocation6 + $0x6a0] ss:$16 sps:$4 sm:$0xff]  }
 0x29f   :  { %5486 = vmatprep.mubr.bf16.mxu0 %v1720_v5  ;;  %4667 = vmatpush1.bf16.msra.mxu1 %v8953_v4  ;;  %v1739_v48 = vrot.slane %v1163_v24, 3  ;;  %v8959_v5 = vld [vmem:[#allocation6 + $0x680] ss:$16 sps:$4 sm:$0xff]   ;;  %v8967_v4 = vld [vmem:[#allocation6 + $0x6a4] ss:$16 sps:$4 sm:$0xff]  }
 0x2a0   :  { %4668 = vmatprep.subr.bf16.mxu1 %v8958_v16  ;;  %5632 = vmatpush1.bf16.msra.mxu0 %v8974_v12  ;;  %v1161_v16 = vsel %vm1141_vm4, %v1156_v55, %v1160_v36  ;;  %v8994_v12 = vld [vmem:[#allocation6 + $0x6ac] ss:$16 sps:$4 sm:$0xff]   ;;  %v8971_v55 = vld [vmem:[#allocation6 + $0x6c0] ss:$16 sps:$4 sm:$0xff]  }
 0x2a1   :  { %5633 = vmatprep.subr.bf16.mxu0 %v8982_v6  ;;  %v1740_v22 = vsel %vm1658_vm2, %v1719_v56, %v1739_v48  ;;  %v1167_v6 = vsel %vm1141_vm4, %v1162_v9, %v1166_v10  ;;  %v1737_v24 = vrot.slane %v1161_v16, 3  ;;  %v9168_v56 = vld [vmem:[#allocation2 + $0x78] sm:$0xff]  ;;  %v8979_v9 = vld [vmem:[#allocation6 + $0x6e4] ss:$16 sps:$4 sm:$0xff]  }
 0x2a3   :  { %4669 = vmatpush1.bf16.msra.mxu1 %v8956_v0  ;;  %v8992_v0 = vld [vmem:[#allocation6 + $0x6a8] ss:$16 sps:$4 sm:$0xff]  }
 0x2a4   :  { %4670 = vmatprep.subr.bf16.mxu1 %v8961_v8  ;;  %5634 = vmatpush1.bf16.msra.mxu0 %v8980_v18  ;;  %v1759_v8 = vrot.slane %v1167_v6, 3  ;;  %v1170_v18 = vrot.slane %v9168_v56, 1 }
 0x2a5   :  { %4522 = vmatmul.mubr.bf16.gmra.mrb[8].mxu1 %v1718_v15  ;;  %5635 = vmatprep.subr.bf16.mxu0 %v8988_v25  ;;  %v8998_v25 = vld [vmem:[#allocation6 + $0x6c8] ss:$16 sps:$4 sm:$0xff]  }
 0x2a6   :  { %5487 = vmatmul.mubr.bf16.gmra.mrb[72].mxu0 %v1718_v15  ;;  %4531 = vmatprep.mubr.bf16.mxu1 %v1740_v22  ;;  %v1164_v15 = vrot.slane %v10338_v26, 1  ;;  %v1171_v16 = vsel %vm1141_vm4, %v1166_v10, %v1170_v18  ;;  %v8991_v10 = vld [vmem:[#allocation6 + $0x724] ss:$16 sps:$4 sm:$0xff]  }
 0x2a7   :  { %5496 = vmatprep.mubr.bf16.mxu0 %v1740_v22  ;;  %4671 = vmatpush1.bf16.msra.mxu1 %v8959_v5  ;;  %v1738_v22 = vsel %vm1658_vm2, %v1717_v51, %v1737_v24  ;;  %v1760_v5 = vsel %vm1658_vm2, %v1739_v48, %v1759_v8  ;;  %v8985_v51 = vld [vmem:[#allocation6 + $0x704] ss:$16 sps:$4 sm:$0xff]   ;;  %v9169_v48 = vld [vmem:[#allocation2 + $0x88] sm:$0xf] }
 0x2a8   :  { %4672 = vmatprep.subr.bf16.mxu1 %v8967_v4  ;;  %5636 = vmatpush1.bf16.msra.mxu0 %v8986_v38  ;;  %v1165_v4 = vsel %vm1141_vm4, %v1160_v36, %v1164_v15  ;;  %v9006_v38 = vld [vmem:[#allocation6 + $0x6ec] ss:$16 sps:$4 sm:$0xff]   ;;  %v1174_v56 = vrot.slane %v9169_v48, 1  ;;  %v8983_v36 = vld [vmem:[#allocation6 + $0x700] ss:$16 sps:$4 sm:$0xff]  }
 0x2a9   :  { %5637 = vmatprep.subr.bf16.mxu0 %v8994_v12  ;;  %v8977_v12 = vld [vmem:[#allocation6 + $0x6e0] ss:$16 sps:$4 sm:$0xff]   ;;  %v1757_v6 = vrot.slane %v1165_v4, 3 }
 0x2aa   :  { %v1175_v4 = vsel %vm1141_vm4, %v1170_v18, %v1174_v56  ;;  %v9019_v18 = vld [vmem:[#allocation6 + $0x748] ss:$16 sps:$4 sm:$0xff]  }
 0x2ab   :  { %4673 = vmatpush1.bf16.msra.mxu1 %v8965_v49  ;;  %v9004_v49 = vld [vmem:[#allocation6 + $0x6e8] ss:$16 sps:$4 sm:$0xff]  }
 0x2ac   :  { %4674 = vmatprep.subr.bf16.mxu1 %v8973_v2  ;;  %5638 = vmatpush1.bf16.msra.mxu0 %v8992_v0  ;;  %v1779_v2 = vrot.slane %v1171_v16, 3  ;;  %v1168_v0 = vrot.slane %v10383_v43, 1 }
 0x2ad   :  { %4532 = vmatmul.mubr.bf16.gmra.mrb[12].mxu1 %v1738_v22  ;;  %5639 = vmatprep.subr.bf16.mxu0 %v9000_v42 }
 0x2ae   :  { %5497 = vmatmul.mubr.bf16.gmra.mrb[76].mxu0 %v1738_v22  ;;  %4541 = vmatprep.mubr.bf16.mxu1 %v1760_v5  ;;  %v9012_v22 = vld [vmem:[#allocation6 + $0x70c] ss:$16 sps:$4 sm:$0xff]   ;;  %v1780_v42 = vsel %vm1658_vm2, %v1759_v8, %v1779_v2  ;;  %v8995_v8 = vld [vmem:[#allocation6 + $0x740] ss:$16 sps:$4 sm:$0xff]  }
 0x2af   :  { %5506 = vmatprep.mubr.bf16.mxu0 %v1760_v5  ;;  %4675 = vmatpush1.bf16.msra.mxu1 %v8971_v55  ;;  %v1758_v5 = vsel %vm1658_vm2, %v1737_v24, %v1757_v6  ;;  %v9010_v55 = vld [vmem:[#allocation6 + $0x708] ss:$16 sps:$4 sm:$0xff]   ;;  %v8997_v24 = vld [vmem:[#allocation6 + $0x744] ss:$16 sps:$4 sm:$0xff]  }
 0x2b0   :  { %4676 = vmatprep.subr.bf16.mxu1 %v8979_v9  ;;  %5640 = vmatpush1.bf16.msra.mxu0 %v8998_v25  ;;  %v1169_v9 = vsel %vm1141_vm4, %v1164_v15, %v1168_v0  ;;  %v9015_v25 = vld [vmem:[#allocation6 + $0x72c] ss:$16 sps:$4 sm:$0xff]  }
 0x2b1   :  { %5641 = vmatprep.subr.bf16.mxu0 %v9006_v38  ;;  %v8989_v38 = vld [vmem:[#allocation6 + $0x720] ss:$16 sps:$4 sm:$0xff]   ;;  %v1777_v16 = vrot.slane %v1169_v9, 3  ;;  %v9021_v15 = vld [vmem:[#allocation6 + $0x74c] ss:$16 sps:$4 sm:$0xff]  }
 0x2b3   :  { %4677 = vmatpush1.bf16.msra.mxu1 %v8977_v12  ;;  %v9013_v12 = vld [vmem:[#allocation6 + $0x728] ss:$16 sps:$4 sm:$0xff]  }
 0x2b4   :  { %4678 = vmatprep.subr.bf16.mxu1 %v8985_v51  ;;  %5642 = vmatpush1.bf16.msra.mxu0 %v9004_v49  ;;  %v1799_v51 = vrot.slane %v1175_v4, 3  ;;  %v9170_v49 = vld [vmem:[#allocation2 + $0x80] sm:$0xf]  ;;  %v1819_v4 = vrot.slane %v1174_v56, 3 }
 0x2b5   :  { %4542 = vmatmul.mubr.bf16.gmra.mrb[16].mxu1 %v1758_v5  ;;  %5643 = vmatprep.subr.bf16.mxu0 %v9012_v22  ;;  %v1172_v48 = vrot.slane %v9170_v49, 1  ;;  %v1495_v49 = vrot.slane %v10522_v21, 1 }
 0x2b6   :  { %5507 = vmatmul.mubr.bf16.gmra.mrb[80].mxu0 %v1758_v5  ;;  %4551 = vmatprep.mubr.bf16.mxu1 %v1780_v42  ;;  %v1778_v5 = vsel %vm1658_vm2, %v1757_v6, %v1777_v16  ;;  %v9022_v6 = vld [vmem:[#allocation6 + $0x768] ss:$16 sps:$4 sm:$0xff]   ;;  %v1820_v56 = vsel %vm1658_vm2, %v1799_v51, %v1819_v4 }
 0x2b7   :  { %5516 = vmatprep.mubr.bf16.mxu0 %v1780_v42  ;;  %4679 = vmatpush1.bf16.msra.mxu1 %v8983_v36  ;;  %v9003_v42 = vld [vmem:[#allocation6 + $0x764] ss:$16 sps:$4 sm:$0xff]   ;;  %v1800_v36 = vsel %vm1658_vm2, %v1779_v2, %v1799_v51  ;;  %v1173_v22 = vsel %vm1141_vm4, %v1168_v0, %v1172_v48  ;;  %v9030_v2 = vld [vmem:[#allocation6 + $0x78c] ss:$16 sps:$4 sm:$0xff]   ;;  %v1492_v51 = vrot.slane %v10546_v17, 1 }
 0x2b8   :  { %4680 = vmatprep.subr.bf16.mxu1 %v8991_v10  ;;  %5644 = vmatpush1.bf16.msra.mxu0 %v9010_v55  ;;  %v9024_v10 = vld [vmem:[#allocation6 + $0x76c] ss:$16 sps:$4 sm:$0xff]   ;;  %v9001_v55 = vld [vmem:[#allocation6 + $0x760] ss:$16 sps:$4 sm:$0xff]   ;;  %v1797_v9 = vrot.slane %v1173_v22, 3 }
 0x2b9   :  { %5645 = vmatprep.subr.bf16.mxu0 %v9015_v25  ;;  %v9009_v25 = vld [vmem:[#allocation6 + $0x784] ss:$16 sps:$4 sm:$0xff]   ;;  %v9016_v22 = vld [vmem:[#allocation6 + $0x7a0] ss:$16 sps:$4 sm:$0xff]   ;;  %v9173_v4 = vld [vmem:[#allocation2 + $0xc8] sm:$0xff] }
 0x2ba   :  { %v1798_v0 = vsel %vm1658_vm2, %v1777_v16, %v1797_v9  ;;  %v1817_v16 = vrot.slane %v1172_v48, 3  ;;  %v9039_v48 = vld [vmem:[#allocation6 + $0x7cc] ss:$16 sps:$4 sm:$0xff]  }
 0x2bb   :  { %4681 = vmatpush1.bf16.msra.mxu1 %v8989_v38  ;;  %v9171_v38 = vld [vmem:[#allocation2 + $0xb8] sm:$0xff] }
 0x2bc   :  { %4682 = vmatprep.subr.bf16.mxu1 %v8997_v24  ;;  %5646 = vmatpush1.bf16.msra.mxu0 %v9013_v12  ;;  %v1500_v24 = vrot.slane %v9171_v38, 1  ;;  %v9007_v12 = vld [vmem:[#allocation6 + $0x780] ss:$16 sps:$4 sm:$0xff]   ;;  %v1504_v38 = vrot.slane %v9173_v4, 1  ;;  %v9060_v4 = vld [vmem:[#allocation6 + $0x80c] ss:$16 sps:$4 sm:$0xff]  }
 0x2bd   :  { %4552 = vmatmul.mubr.bf16.gmra.mrb[20].mxu1 %v1778_v5  ;;  %5647 = vmatprep.subr.bf16.mxu0 %v9021_v15  ;;  %v9018_v15 = vld [vmem:[#allocation6 + $0x7a4] ss:$16 sps:$4 sm:$0xff]  }
 0x2be   :  { %5517 = vmatmul.mubr.bf16.gmra.mrb[84].mxu0 %v1778_v5  ;;  %4561 = vmatprep.mubr.bf16.mxu1 %v1800_v36  ;;  %v9172_v5 = vld [vmem:[#allocation2 + $0xa8] sm:$0xff] }
 0x2bf   :  { %5526 = vmatprep.mubr.bf16.mxu0 %v1800_v36  ;;  %4683 = vmatpush1.bf16.msra.mxu1 %v8995_v8  ;;  %v1496_v8 = vrot.slane %v9172_v5, 1  ;;  %v9036_v5 = vld [vmem:[#allocation6 + $0x7e4] ss:$16 sps:$4 sm:$0xff]  }
 0x2c0   :  { %4684 = vmatprep.subr.bf16.mxu1 %v9003_v42  ;;  %5648 = vmatpush1.bf16.msra.mxu0 %v9019_v18  ;;  %v9028_v42 = vld [vmem:[#allocation6 + $0x788] ss:$16 sps:$4 sm:$0xff]   ;;  %v9033_v18 = vld [vmem:[#allocation6 + $0x7ac] ss:$16 sps:$4 sm:$0xff]  }
 0x2c1   :  { %5649 = vmatprep.subr.bf16.mxu0 %v9024_v10  ;;  %v1501_v36 = vsel %vm1141_vm4, %v1496_v8, %v1500_v24  ;;  %v1497_v21 = vsel %vm1141_vm4, %v1495_v49, %v1496_v8  ;;  %v9027_v10 = vld [vmem:[#allocation6 + $0x7c4] ss:$16 sps:$4 sm:$0xff]   ;;  %v1818_v49 = vsel %vm1658_vm2, %v1797_v9, %v1817_v16  ;;  %v9037_v8 = vld [vmem:[#allocation6 + $0x7c8] ss:$16 sps:$4 sm:$0xff]   ;;  %v1502_v16 = vrot.slane %v10543_v7, 1 }
 0x2c3   :  { %4685 = vmatpush1.bf16.msra.mxu1 %v9001_v55  ;;  %v9031_v55 = vld [vmem:[#allocation6 + $0x7a8] ss:$16 sps:$4 sm:$0xff]  }
 0x2c4   :  { %4686 = vmatprep.subr.bf16.mxu1 %v9009_v25  ;;  %5650 = vmatpush1.bf16.msra.mxu0 %v9022_v6  ;;  %v1929_v25 = vrot.slane %v1501_v36, 3  ;;  %v1498_v6 = vrot.slane %v10513_v34, 1  ;;  %v9045_v36 = vld [vmem:[#allocation6 + $0x804] ss:$16 sps:$4 sm:$0xff]  }
 0x2c5   :  { %4562 = vmatmul.mubr.bf16.gmra.mrb[24].mxu1 %v1798_v0  ;;  %5651 = vmatprep.subr.bf16.mxu0 %v9030_v2  ;;  %v9025_v2 = vld [vmem:[#allocation6 + $0x7c0] ss:$16 sps:$4 sm:$0xff]  }
 0x2c6   :  { %5527 = vmatmul.mubr.bf16.gmra.mrb[88].mxu0 %v1798_v0  ;;  %4571 = vmatprep.mubr.bf16.mxu1 %v1820_v56  ;;  %v1928_v0 = vrot.slane %v1497_v21, 3 }
 0x2c7   :  { %5536 = vmatprep.mubr.bf16.mxu0 %v1820_v56  ;;  %4687 = vmatpush1.bf16.msra.mxu1 %v9007_v12  ;;  %v1493_v12 = vrot.slane %v10490_v46, 1  ;;  %v1505_v46 = vsel %vm1141_vm4, %v1500_v24, %v1504_v38  ;;  %v9034_v56 = vld [vmem:[#allocation6 + $0x7e0] ss:$16 sps:$4 sm:$0xff]  }
 0x2c8   :  { %4688 = vmatprep.subr.bf16.mxu1 %v9018_v15  ;;  %5652 = vmatpush1.bf16.msra.mxu0 %v9028_v42  ;;  %v1930_v34 = vsel %vm1658_vm2, %v1928_v0, %v1929_v25  ;;  %v9042_v15 = vld [vmem:[#allocation6 + $0x7ec] ss:$16 sps:$4 sm:$0xff]   ;;  %v1503_v0 = vsel %vm1141_vm4, %v1498_v6, %v1502_v16 }
 0x2c9   :  { %5653 = vmatprep.subr.bf16.mxu0 %v9033_v18  ;;  %v1499_v17 = vsel %vm1141_vm4, %v1493_v12, %v1498_v6  ;;  %v1494_v42 = vsel %vm1141_vm4, %v1492_v51, %v1493_v12  ;;  %v9040_v18 = vld [vmem:[#allocation6 + $0x7e8] ss:$16 sps:$4 sm:$0xff]  }
 0x2ca   :  { %v1926_v9 = vrot.slane %v1499_v17, 3  ;;  %v1925_v21 = vrot.slane %v1494_v42, 3 }
 0x2cb   :  { %4689 = vmatpush1.bf16.msra.mxu1 %v9016_v22  ;;  %v1953_v22 = vrot.slane %v1505_v46, 3  ;;  %v1510_v46 = vrot.slane %v10624_v40, 1 }
 0x2cc   :  { %4690 = vmatprep.subr.bf16.mxu1 %v9027_v10  ;;  %5654 = vmatpush1.bf16.msra.mxu0 %v9031_v55  ;;  %v9174_v10 = vld [vmem:[#allocation2 + $0xd8] sm:$0xff]  ;;  %v1927_v24 = vsel %vm1658_vm2, %v1925_v21, %v1926_v9 }
 0x2cd   :  { %4572 = vmatmul.mubr.bf16.gmra.mrb[28].mxu1 %v1818_v49  ;;  %5655 = vmatprep.subr.bf16.mxu0 %v9039_v48  ;;  %v1508_v55 = vrot.slane %v9174_v10, 1  ;;  %v1954_v51 = vsel %vm1658_vm2, %v1929_v25, %v1953_v22 }
 0x2ce   :  { %5537 = vmatmul.mubr.bf16.gmra.mrb[92].mxu0 %v1818_v49  ;;  %4581 = vmatprep.mubr.bf16.mxu1 %v1930_v34  ;;  %v1506_v49 = vrot.slane %v10586_v1, 1 }
 0x2cf   :  { %5546 = vmatprep.mubr.bf16.mxu0 %v1930_v34  ;;  %4691 = vmatpush1.bf16.msra.mxu1 %v9025_v2  ;;  %v1509_v12 = vsel %vm1141_vm4, %v1504_v38, %v1508_v55  ;;  %v1951_v2 = vrot.slane %v1503_v0, 3  ;;  %v11712_v0 = vrot.slane %v10381_v3, 3  ;;  %v11714_v3 = vshrl.u32 %v10193_v11, 16 }
 0x2d0   :  { %4692 = vmatprep.subr.bf16.mxu1 %v9036_v5  ;;  %5656 = vmatpush1.bf16.msra.mxu0 %v9037_v8  ;;  %v1973_v48 = vrot.slane %v1509_v12, 3  ;;  %v9175_v5 = vld [vmem:[#allocation2 + $0xe8] sm:$0xff]  ;;  %v1507_v25 = vsel %vm1141_vm4, %v1502_v16, %v1506_v49 }
 0x2d1   :  { %5657 = vmatprep.subr.bf16.mxu0 %v9042_v15  ;;  %v1512_v8 = vrot.slane %v9175_v5, 1  ;;  %v1952_v34 = vsel %vm1658_vm2, %v1926_v9, %v1951_v2  ;;  %v1971_v38 = vrot.slane %v1507_v25, 3  ;;  %v1511_v9 = vsel %vm1141_vm4, %v1506_v49, %v1510_v46 }
 0x2d2   :  { %v1974_v17 = vsel %vm1658_vm2, %v1953_v22, %v1973_v48  ;;  %v1991_v22 = vrot.slane %v1511_v9, 3  ;;  %v1190_v49 = vshrl.u32 %v10664_v13, 16  ;;  %v1193_v5 = vshll.u32 %v10664_v13, 16 }
 0x2d3   :  { %4693 = vmatpush1.bf16.msra.mxu1 %v9034_v56  ;;  %v1513_v6 = vsel %vm1141_vm4, %v1508_v55, %v1512_v8  ;;  %v1972_v42 = vsel %vm1658_vm2, %v1951_v2, %v1971_v38  ;;  %v11711_v55 = vrot.slane %v10170_v50, 1  ;;  %v11713_v2 = vrot.slane %v10391_v39, 3 }
 0x2d4   :  { %5658 = vmatpush1.bf16.msra.mxu0 %v9040_v18  ;;  %4855 = vmatprep.subr.bf16.mxu1 %v9045_v36  ;;  %v1993_v15 = vrot.slane %v1513_v6, 3  ;;  %v11710_v18 = vrot.slane %v10175_v54, 1  ;;  %v1992_v21 = vsel %vm1658_vm2, %v1971_v38, %v1991_v22  ;;  %v1192_v25 = vrot.slane %v1190_v49, 1 }
 0x2d5   :  { %4582 = vmatmul.mubr.bf16.gmra.mrb[32].mxu1 %v1927_v24  ;;  %5820 = vmatprep.subr.bf16.mxu0 %v9060_v4  ;;  %v1515_v4 = vsel %vm1141_vm4, %v1510_v46, %v11711_v55  ;;  %v1195_v39 = vrot.slane %v1193_v5, 2  ;;  %v11716_v6 = vshrl.u32 %v10183_v58, 16 }
 0x2d6   :  { %5547 = vmatmul.mubr.bf16.gmra.mrb[96].mxu0 %v1927_v24  ;;  %4591 = vmatprep.mubr.bf16.mxu1 %v1954_v51  ;;  %v1994_v56 = vsel %vm1658_vm2, %v1973_v48, %v1993_v15  ;;  %v1517_v36 = vsel %vm1141_vm4, %v1512_v8, %v11710_v18  ;;  %v2011_v24 = vrot.slane %v1515_v4, 3  ;;  %v1205_v8 = vrot.slane %v11714_v3, 1  ;;  %v9043_v3 = vld [vmem:[#allocation6 + $0x800] ss:$16 sps:$4 sm:$0xff]  }
 0x2d7   :  { %5556 = vmatprep.mubr.bf16.mxu0 %v1954_v51  ;;  %v2013_v16 = vrot.slane %v1517_v36, 3  ;;  %v1197_v38 = vrot.slane %v11716_v6, 1  ;;  %v11719_v18 = vshll.u32 %v10215_v45, 16  ;;  %v11722_v4 = vshll.u32 %v10235_v35, 16 }
 0x2d8   :  { %v2012_v51 = vsel %vm1658_vm2, %v1991_v22, %v2011_v24  ;;  %v2032_v48 = vsel %vm1658_vm2, %v2011_v24, %v11713_v2  ;;  %v11727_v6 = vshll.u32 %v10256_v28, 16 }
 0x2d9   :  { %v2014_v10 = vsel %vm1658_vm2, %v1993_v15, %v2013_v16  ;;  %v2034_v12 = vsel %vm1658_vm2, %v2013_v16, %v11712_v0  ;;  %v11717_v15 = vshll.u32 %v10183_v58, 16  ;;  %v1214_v58 = vrot.slane %v11719_v18, 2  ;;  %v9064_v18 = vld [vmem:[#allocation6 + $0x828] ss:$16 sps:$4 sm:$0xff]  }
 0x2da   :  { %v1210_v24 = vrot.slane %v11722_v4, 2  ;;  %v11732_v4 = vshrl.u32 %v10311_v62, 16  ;;  %v9057_v62 = vld [vmem:[#allocation6 + $0x884] ss:$16 sps:$4 sm:$0xff]  }
 0x2db   :  { %v1198_v13 = vrot.slane %v11717_v15, 2  ;;  %v9066_v15 = vld [vmem:[#allocation6 + $0x82c] ss:$16 sps:$4 sm:$0xff]  }
 0x2dd   :  { %4592 = vmatmul.mubr.bf16.gmra.mrb[36].mxu1 %v1952_v34 }
 0x2de   :  { %5557 = vmatmul.mubr.bf16.gmra.mrb[100].mxu0 %v1952_v34  ;;  %4601 = vmatprep.mubr.bf16.mxu1 %v1974_v17  ;;  %v11715_v34 = vshll.u32 %v10193_v11, 16 }
 0x2df   :  { %5566 = vmatprep.mubr.bf16.mxu0 %v1974_v17 }
 0x2e0   :  { %v1206_v17 = vrot.slane %v11715_v34, 2  ;;  %v9048_v34 = vld [vmem:[#allocation6 + $0x824] ss:$16 sps:$4 sm:$0xff]  }
 0x2e2   :  { %v1207_v46 = vor.u32 %v1206_v17, %v1205_v8  ;;  %v9058_v17 = vld [vmem:[#allocation6 + $0x808] ss:$16 sps:$4 sm:$0xff]  }
 0x2e5   :  { %4602 = vmatmul.mubr.bf16.gmra.mrb[40].mxu1 %v1972_v42 }
 0x2e6   :  { %5567 = vmatmul.mubr.bf16.gmra.mrb[104].mxu0 %v1972_v42  ;;  %4611 = vmatprep.mubr.bf16.mxu1 %v1994_v56  ;;  %v1196_v42 = vor.u32 %v1195_v39, %v1192_v25 }
 0x2e7   :  { %5576 = vmatprep.mubr.bf16.mxu0 %v1994_v56  ;;  %v1199_v56 = vor.u32 %v1198_v13, %v1197_v38  ;;  %v1218_v38 = vrot.slane %v11727_v6, 2  ;;  %v9046_v13 = vld [vmem:[#allocation6 + $0x820] ss:$16 sps:$4 sm:$0xff]   ;;  %v9084_v6 = vld [vmem:[#allocation6 + $0x88c] ss:$16 sps:$4 sm:$0xff]  }
 0x2e9   :  { %v1208_v11 = vsel %vm1176_vm5, %v1199_v56, %v1207_v46  ;;  %v1200_v36 = vsel %vm1176_vm5, %v1196_v42, %v1199_v56  ;;  %v11728_v42 = vshrl.u32 %v10292_v30, 16  ;;  %v11729_v56 = vld [vmem:[#allocation30_spill] sm:$0xff]  ;;  %v11731_v30 = vrot.slane %v10470_v61, 3 }
 0x2ea   :  { %v1681_v22 = vrot.slane %v1208_v11, 3  ;;  %v11730_v11 = vshll.u32 %v11729_v56, 16 }
 0x2ed   :  { %4612 = vmatmul.mubr.bf16.gmra.mrb[44].mxu1 %v1992_v21 }
 0x2ee   :  { %5577 = vmatmul.mubr.bf16.gmra.mrb[108].mxu0 %v1992_v21  ;;  %4621 = vmatprep.mubr.bf16.mxu1 %v2014_v10  ;;  %v1680_v21 = vrot.slane %v1200_v36, 3 }
 0x2ef   :  { %5586 = vmatprep.mubr.bf16.mxu0 %v2014_v10  ;;  %v11720_v10 = vld [vmem:[#allocation39_spill] sm:$0xff] }
 0x2f5   :  { %4622 = vmatmul.mubr.bf16.gmra.mrb[48].mxu1 %v2012_v51 }
 0x2f6   :  { %5587 = vmatmul.mubr.bf16.gmra.mrb[112].mxu0 %v2012_v51  ;;  %4631 = vmatprep.mubr.bf16.mxu1 %v2034_v12  ;;  %v11723_v51 = vshrl.u32 %v10268_v14, 16  ;;  %v11726_v14 = vshrl.u32 %v10256_v28, 16 }
 0x2f7   :  { %5596 = vmatprep.mubr.bf16.mxu0 %v2034_v12  ;;  %v11724_v12 = vld [vmem:[#allocation28_spill] sm:$0xff] }
 0x2f8   :  { %v1221_v0 = vrot.slane %v11723_v51, 1  ;;  %v11725_v2 = vshll.u32 %v11724_v12, 16  ;;  %v1217_v39 = vrot.slane %v11726_v14, 1  ;;  %v9078_v12 = vld [vmem:[#allocation6 + $0x86c] ss:$16 sps:$4 sm:$0xff]  }
 0x2fd   :  { %4632 = vmatmul.mubr.bf16.gmra.mrb[52].mxu1 %v2032_v48 }
 0x2fe   :  { %5597 = vmatmul.mubr.bf16.gmra.mrb[116].mxu0 %v2032_v48  ;;  %4641 = vmatprep.mubr.bf16.mxu1 %v10406_v27  ;;  %v1222_v48 = vrot.slane %v11725_v2, 2  ;;  %v11735_v2 = vld [vmem:[#allocation32_spill] sm:$0xff] }
 0x2ff   :  { %5606 = vmatprep.mubr.bf16.mxu0 %v10406_v27  ;;  %v11718_v27 = vshrl.u32 %v10215_v45, 16 }
 0x300   :  { %v1223_v8 = vor.u32 %v1222_v48, %v1221_v0  ;;  %v11736_v48 = vshrl.u32 %v11735_v2, 16 }
 0x301   :  { %v1213_v9 = vrot.slane %v11718_v27, 1  ;;  %v1230_v27 = vrot.slane %v11730_v11, 2  ;;  %v11739_v11 = vld [vmem:[#allocation31_spill] sm:$0xff] }
 0x303   :  { %v1215_v16 = vor.u32 %v1214_v58, %v1213_v9  ;;  %v1219_v58 = vor.u32 %v1218_v38, %v1217_v39 }
 0x305   :  { %4642 = vmatmul.mubr.bf16.gmra.mrb[56].mxu1 %v10434_v52  ;;  %v1216_v45 = vsel %vm1176_vm5, %v1207_v46, %v1215_v16  ;;  %v1224_v46 = vsel %vm1176_vm5, %v1215_v16, %v1223_v8  ;;  %v9072_v16 = vld [vmem:[#allocation6 + $0x84c] ss:$16 sps:$4 sm:$0xff]  }
 0x306   :  { %5607 = vmatmul.mubr.bf16.gmra.mrb[120].mxu0 %v10434_v52  ;;  %4651 = vmatprep.mubr.bf16.mxu1 %v10410_v63  ;;  %v1682_v52 = vsel %vm1658_vm2, %v1680_v21, %v1681_v22  ;;  %v1703_v49 = vrot.slane %v1216_v45, 3  ;;  %v1723_v28 = vrot.slane %v1224_v46, 3  ;;  %v11733_v45 = vld [vmem:[#allocation29_spill] sm:$0xff] }
 0x307   :  { %5616 = vmatprep.mubr.bf16.mxu0 %v10410_v63  ;;  %v11721_v63 = vshrl.u32 %v10235_v35, 16  ;;  %v11734_v51 = vshll.u32 %v11733_v45, 16 }
 0x308   :  { %v1704_v35 = vsel %vm1658_vm2, %v1681_v22, %v1703_v49  ;;  %v9049_v22 = vld [vmem:[#allocation6 + $0x840] ss:$16 sps:$4 sm:$0xff]  }
 0x309   :  { %v1209_v55 = vrot.slane %v11721_v63, 1  ;;  %v1724_v63 = vsel %vm1658_vm2, %v1703_v49, %v1723_v28  ;;  %v1226_v0 = vrot.slane %v11734_v51, 2  ;;  %v9052_v49 = vld [vmem:[#allocation6 + $0x860] ss:$16 sps:$4 sm:$0xff]  }
 0x30a   :  { %v9067_v51 = vld [vmem:[#allocation6 + $0x8c0] ss:$16 sps:$4 sm:$0xff]  }
 0x30b   :  { %v1211_v5 = vor.u32 %v1210_v24, %v1209_v55  ;;  %v1225_v24 = vrot.slane %v11732_v4, 1 }
 0x30d   :  { %4652 = vmatmul.mubr.bf16.gmra.mrb[60].mxu1 %v11720_v10  ;;  %v1212_v25 = vsel %vm1176_vm5, %v10456_v41, %v1211_v5  ;;  %v9051_v41 = vld [vmem:[#allocation6 + $0x844] ss:$16 sps:$4 sm:$0xff]   ;;  %v1220_v55 = vsel %vm1176_vm5, %v1211_v5, %v1219_v58  ;;  %v1227_v14 = vor.u32 %v1226_v0, %v1225_v24  ;;  %v9096_v0 = vld [vmem:[#allocation6 + $0x8cc] ss:$16 sps:$4 sm:$0xff]  }
 0x30e   :  { %5617 = vmatmul.mubr.bf16.gmra.mrb[124].mxu0 %v11720_v10  ;;  %4694 = vmatprep.mubr.bf16.mxu1 %v1682_v52  ;;  %v1701_v9 = vrot.slane %v1212_v25, 3  ;;  %v9054_v10 = vld [vmem:[#allocation6 + $0x864] ss:$16 sps:$4 sm:$0xff]   ;;  %v1721_v5 = vrot.slane %v1220_v55, 3 }
 0x30f   :  { %5659 = vmatprep.mubr.bf16.mxu0 %v1682_v52  ;;  %v9070_v52 = vld [vmem:[#allocation6 + $0x848] ss:$16 sps:$4 sm:$0xff]  }
 0x310   :  { %v1702_v21 = vsel %vm1658_vm2, %v11731_v30, %v1701_v9  ;;  %v1722_v38 = vsel %vm1658_vm2, %v1701_v9, %v1721_v5 }
 0x315   :  { %4695 = vmatmul.mubr.bf16.vlgmr.msra.gmra.mrb[0].mxu1 %v10486_v33 }
 0x316   :  { %5660 = vmatmul.mubr.bf16.vlgmr.msra.gmra.mrb[64].mxu0 %v10486_v33  ;;  %4856 = vmatpush1.bf16.msra.mxu1 %v9043_v3  ;;  %v1229_v33 = vrot.slane %v11728_v42, 1  ;;  %v1237_v3 = vrot.slane %v11736_v48, 1  ;;  %v10870_v42 = vsel %vm1176_vm5, %v1219_v58, %v1227_v14  ;;  %v9061_v58 = vld [vmem:[#allocation6 + $0x8a0] ss:$16 sps:$4 sm:$0xff]  }
 0x317   :  { %4704 = vmatprep.mubr.bf16.mxu1 %v1704_v35  ;;  %5669 = vmatprep.mubr.bf16.mxu0 %v1704_v35  ;;  %v9076_v35 = vld [vmem:[#allocation6 + $0x868] ss:$16 sps:$4 sm:$0xff]  }
 0x318   :  { %4857 = vmatprep.subr.bf16.mxu1 %v9048_v34  ;;  %5821 = vmatpush1.bf16.msra.mxu0 %v9058_v17  ;;  %v1231_v36 = vor.u32 %v1230_v27, %v1229_v33  ;;  %v11737_v34 = vshll.u32 %v11735_v2, 16  ;;  %v11738_v33 = vshrl.u32 %v10338_v26, 16  ;;  %v11740_v27 = vshll.u32 %v11739_v11, 16  ;;  %v9094_v2 = vld [vmem:[#allocation6 + $0x8c8] ss:$16 sps:$4 sm:$0xff]  }
 0x319   :  { %5822 = vmatprep.subr.bf16.mxu0 %v9066_v15  ;;  %v9063_v15 = vld [vmem:[#allocation6 + $0x8a4] ss:$16 sps:$4 sm:$0xff]   ;;  %v1741_v26 = vrot.slane %v10870_v42, 3  ;;  %v9079_v11 = vld [vmem:[#allocation6 + $0x900] ss:$16 sps:$4 sm:$0xff]  }
 0x31a   :  { %4858 = vmatpush1.bf16.msra.mxu1 %v9046_v13  ;;  %v1232_v61 = vsel %vm1176_vm5, %v1223_v8, %v1231_v36  ;;  %v1238_v17 = vrot.slane %v11737_v34, 2  ;;  %v9055_v8 = vld [vmem:[#allocation6 + $0x880] ss:$16 sps:$4 sm:$0xff]   ;;  %v9082_v13 = vld [vmem:[#allocation6 + $0x888] ss:$16 sps:$4 sm:$0xff]   ;;  %v1233_v56 = vrot.slane %v11738_v33, 1 }
 0x31b   :  { %4859 = vmatprep.subr.bf16.mxu1 %v9051_v41  ;;  %v1743_v25 = vrot.slane %v1232_v61, 3  ;;  %v1234_v41 = vrot.slane %v11740_v27, 2  ;;  %v9075_v61 = vld [vmem:[#allocation6 + $0x8e4] ss:$16 sps:$4 sm:$0xff]   ;;  %v11744_v34 = vshrl.u32 %v10383_v43, 16 }
 0x31c   :  { %5823 = vmatpush1.bf16.msra.mxu0 %v9064_v18  ;;  %v1239_v39 = vor.u32 %v1238_v17, %v1237_v3  ;;  %v9090_v18 = vld [vmem:[#allocation6 + $0x8ac] ss:$16 sps:$4 sm:$0xff]   ;;  %v9100_v43 = vld [vmem:[#allocation6 + $0x8e8] ss:$16 sps:$4 sm:$0xff]  }
 0x31d   :  { %4705 = vmatmul.mubr.bf16.gmra.mrb[4].mxu1 %v1702_v21  ;;  %5824 = vmatprep.subr.bf16.mxu0 %v9072_v16  ;;  %v1744_v46 = vsel %vm1658_vm2, %v1723_v28, %v1743_v25  ;;  %v1235_v55 = vor.u32 %v1234_v41, %v1233_v56  ;;  %v1241_v17 = vrot.slane %v11744_v34, 1  ;;  %v9108_v27 = vld [vmem:[#allocation6 + $0x90c] ss:$16 sps:$4 sm:$0xff]  }
 0x31e   :  { %5670 = vmatmul.mubr.bf16.gmra.mrb[68].mxu0 %v1702_v21  ;;  %4714 = vmatprep.mubr.bf16.mxu1 %v1724_v63  ;;  %v10877_v9 = vsel %vm1176_vm5, %v1231_v36, %v1239_v39 }
 0x31f   :  { %5679 = vmatprep.mubr.bf16.mxu0 %v1724_v63  ;;  %4860 = vmatpush1.bf16.msra.mxu1 %v9049_v22  ;;  %v11741_v22 = vld [vmem:[#allocation34_spill] sm:$0xff]  ;;  %v1763_v36 = vrot.slane %v10877_v9, 3  ;;  %v1236_v3 = vsel %vm1176_vm5, %v1227_v14, %v1235_v55  ;;  %v9081_v14 = vld [vmem:[#allocation6 + $0x904] ss:$16 sps:$4 sm:$0xff]  }
 0x320   :  { %4861 = vmatprep.subr.bf16.mxu1 %v9054_v10  ;;  %5825 = vmatpush1.bf16.msra.mxu0 %v9070_v52  ;;  %v11742_v16 = vshrl.u32 %v11741_v22, 16  ;;  %v11743_v28 = vshll.u32 %v11741_v22, 16  ;;  %v10883_v10 = vld [vmem:[#allocation2 + $0x88] sm:$0x1f]  ;;  %v9069_v52 = vld [vmem:[#allocation6 + $0x8c4] ss:$16 sps:$4 sm:$0xff]  }
 0x321   :  { %5826 = vmatprep.subr.bf16.mxu0 %v9078_v12  ;;  %v9088_v63 = vld [vmem:[#allocation6 + $0x8a8] ss:$16 sps:$4 sm:$0xff]   ;;  %v1259_v24 = vshrl.u32 %v10883_v10, 16  ;;  %v1262_v45 = vshll.u32 %v10883_v10, 16  ;;  %v1742_v12 = vsel %vm1658_vm2, %v1721_v5, %v1741_v26  ;;  %v1764_v48 = vsel %vm1658_vm2, %v1743_v25, %v1763_v36 }
 0x322   :  { %v1245_v30 = vrot.slane %v11742_v16, 1  ;;  %v1246_v21 = vrot.slane %v11743_v28, 2  ;;  %v1761_v25 = vrot.slane %v1236_v3, 3  ;;  %v9106_v9 = vld [vmem:[#allocation6 + $0x908] ss:$16 sps:$4 sm:$0xff]  }
 0x323   :  { %4862 = vmatpush1.bf16.msra.mxu1 %v9052_v49  ;;  %v11745_v49 = vld [vmem:[#allocation33_spill] sm:$0xff] }
 0x324   :  { %4863 = vmatprep.subr.bf16.mxu1 %v9057_v62  ;;  %5827 = vmatpush1.bf16.msra.mxu0 %v9076_v35  ;;  %v1247_v4 = vor.u32 %v1246_v21, %v1245_v30  ;;  %v11746_v62 = vshll.u32 %v11745_v49, 16  ;;  %v1762_v41 = vsel %vm1658_vm2, %v1741_v26, %v1761_v25  ;;  %v9111_v21 = vld [vmem:[#allocation6 + $0x92c] ss:$16 sps:$4 sm:$0xff]   ;;  %v9085_v26 = vld [vmem:[#allocation6 + $0x920] ss:$16 sps:$4 sm:$0xff]  }
 0x325   :  { %4715 = vmatmul.mubr.bf16.gmra.mrb[8].mxu1 %v1722_v38  ;;  %5828 = vmatprep.subr.bf16.mxu0 %v9084_v6  ;;  %v1261_v6 = vrot.slane %v1259_v24, 1  ;;  %v9109_v24 = vld [vmem:[#allocation6 + $0x928] ss:$16 sps:$4 sm:$0xff]   ;;  %v9097_v3 = vld [vmem:[#allocation6 + $0x960] ss:$16 sps:$4 sm:$0xff]  }
 0x326   :  { %5680 = vmatmul.mubr.bf16.gmra.mrb[72].mxu0 %v1722_v38  ;;  %4724 = vmatprep.mubr.bf16.mxu1 %v1744_v46  ;;  %v1242_v35 = vrot.slane %v11746_v62, 2  ;;  %v1248_v5 = vsel %vm1176_vm5, %v1239_v39, %v1247_v4  ;;  %v1264_v38 = vrot.slane %v1262_v45, 2  ;;  %v9118_v49 = vld [vmem:[#allocation6 + $0x968] ss:$16 sps:$4 sm:$0xff]  }
 0x327   :  { %5689 = vmatprep.mubr.bf16.mxu0 %v1744_v46  ;;  %4864 = vmatpush1.bf16.msra.mxu1 %v9055_v8  ;;  %v9102_v8 = vld [vmem:[#allocation6 + $0x8ec] ss:$16 sps:$4 sm:$0xff]   ;;  %v1783_v46 = vrot.slane %v1248_v5, 3 }
 0x328   :  { %4865 = vmatprep.subr.bf16.mxu1 %v9063_v15  ;;  %5829 = vmatpush1.bf16.msra.mxu0 %v9082_v13  ;;  %v10897_v15 = vld [vmem:[#allocation2 + $0x80] sm:$0x1f]  ;;  %v1243_v42 = vor.u32 %v1242_v35, %v1241_v17  ;;  %v10901_v39 = vor.u32 %v1264_v38, %v1261_v6  ;;  %v9124_v38 = vld [vmem:[#allocation6 + $0x988] ss:$16 sps:$4 sm:$0xff]  }
 0x329   :  { %5830 = vmatprep.subr.bf16.mxu0 %v9090_v18  ;;  %v9073_v13 = vld [vmem:[#allocation6 + $0x8e0] ss:$16 sps:$4 sm:$0xff]   ;;  %v1250_v33 = vshrl.u32 %v10897_v15, 16  ;;  %v1253_v56 = vshll.u32 %v10897_v15, 16  ;;  %v9087_v18 = vld [vmem:[#allocation6 + $0x924] ss:$16 sps:$4 sm:$0xff]   ;;  %v1784_v22 = vsel %vm1658_vm2, %v1763_v36, %v1783_v46 }
 0x32a   :  { %v1244_v16 = vsel %vm1176_vm5, %v1235_v55, %v1243_v42  ;;  %v9091_v55 = vld [vmem:[#allocation6 + $0x940] ss:$16 sps:$4 sm:$0xff]   ;;  %v9105_v17 = vld [vmem:[#allocation6 + $0x984] ss:$16 sps:$4 sm:$0xff]   ;;  %v1823_v62 = vrot.slane %v10901_v39, 3 }
 0x32b   :  { %4866 = vmatpush1.bf16.msra.mxu1 %v9061_v58  ;;  %v1252_v30 = vrot.slane %v1250_v33, 1  ;;  %v1255_v28 = vrot.slane %v1253_v56, 2  ;;  %v1266_v58 = vsel %vm1176_vm5, %v1247_v4, %v10901_v39  ;;  %v9115_v4 = vld [vmem:[#allocation6 + $0x948] ss:$16 sps:$4 sm:$0xff]   ;;  %v9103_v35 = vld [vmem:[#allocation6 + $0x980] ss:$16 sps:$4 sm:$0xff]  }
 0x32c   :  { %4867 = vmatprep.subr.bf16.mxu1 %v9069_v52  ;;  %5831 = vmatpush1.bf16.msra.mxu0 %v9088_v63  ;;  %v1781_v52 = vrot.slane %v1244_v16, 3  ;;  %v9093_v63 = vld [vmem:[#allocation6 + $0x944] ss:$16 sps:$4 sm:$0xff]   ;;  %v1803_v45 = vrot.slane %v1266_v58, 3  ;;  %v9112_v33 = vld [vmem:[#allocation6 + $0x9a0] ss:$16 sps:$4 sm:$0xff]  }
 0x32d   :  { %4725 = vmatmul.mubr.bf16.gmra.mrb[12].mxu1 %v1742_v12  ;;  %5832 = vmatprep.subr.bf16.mxu0 %v9096_v0  ;;  %v1256_v36 = vor.u32 %v1255_v28, %v1252_v30  ;;  %v9114_v6 = vld [vmem:[#allocation6 + $0x9a4] ss:$16 sps:$4 sm:$0xff]   ;;  %v11749_v16 = vshrl.u32 %v10543_v7, 16  ;;  %v11750_v28 = vshll.u32 %v10110_v57, 16  ;;  %v9138_v58 = vld [vmem:[#allocation6 + $0x9ec] ss:$16 sps:$4 sm:$0xff]  }
 0x32e   :  { %5690 = vmatmul.mubr.bf16.gmra.mrb[76].mxu0 %v1742_v12  ;;  %4734 = vmatprep.mubr.bf16.mxu1 %v1764_v48  ;;  %v1782_v0 = vsel %vm1658_vm2, %v1761_v25, %v1781_v52  ;;  %v9099_v12 = vld [vmem:[#allocation6 + $0x964] ss:$16 sps:$4 sm:$0xff]   ;;  %v9129_v25 = vld [vmem:[#allocation6 + $0x9ac] ss:$16 sps:$4 sm:$0xff]   ;;  %v9130_v7 = vld [vmem:[#allocation6 + $0x9e0] ss:$16 sps:$4 sm:$0xff]  }
 0x32f   :  { %5699 = vmatprep.mubr.bf16.mxu0 %v1764_v48  ;;  %4868 = vmatpush1.bf16.msra.mxu1 %v9067_v51  ;;  %v9117_v51 = vld [vmem:[#allocation6 + $0x94c] ss:$16 sps:$4 sm:$0xff]   ;;  %v1821_v56 = vrot.slane %v1256_v36, 3  ;;  %v9123_v39 = vld [vmem:[#allocation6 + $0x9c4] ss:$16 sps:$4 sm:$0xff]   ;;  %v1558_v30 = vrot.slane %v11749_v16, 1 }
 0x330   :  { %4869 = vmatprep.subr.bf16.mxu1 %v9075_v61  ;;  %5833 = vmatpush1.bf16.msra.mxu0 %v9094_v2  ;;  %v1804_v61 = vsel %vm1658_vm2, %v1783_v46, %v1803_v45  ;;  %v1257_v2 = vsel %vm1176_vm5, %v1243_v42, %v1256_v36  ;;  %v9120_v48 = vld [vmem:[#allocation6 + $0x96c] ss:$16 sps:$4 sm:$0xff]   ;;  %v11748_v46 = vshll.u32 %v10115_v59, 16  ;;  %v9136_v57 = vld [vmem:[#allocation6 + $0x9e8] ss:$16 sps:$4 sm:$0xff]   ;;  %v11767_v16 = vshll.u32 %v10170_v50, 16 }
 0x331   :  { %5834 = vmatprep.subr.bf16.mxu0 %v9102_v8  ;;  %v1801_v34 = vrot.slane %v1257_v2, 3  ;;  %v9126_v8 = vld [vmem:[#allocation6 + $0x98c] ss:$16 sps:$4 sm:$0xff]  }
 0x332   :  { %v1563_v42 = vrot.slane %v11748_v46, 2  ;;  %v11764_v46 = vshrl.u32 %v10175_v54, 16 }
 0x333   :  { %4870 = vmatpush1.bf16.msra.mxu1 %v9073_v13  ;;  %v1802_v5 = vsel %vm1658_vm2, %v1781_v52, %v1801_v34  ;;  %v1824_v13 = vsel %vm1658_vm2, %v1803_v45, %v1823_v62  ;;  %v11751_v52 = vshrl.u32 %v10135_v29, 16 }
 0x334   :  { %4871 = vmatprep.subr.bf16.mxu1 %v9081_v14  ;;  %5835 = vmatpush1.bf16.msra.mxu0 %v9100_v43  ;;  %v11747_v14 = vshrl.u32 %v10115_v59, 16  ;;  %v9133_v59 = vld [vmem:[#allocation6 + $0x9c8] ss:$16 sps:$4 sm:$0xff]  }
 0x335   :  { %4735 = vmatmul.mubr.bf16.gmra.mrb[16].mxu1 %v1762_v41  ;;  %5836 = vmatprep.subr.bf16.mxu0 %v9108_v27 }
 0x336   :  { %5700 = vmatmul.mubr.bf16.gmra.mrb[80].mxu0 %v1762_v41  ;;  %4744 = vmatprep.mubr.bf16.mxu1 %v1784_v22  ;;  %v1562_v43 = vrot.slane %v11747_v14, 1  ;;  %v9121_v41 = vld [vmem:[#allocation6 + $0x9c0] ss:$16 sps:$4 sm:$0xff]  }
 0x337   :  { %5709 = vmatprep.mubr.bf16.mxu0 %v1784_v22  ;;  %4872 = vmatpush1.bf16.msra.mxu1 %v9079_v11  ;;  %v9127_v11 = vld [vmem:[#allocation6 + $0x9a8] ss:$16 sps:$4 sm:$0xff]   ;;  %v9132_v22 = vld [vmem:[#allocation6 + $0x9e4] ss:$16 sps:$4 sm:$0xff]  }
 0x338   :  { %4873 = vmatprep.subr.bf16.mxu1 %v9087_v18  ;;  %5837 = vmatpush1.bf16.msra.mxu0 %v9106_v9  ;;  %v1564_v27 = vor.u32 %v1563_v42, %v1562_v43  ;;  %v9135_v18 = vld [vmem:[#allocation6 + $0x9cc] ss:$16 sps:$4 sm:$0xff]   ;;  %v1822_v9 = vsel %vm1658_vm2, %v1801_v34, %v1821_v56  ;;  %v1586_v42 = vrot.slane %v11764_v46, 1 }
 0x339   :  { %5838 = vmatprep.subr.bf16.mxu0 %v9111_v21  ;;  %v1559_v21 = vrot.slane %v11750_v28, 2  ;;  %v11768_v28 = vld [vmem:[#allocation38_spill] sm:$0xff] }
 0x33b   :  { %4874 = vmatpush1.bf16.msra.mxu1 %v9085_v26  ;;  %v1565_v26 = vsel %vm1176_vm5, %v10572_v19, %v1564_v27  ;;  %v11753_v19 = vrot.slane %v10581_v20, 3 }
 0x33c   :  { %4875 = vmatprep.subr.bf16.mxu1 %v9093_v63  ;;  %5839 = vmatpush1.bf16.msra.mxu0 %v9109_v24  ;;  %v1570_v63 = vrot.slane %v11751_v52, 1  ;;  %v11752_v24 = vshll.u32 %v10135_v29, 16  ;;  %v1957_v36 = vrot.slane %v1565_v26, 3  ;;  %v11770_v26 = vshll.u32 %v11768_v28, 16 }
 0x33d   :  { %4745 = vmatmul.mubr.bf16.gmra.mrb[20].mxu1 %v1782_v0  ;;  %5840 = vmatprep.subr.bf16.mxu0 %v9117_v51 }
 0x33e   :  { %5710 = vmatmul.mubr.bf16.gmra.mrb[84].mxu0 %v1782_v0  ;;  %4754 = vmatprep.mubr.bf16.mxu1 %v1804_v61  ;;  %v1571_v45 = vrot.slane %v11752_v24, 2  ;;  %v1958_v29 = vsel %vm1658_vm2, %v11753_v19, %v1957_v36  ;;  %v11754_v0 = vshrl.u32 %v10586_v1, 16  ;;  %v1595_v52 = vrot.slane %v11770_v26, 2 }
 0x33f   :  { %5719 = vmatprep.mubr.bf16.mxu0 %v1804_v61  ;;  %4876 = vmatpush1.bf16.msra.mxu1 %v9091_v55  ;;  %v1560_v55 = vor.u32 %v1559_v21, %v1558_v30  ;;  %v1583_v30 = vrot.slane %v11767_v16, 2  ;;  %v11769_v21 = vshrl.u32 %v11768_v28, 16  ;;  %v978_v16 = vld [vmem:[#allocation2] sm:$0xe0] }
 0x340   :  { %4877 = vmatprep.subr.bf16.mxu1 %v9099_v12  ;;  %5841 = vmatpush1.bf16.msra.mxu0 %v9115_v4  ;;  %v1572_v51 = vor.u32 %v1571_v45, %v1570_v63  ;;  %v1566_v12 = vrot.slane %v11754_v0, 1  ;;  %v11755_v4 = vshll.u32 %v10130_v23, 16 }
 0x341   :  { %5842 = vmatprep.subr.bf16.mxu0 %v9120_v48  ;;  %v11756_v48 = vld [vmem:[#allocation36_spill] sm:$0xff] }
 0x342   :  { %v1567_v61 = vrot.slane %v11755_v4, 2  ;;  %v1573_v2 = vsel %vm1176_vm5, %v1564_v27, %v1572_v51  ;;  %v11758_v20 = vshll.u32 %v11756_v48, 16 }
 0x343   :  { %4878 = vmatpush1.bf16.msra.mxu1 %v9097_v3  ;;  %v11757_v3 = vshrl.u32 %v11756_v48, 16 }
 0x344   :  { %4879 = vmatprep.subr.bf16.mxu1 %v9105_v17  ;;  %5843 = vmatpush1.bf16.msra.mxu0 %v9118_v49  ;;  %v1579_v34 = vrot.slane %v11758_v20, 2  ;;  %v1977_v49 = vrot.slane %v1573_v2, 3  ;;  %v1568_v62 = vor.u32 %v1567_v61, %v1566_v12 }
 0x345   :  { %4755 = vmatmul.mubr.bf16.gmra.mrb[24].mxu1 %v1802_v5  ;;  %5844 = vmatprep.subr.bf16.mxu0 %v9126_v8 }
 0x346   :  { %5720 = vmatmul.mubr.bf16.gmra.mrb[88].mxu0 %v1802_v5  ;;  %4764 = vmatprep.mubr.bf16.mxu1 %v1824_v13  ;;  %v1978_v23 = vsel %vm1658_vm2, %v1957_v36, %v1977_v49  ;;  %v1569_v5 = vsel %vm1176_vm5, %v1560_v55, %v1568_v62 }
 0x347   :  { %5729 = vmatprep.mubr.bf16.mxu0 %v1824_v13  ;;  %4880 = vmatpush1.bf16.msra.mxu1 %v9103_v35  ;;  %v11759_v35 = vld [vmem:[#allocation40_spill] sm:$0xff]  ;;  %v11762_v13 = vld [vmem:[#allocation35_spill] sm:$0xff] }
 0x348   :  { %4881 = vmatprep.subr.bf16.mxu1 %v9114_v6  ;;  %5845 = vmatpush1.bf16.msra.mxu0 %v9124_v38  ;;  %v11760_v1 = vrot.slane %v11759_v35, 3  ;;  %v11761_v6 = vshrl.u32 %v10624_v40, 16 }
 0x349   :  { %5846 = vmatprep.subr.bf16.mxu0 %v9129_v25  ;;  %v11763_v25 = vshll.u32 %v11762_v13, 16 }
 0x34a   :  { %v1574_v38 = vrot.slane %v11761_v6, 1 }
 0x34b   :  { %4882 = vmatpush1.bf16.msra.mxu1 %v9112_v33  ;;  %v1575_v14 = vrot.slane %v11763_v25, 2  ;;  %v11765_v33 = vshll.u32 %v10175_v54, 16 }
 0x34c   :  { %4883 = vmatprep.subr.bf16.mxu1 %v9123_v39  ;;  %5847 = vmatpush1.bf16.msra.mxu0 %v9127_v11  ;;  %v1975_v39 = vrot.slane %v1569_v5, 3 }
 0x34d   :  { %4765 = vmatmul.mubr.bf16.gmra.mrb[28].mxu1 %v1822_v9  ;;  %5848 = vmatprep.subr.bf16.mxu0 %v9135_v18  ;;  %v1587_v56 = vrot.slane %v11765_v33, 2  ;;  %v1576_v27 = vor.u32 %v1575_v14, %v1574_v38  ;;  %v979_v33 = vld [vmem:[#allocation2 + $0x8] sm:$0xe0] }
 0x34e   :  { %5730 = vmatmul.mubr.bf16.gmra.mrb[92].mxu0 %v1822_v9  ;;  %4774 = vmatprep.mubr.bf16.mxu1 %v10596_v47 }
 0x34f   :  { %5739 = vmatprep.mubr.bf16.mxu0 %v10596_v47  ;;  %4884 = vmatpush1.bf16.msra.mxu1 %v9121_v41  ;;  %v1561_v47 = vsel %vm1176_vm5, %v10602_v31, %v1560_v55  ;;  %v1588_v41 = vor.u32 %v1587_v56, %v1586_v42  ;;  %v1577_v9 = vsel %vm1176_vm5, %v1568_v62, %v1576_v27  ;;  %v9178_v56 = vld [vmem:[#allocation2 + $0x28] sm:$0xff] }
 0x350   :  { %4885 = vmatprep.subr.bf16.mxu1 %v9132_v22  ;;  %5849 = vmatpush1.bf16.msra.mxu0 %v9133_v59  ;;  %v1955_v17 = vrot.slane %v1561_v47, 3  ;;  %v11766_v22 = vshrl.u32 %v10642_v37, 16  ;;  %v1995_v63 = vrot.slane %v1577_v9, 3 }
 0x351   :  { %5850 = vmatprep.subr.bf16.mxu0 %v9138_v58  ;;  %v1594_v58 = vrot.slane %v11769_v21, 1  ;;  %v9181_v21 = vld [vmem:[#allocation2 + $0x38] sm:$0xff] }
 0x352   :  { %v1956_v8 = vsel %vm1658_vm2, %v11760_v1, %v1955_v17  ;;  %v1976_v40 = vsel %vm1658_vm2, %v1955_v17, %v1975_v39  ;;  %v1582_v59 = vrot.slane %v11766_v22, 1  ;;  %v1996_v50 = vsel %vm1658_vm2, %v1975_v39, %v1995_v63 }
 0x353   :  { %4886 = vmatpush1.bf16.msra.mxu1 %v9130_v7  ;;  %v1596_v7 = vor.u32 %v1595_v52, %v1594_v58  ;;  %v1280_v39 = vrot.slane %v9178_v56, 2  ;;  %v1284_v58 = vrot.slane %v9181_v21, 2  ;;  %v1272_v52 = vrot.slane %v978_v16, 2  ;;  %v9189_v56 = vld [vmem:[#allocation2 + $0x60] sm:$0xff]  ;;  %v9191_v16 = vld [vmem:[#allocation2 + $0x70] sm:$0xff] }
 0x354   :  { %5851 = vmatpush1.bf16.msra.mxu0 %v9136_v57  ;;  %v1584_v45 = vor.u32 %v1583_v30, %v1582_v59  ;;  %v9176_v57 = vld [vmem:[#allocation2 + $0x118] sm:$0x1f] }
 0x355   :  { %4775 = vmatmul.mubr.bf16.gmra.mrb[32].mxu1 %v10622_v32  ;;  %v1608_v36 = vshrl.u32 %v9176_v57, 16  ;;  %v1611_v55 = vshll.u32 %v9176_v57, 16  ;;  %v1597_v61 = vsel %vm1176_vm5, %v1588_v41, %v1596_v7 }
 0x356   :  { %5740 = vmatmul.mubr.bf16.gmra.mrb[96].mxu0 %v10622_v32  ;;  %4784 = vmatprep.mubr.bf16.mxu1 %v1958_v29  ;;  %v1578_v32 = vrot.slane %v11757_v3, 1  ;;  %v1585_v19 = vsel %vm1176_vm5, %v1576_v27, %v1584_v45  ;;  %v1275_v27 = vrot.slane %v979_v33, 2 }
 0x357   :  { %5749 = vmatprep.mubr.bf16.mxu0 %v1958_v29  ;;  %v11771_v29 = vld [vmem:[#allocation37_spill] sm:$0xff]  ;;  %v1610_v2 = vrot.slane %v1608_v36, 1  ;;  %v1613_v48 = vrot.slane %v1611_v55, 2  ;;  %v2015_v3 = vrot.slane %v1585_v19, 3  ;;  %v1285_v36 = vsel %vm1271_vm6, %v1280_v39, %v1284_v58  ;;  %v9183_v19 = vld [vmem:[#allocation2 + $0x30] sm:$0xff] }
 0x358   :  { %v1580_v31 = vor.u32 %v1579_v34, %v1578_v32  ;;  %v11772_v47 = vshrl.u32 %v11771_v29, 16  ;;  %v11773_v12 = vshll.u32 %v11771_v29, 16  ;;  %v2037_v32 = vrot.slane %v1597_v61, 3  ;;  %v9177_v34 = vld [vmem:[#allocation2 + $0x110] sm:$0x1f] }
 0x359   :  { %v1599_v17 = vshrl.u32 %v9177_v34, 16  ;;  %v1614_v62 = vor.u32 %v1613_v48, %v1610_v2  ;;  %v1282_v29 = vrot.slane %v9183_v19, 2 }
 0x35a   :  { %v1581_v43 = vsel %vm1176_vm5, %v1572_v51, %v1580_v31  ;;  %v1589_v54 = vsel %vm1176_vm5, %v1580_v31, %v1588_v41  ;;  %v1590_v0 = vrot.slane %v11772_v47, 1  ;;  %v1591_v4 = vrot.slane %v11773_v12, 2  ;;  %v9179_v41 = vld [vmem:[#allocation2 + $0x18] sm:$0xff] }
 0x35b   :  { %v1997_v11 = vrot.slane %v1581_v43, 3  ;;  %v2017_v24 = vrot.slane %v1589_v54, 3  ;;  %v2016_v31 = vsel %vm1658_vm2, %v1995_v63, %v2015_v3  ;;  %v1615_v5 = vsel %vm1176_vm5, %v1596_v7, %v1614_v62  ;;  %v9180_v54 = vld [vmem:[#allocation2 + $0x20] sm:$0xff]  ;;  %v9182_v63 = vld [vmem:[#allocation2 + $0x10] sm:$0xff] }
 0x35c   :  { %v1592_v20 = vor.u32 %v1591_v4, %v1590_v0  ;;  %v2057_v38 = vrot.slane %v1615_v5, 3  ;;  %v2077_v42 = vrot.slane %v1614_v62, 3  ;;  %v1278_v28 = vrot.slane %v9180_v54, 2  ;;  %v9184_v0 = vld [vmem:[#allocation2 + $0x48] sm:$0xff]  ;;  %v9187_v5 = vld [vmem:[#allocation2 + $0x50] sm:$0xff] }
 0x35d   :  { %4785 = vmatmul.mubr.bf16.gmra.mrb[36].mxu1 %v1956_v8  ;;  %v1998_v18 = vsel %vm1658_vm2, %v1977_v49, %v1997_v11  ;;  %v2018_v51 = vsel %vm1658_vm2, %v1997_v11, %v2017_v24  ;;  %v1602_v49 = vshll.u32 %v9177_v34, 16  ;;  %v2038_v35 = vsel %vm1658_vm2, %v2017_v24, %v2037_v32 }
 0x35e   :  { %5750 = vmatmul.mubr.bf16.gmra.mrb[100].mxu0 %v1956_v8  ;;  %4794 = vmatprep.mubr.bf16.mxu1 %v1978_v23  ;;  %v1593_v1 = vsel %vm1176_vm5, %v1584_v45, %v1592_v20  ;;  %v1601_v8 = vrot.slane %v1599_v17, 1  ;;  %v2058_v14 = vsel %vm1658_vm2, %v2037_v32, %v2057_v38  ;;  %v1273_v24 = vrot.slane %v9182_v63, 2  ;;  %v9186_v17 = vld [vmem:[#allocation2 + $0x58] sm:$0xff] }
 0x35f   :  { %5759 = vmatprep.mubr.bf16.mxu0 %v1978_v23  ;;  %v1604_v23 = vrot.slane %v1602_v49, 2  ;;  %v2035_v6 = vrot.slane %v1593_v1, 3  ;;  %v1288_v12 = vrot.slane %v9184_v0, 2  ;;  %v1283_v2 = vsel %vm1271_vm6, %v1278_v28, %v1282_v29 }
 0x360   :  { %v1279_v57 = vsel %vm1271_vm6, %v1273_v24, %v1278_v28  ;;  %v1274_v55 = vsel %vm1271_vm6, %v1272_v52, %v1273_v24  ;;  %v1292_v49 = vrot.slane %v9186_v17, 2  ;;  %v1304_v54 = vrot.slane %v10883_v10, 2 }
 0x361   :  { %v1605_v13 = vor.u32 %v1604_v23, %v1601_v8  ;;  %v2036_v25 = vsel %vm1658_vm2, %v2015_v3, %v2035_v6  ;;  %v1683_v47 = vrot.slane %v1274_v55, 3  ;;  %v1289_v48 = vsel %vm1271_vm6, %v1284_v58, %v1288_v12  ;;  %v1331_v55 = vld [vmem:[#allocation2 + $0x98] sm:$0xe0] }
 0x362   :  { %v1705_v3 = vrot.slane %v1283_v2, 3  ;;  %v1727_v32 = vrot.slane %v1289_v48, 3  ;;  %v1293_v1 = vsel %vm1271_vm6, %v1288_v12, %v1292_v49  ;;  %v1302_v24 = vrot.slane %v10897_v15, 2  ;;  %v1330_v2 = vld [vmem:[#allocation2 + $0x90] sm:$0xe0] }
 0x363   :  { %v1606_v43 = vsel %vm1176_vm5, %v1592_v20, %v1605_v13  ;;  %v2075_v22 = vrot.slane %v1605_v13, 3  ;;  %v9185_v20 = vld [vmem:[#allocation2 + $0x40] sm:$0xff]  ;;  %v1747_v23 = vrot.slane %v1293_v1, 3 }
 0x364   :  { %v2055_v46 = vrot.slane %v1606_v43, 3  ;;  %v1286_v34 = vrot.slane %v9185_v20, 2  ;;  %v9195_v20 = vld [vmem:[#allocation2 + $0xc8] sm:$0xff] }
 0x365   :  { %4795 = vmatmul.mubr.bf16.gmra.mrb[40].mxu1 %v1976_v40 }
 0x366   :  { %5760 = vmatmul.mubr.bf16.gmra.mrb[104].mxu0 %v1976_v40  ;;  %4804 = vmatprep.mubr.bf16.mxu1 %v1998_v18  ;;  %v2056_v11 = vsel %vm1658_vm2, %v2035_v6, %v2055_v46  ;;  %v1276_v40 = vrot.slane %v9179_v41, 2  ;;  %v2076_v45 = vsel %vm1658_vm2, %v2055_v46, %v2075_v22  ;;  %v1290_v6 = vrot.slane %v9187_v5, 2 }
 0x367   :  { %5769 = vmatprep.mubr.bf16.mxu0 %v1998_v18  ;;  %v2078_v18 = vsel %vm1658_vm2, %v2057_v38, %v2077_v42  ;;  %v9188_v38 = vld [vmem:[#allocation2 + $0x68] sm:$0xff] }
 0x368   :  { %v1281_v9 = vsel %vm1271_vm6, %v1276_v40, %v1280_v39  ;;  %v1277_v59 = vsel %vm1271_vm6, %v1275_v27, %v1276_v40  ;;  %v1296_v13 = vrot.slane %v9188_v38, 2  ;;  %v1291_v43 = vsel %vm1271_vm6, %v1286_v34, %v1290_v6 }
 0x369   :  { %v1687_v30 = vrot.slane %v1281_v9, 3  ;;  %v1686_v26 = vrot.slane %v1277_v59, 3  ;;  %v1745_v42 = vrot.slane %v1291_v43, 3  ;;  %v1294_v39 = vrot.slane %v9189_v56, 2  ;;  %v9198_v43 = vld [vmem:[#allocation2 + $0xd8] sm:$0xff] }
 0x36a   :  { %v1297_v46 = vsel %vm1271_vm6, %v1292_v49, %v1296_v13  ;;  %v1620_v49 = vrot.slane %v1330_v2, 2  ;;  %v6718_v2 = vld [vmem:[#allocation8] sm:$0xff] }
 0x36b   :  { %v1688_v7 = vsel %vm1658_vm2, %v1686_v26, %v1687_v30  ;;  %v1767_v33 = vrot.slane %v1297_v46, 3  ;;  %v1636_v46 = vrot.slane %v9198_v43, 2 }
 0x36d   :  { %4805 = vmatmul.mubr.bf16.gmra.mrb[44].mxu1 %v1996_v50  ;;  %v1768_v40 = vsel %vm1658_vm2, %v1747_v23, %v1767_v33 }
 0x36e   :  { %5770 = vmatmul.mubr.bf16.gmra.mrb[108].mxu0 %v1996_v50  ;;  %4814 = vmatprep.mubr.bf16.mxu1 %v2018_v51  ;;  %v1684_v50 = vrot.slane %v1279_v57, 3 }
 0x36f   :  { %5779 = vmatprep.mubr.bf16.mxu0 %v2018_v51  ;;  %v1707_v51 = vrot.slane %v1285_v36, 3  ;;  %v1827_v36 = vrot.slane %v1304_v54, 3 }
 0x370   :  { %v1685_v4 = vsel %vm1658_vm2, %v1683_v47, %v1684_v50  ;;  %v1706_v62 = vsel %vm1658_vm2, %v1684_v50, %v1705_v3  ;;  %v9192_v50 = vld [vmem:[#allocation2 + $0xb8] sm:$0xff]  ;;  %v9193_v47 = vld [vmem:[#allocation2 + $0xa8] sm:$0xff] }
 0x371   :  { %v1708_v61 = vsel %vm1658_vm2, %v1687_v30, %v1707_v51  ;;  %v1298_v30 = vrot.slane %v9191_v16, 2  ;;  %v1624_v15 = vrot.slane %v9193_v47, 2  ;;  %v11777_v47 = vrot.slane %v10700_v44, 3 }
 0x373   :  { %v1299_v58 = vsel %vm1271_vm6, %v1294_v39, %v1298_v30 }
 0x374   :  { %v1785_v52 = vrot.slane %v1299_v58, 3 }
 0x375   :  { %4815 = vmatmul.mubr.bf16.gmra.mrb[48].mxu1 %v2016_v31 }
 0x376   :  { %5780 = vmatmul.mubr.bf16.gmra.mrb[112].mxu0 %v2016_v31  ;;  %4824 = vmatprep.mubr.bf16.mxu1 %v2038_v35  ;;  %v1728_v31 = vsel %vm1658_vm2, %v1707_v51, %v1727_v32  ;;  %v1628_v51 = vrot.slane %v9192_v50, 2  ;;  %v11776_v50 = vrot.slane %v10642_v37, 2  ;;  %v11779_v37 = vld [vmem:[#allocation42_spill] sm:$0xff] }
 0x377   :  { %5789 = vmatprep.mubr.bf16.mxu0 %v2038_v35  ;;  %v1287_v35 = vsel %vm1271_vm6, %v1282_v29, %v1286_v34  ;;  %v1623_v29 = vrot.slane %v1331_v55, 2  ;;  %v1632_v34 = vrot.slane %v9195_v20, 2  ;;  %v6736_v20 = vld [vmem:[#allocation8 + $0x90] sm:$0xff] }
 0x378   :  { %v1725_v8 = vrot.slane %v1287_v35, 3  ;;  %v1629_v12 = vsel %vm1271_vm6, %v1624_v15, %v1628_v51 }
 0x379   :  { %v1941_v48 = vrot.slane %v1629_v12, 3 }
 0x37a   :  { %v1746_v41 = vsel %vm1658_vm2, %v1725_v8, %v1745_v42 }
 0x37d   :  { %4825 = vmatmul.mubr.bf16.gmra.mrb[52].mxu1 %v2036_v25 }
 0x37e   :  { %5790 = vmatmul.mubr.bf16.gmra.mrb[116].mxu0 %v2036_v25  ;;  %4834 = vmatprep.mubr.bf16.mxu1 %v2058_v14  ;;  %v1726_v25 = vsel %vm1658_vm2, %v1705_v3, %v1725_v8  ;;  %v9194_v3 = vld [vmem:[#allocation2 + $0xb0] sm:$0xff] }
 0x37f   :  { %5799 = vmatprep.mubr.bf16.mxu0 %v2058_v14  ;;  %v1748_v14 = vsel %vm1658_vm2, %v1727_v32, %v1747_v23  ;;  %v1626_v32 = vrot.slane %v9194_v3, 2  ;;  %v1633_v23 = vsel %vm1271_vm6, %v1628_v51, %v1632_v34  ;;  %v6719_v3 = vld [vmem:[#allocation8 + $0x8] sm:$0xff] }
 0x380   :  { %v1961_v38 = vrot.slane %v1633_v23, 3  ;;  %v7941_v44 = vpack.c.bf16 %v6719_v3, %v6718_v2  ;;  %v6723_v23 = vld [vmem:[#allocation8 + $0x28] sm:$0xff] }
 0x385   :  { %4835 = vmatmul.mubr.bf16.gmra.mrb[56].mxu1 %v2056_v11 }
 0x386   :  { %5800 = vmatmul.mubr.bf16.gmra.mrb[120].mxu0 %v2056_v11  ;;  %4844 = vmatprep.mubr.bf16.mxu1 %v2078_v18  ;;  %v9190_v11 = vld [vmem:[#allocation2 + $0x78] sm:$0xff] }
 0x387   :  { %5809 = vmatprep.mubr.bf16.mxu0 %v2078_v18  ;;  %v1300_v27 = vrot.slane %v9190_v11, 2  ;;  %v1295_v18 = vsel %vm1271_vm6, %v1290_v6, %v1294_v39  ;;  %v1637_v39 = vsel %vm1271_vm6, %v1632_v34, %v1636_v46  ;;  %v6737_v34 = vld [vmem:[#allocation8 + $0x98] sm:$0xff] }
 0x388   :  { %v1765_v22 = vrot.slane %v1295_v18, 3  ;;  %v9200_v18 = vld [vmem:[#allocation2 + $0xe8] sm:$0xff] }
 0x389   :  { %v1301_v9 = vsel %vm1271_vm6, %v1296_v13, %v1300_v27  ;;  %v1305_v26 = vsel %vm1271_vm6, %v1300_v27, %v1304_v54  ;;  %v9197_v13 = vld [vmem:[#allocation2 + $0xc0] sm:$0xff]  ;;  %v1981_v27 = vrot.slane %v1637_v39, 3  ;;  %v6727_v39 = vld [vmem:[#allocation8 + $0x48] sm:$0xff] }
 0x38a   :  { %v1787_v59 = vrot.slane %v1301_v9, 3  ;;  %v1766_v28 = vsel %vm1658_vm2, %v1745_v42, %v1765_v22  ;;  %v1807_v63 = vrot.slane %v1305_v26, 3  ;;  %v1640_v9 = vrot.slane %v9200_v18, 2  ;;  %v6814_v18 = vld [vmem:[#allocation8 + $0x300] sm:$0xff] }
 0x38c   :  { %v1788_v21 = vsel %vm1658_vm2, %v1767_v33, %v1787_v59  ;;  %v1808_v10 = vsel %vm1658_vm2, %v1787_v59, %v1807_v63  ;;  %v1828_v0 = vsel %vm1658_vm2, %v1807_v63, %v1827_v36  ;;  %v1962_v33 = vsel %vm1658_vm2, %v1941_v48, %v1961_v38 }
 0x38d   :  { %4845 = vmatmul.mubr.bf16.gmra.mrb[60].mxu1 %v2076_v45  ;;  %v1982_v59 = vsel %vm1658_vm2, %v1961_v38, %v1981_v27  ;;  %v6741_v38 = vld [vmem:[#allocation8 + $0xb8] sm:$0xff] }
 0x38e   :  { %5810 = vmatmul.mubr.bf16.gmra.mrb[124].mxu0 %v2076_v45  ;;  %4887 = vmatprep.mubr.bf16.mxu1 %v1688_v7  ;;  %v1786_v45 = vsel %vm1658_vm2, %v1765_v22, %v1785_v52 }
 0x38f   :  { %5852 = vmatprep.mubr.bf16.mxu0 %v1688_v7  ;;  %v1303_v7 = vsel %vm1271_vm6, %v1298_v30, %v1302_v24  ;;  %v1641_v30 = vsel %vm1271_vm6, %v1636_v46, %v1640_v9  ;;  %v6742_v46 = vld [vmem:[#allocation8 + $0xc0] sm:$0xff] }
 0x390   :  { %v1805_v57 = vrot.slane %v1303_v7, 3 }
 0x392   :  { %v1806_v19 = vsel %vm1658_vm2, %v1785_v52, %v1805_v57 }
 0x395   :  { %4888 = vmatmul.mubr.bf16.vlgmr.msra.gmra.mrb[0].mxu1 %v1685_v4 }
 0x396   :  { %5853 = vmatmul.mubr.bf16.vlgmr.msra.gmra.mrb[64].mxu0 %v1685_v4  ;;  %4897 = vmatprep.mubr.bf16.mxu1 %v1708_v61  ;;  %v1825_v4 = vrot.slane %v1302_v24, 3  ;;  %v11774_v24 = vld [vmem:[#allocation41_spill] sm:$0xff] }
 0x397   :  { %5862 = vmatprep.mubr.bf16.mxu0 %v1708_v61  ;;  %v1625_v61 = vsel %vm1271_vm6, %v1623_v29, %v1624_v15 }
 0x398   :  { %v1940_v17 = vrot.slane %v1625_v61, 3  ;;  %v1826_v35 = vsel %vm1658_vm2, %v1805_v57, %v1825_v4  ;;  %v6734_v4 = vld [vmem:[#allocation8 + $0x80] sm:$0xff]  ;;  %v6735_v61 = vld [vmem:[#allocation8 + $0x88] sm:$0xff] }
 0x39a   :  { %v1942_v1 = vsel %vm1658_vm2, %v1940_v17, %v1941_v48  ;;  %v7939_v48 = vpack.c.bf16 %v6735_v61, %v6734_v4  ;;  %v6720_v17 = vld [vmem:[#allocation8 + $0x10] sm:$0xff] }
 0x39c   :  { %7940 = vmatprep.subr.bf16.mxu1 %v7939_v48 }
 0x39d   :  { %4898 = vmatmul.mubr.bf16.gmra.mrb[4].mxu1 %v1706_v62 }
 0x39e   :  { %5863 = vmatmul.mubr.bf16.gmra.mrb[68].mxu0 %v1706_v62  ;;  %4907 = vmatprep.mubr.bf16.mxu1 %v1728_v31  ;;  %v9196_v62 = vld [vmem:[#allocation2 + $0xa0] sm:$0xff] }
 0x39f   :  { %5872 = vmatprep.mubr.bf16.mxu0 %v1728_v31  ;;  %v1621_v31 = vrot.slane %v9196_v62, 2  ;;  %7942 = vmatpush3.bf16.msra.mxu1 %v7941_v44  ;;  %v6721_v62 = vld [vmem:[#allocation8 + $0x18] sm:$0xff] }
 0x3a1   :  { %v1627_v8 = vsel %vm1271_vm6, %v1621_v31, %v1626_v32  ;;  %v1622_v5 = vsel %vm1271_vm6, %v1620_v49, %v1621_v31  ;;  %v7943_v49 = vpack.c.bf16 %v6737_v34, %v6736_v20  ;;  %v7945_v31 = vpack.c.bf16 %v6721_v62, %v6720_v17 }
 0x3a2   :  { %v1938_v6 = vrot.slane %v1627_v8, 3 }
 0x3a3   :  { %7944 = vmatprep.subr.bf16.mxu1 %v7943_v49 }
 0x3a4   :  { %7946 = vmatpush3.bf16.msra.mxu1 %v7945_v31 }
 0x3a5   :  { %4908 = vmatmul.mubr.bf16.gmra.mrb[8].mxu1 %v1726_v25 }
 0x3a6   :  { %5873 = vmatmul.mubr.bf16.gmra.mrb[72].mxu0 %v1726_v25  ;;  %4917 = vmatprep.mubr.bf16.mxu1 %v1748_v14  ;;  %v1630_v25 = vrot.slane %v9197_v13, 2  ;;  %v6724_v13 = vld [vmem:[#allocation8 + $0x30] sm:$0xff] }
 0x3a7   :  { %5882 = vmatprep.mubr.bf16.mxu0 %v1748_v14  ;;  %v1937_v14 = vrot.slane %v1622_v5, 3 }
 0x3a8   :  { %v1631_v56 = vsel %vm1271_vm6, %v1626_v32, %v1630_v25  ;;  %v11780_v32 = vld [vmem:[#allocation43_spill] sm:$0xff] }
 0x3a9   :  { %v1939_v42 = vsel %vm1658_vm2, %v1937_v14, %v1938_v6  ;;  %v1959_v11 = vrot.slane %v1631_v56, 3  ;;  %v6725_v14 = vld [vmem:[#allocation8 + $0x38] sm:$0xff] }
 0x3aa   :  { %v7953_v43 = vpack.c.bf16 %v6725_v14, %v6724_v13  ;;  %v6731_v14 = vld [vmem:[#allocation8 + $0x68] sm:$0xff] }
 0x3ab   :  { %v1960_v22 = vsel %vm1658_vm2, %v1938_v6, %v1959_v11  ;;  %v6740_v6 = vld [vmem:[#allocation8 + $0xb0] sm:$0xff] }
 0x3ad   :  { %4918 = vmatmul.mubr.bf16.gmra.mrb[12].mxu1 %v1746_v41 }
 0x3ae   :  { %5883 = vmatmul.mubr.bf16.gmra.mrb[76].mxu0 %v1746_v41  ;;  %4927 = vmatprep.mubr.bf16.mxu1 %v1768_v40  ;;  %v9199_v41 = vld [vmem:[#allocation2 + $0xd0] sm:$0xff] }
 0x3af   :  { %5892 = vmatprep.mubr.bf16.mxu0 %v1768_v40  ;;  %v1634_v40 = vrot.slane %v9199_v41, 2 }
 0x3b1   :  { %v1635_v16 = vsel %vm1271_vm6, %v1630_v25, %v1634_v40  ;;  %v7951_v25 = vpack.c.bf16 %v6741_v38, %v6740_v6 }
 0x3b2   :  { %v1979_v54 = vrot.slane %v1635_v16, 3  ;;  %v6745_v16 = vld [vmem:[#allocation8 + $0xd8] sm:$0xff] }
 0x3b4   :  { %v1980_v26 = vsel %vm1658_vm2, %v1959_v11, %v1979_v54  ;;  %v6830_v11 = vld [vmem:[#allocation8 + $0x380] sm:$0xff] }
 0x3b5   :  { %4928 = vmatmul.mubr.bf16.gmra.mrb[16].mxu1 %v1766_v28 }
 0x3b6   :  { %5893 = vmatmul.mubr.bf16.gmra.mrb[80].mxu0 %v1766_v28  ;;  %4937 = vmatprep.mubr.bf16.mxu1 %v1788_v21  ;;  %v2001_v28 = vrot.slane %v1641_v30, 3  ;;  %v6728_v30 = vld [vmem:[#allocation8 + $0x50] sm:$0xff] }
 0x3b7   :  { %5902 = vmatprep.mubr.bf16.mxu0 %v1788_v21  ;;  %v9201_v21 = vld [vmem:[#allocation2 + $0xe0] sm:$0xff] }
 0x3b8   :  { %v1638_v58 = vrot.slane %v9201_v21, 2  ;;  %v2002_v52 = vsel %vm1658_vm2, %v1981_v27, %v2001_v28  ;;  %v6831_v27 = vld [vmem:[#allocation8 + $0x388] sm:$0xff]  ;;  %v6832_v21 = vld [vmem:[#allocation8 + $0x390] sm:$0xff] }
 0x3ba   :  { %v1639_v63 = vsel %vm1271_vm6, %v1634_v40, %v1638_v58  ;;  %v1643_v51 = vsel %vm1271_vm6, %v1638_v58, %v11776_v50  ;;  %v8035_v40 = vpack.c.bf16 %v6831_v27, %v6830_v11  ;;  %v6833_v58 = vld [vmem:[#allocation8 + $0x398] sm:$0xff]  ;;  %v6818_v11 = vld [vmem:[#allocation8 + $0x320] sm:$0xff]  ;;  %v6819_v27 = vld [vmem:[#allocation8 + $0x328] sm:$0xff] }
 0x3bb   :  { %v1999_v7 = vrot.slane %v1639_v63, 3  ;;  %v6816_v63 = vld [vmem:[#allocation8 + $0x310] sm:$0xff]  ;;  %v11783_v50 = vld [vmem:[#allocation26_spill] sm:$0xff] }
 0x3bc   :  { %8036 = vmatprep.subr.bf16.mxu0 %v8035_v40 }
 0x3bd   :  { %4938 = vmatmul.mubr.bf16.gmra.mrb[20].mxu1 %v1786_v45  ;;  %v2000_v36 = vsel %vm1658_vm2, %v1979_v54, %v1999_v7 }
 0x3be   :  { %5903 = vmatmul.mubr.bf16.gmra.mrb[84].mxu0 %v1786_v45  ;;  %4947 = vmatprep.mubr.bf16.mxu1 %v1808_v10  ;;  %v11775_v45 = vrot.slane %v11774_v24, 2  ;;  %v6817_v24 = vld [vmem:[#allocation8 + $0x318] sm:$0xff] }
 0x3bf   :  { %5912 = vmatprep.mubr.bf16.mxu0 %v1808_v10 }
 0x3c0   :  { %v1645_v10 = vsel %vm1271_vm6, %v1640_v9, %v11775_v45  ;;  %v6815_v9 = vld [vmem:[#allocation8 + $0x308] sm:$0xff]  ;;  %v8041_v45 = vpack.c.bf16 %v6817_v24, %v6816_v63 }
 0x3c1   :  { %v2021_v57 = vrot.slane %v1645_v10, 3  ;;  %v11782_v10 = vld [vmem:[#allocation25_spill] sm:$0xff] }
 0x3c3   :  { %v2022_v55 = vsel %vm1658_vm2, %v2001_v28, %v2021_v57  ;;  %v2042_v15 = vsel %vm1658_vm2, %v2021_v57, %v11777_v47  ;;  %v6729_v28 = vld [vmem:[#allocation8 + $0x58] sm:$0xff]  ;;  %v6013_v57 = vld [vmem:[#allocation12] sm:$0xf] }
 0x3c5   :  { %4948 = vmatmul.mubr.bf16.gmra.mrb[24].mxu1 %v1806_v19 }
 0x3c6   :  { %5913 = vmatmul.mubr.bf16.gmra.mrb[88].mxu0 %v1806_v19  ;;  %4957 = vmatprep.mubr.bf16.mxu1 %v1828_v0  ;;  %v2019_v19 = vrot.slane %v1643_v51, 3  ;;  %v11068_v51 = vrot.slane %v6013_v57, %v11783_v50 }
 0x3c7   :  { %5922 = vmatprep.mubr.bf16.mxu0 %v1828_v0  ;;  %v11778_v0 = vrot.slane %v10715_v60, 3  ;;  %v11781_v60 = vld [vmem:[#allocation44_spill] sm:$0xff] }
 0x3c8   :  { %v2020_v29 = vsel %vm1658_vm2, %v1999_v7, %v2019_v19  ;;  %v6025_v7 = vsub.s32 2, %v11782_v10 }
 0x3c9   :  { %v2040_v12 = vsel %vm1658_vm2, %v2019_v19, %v11778_v0 }
 0x3ca   :  { %v11070_v19 = vrot.slane %v6013_v57, %v6025_v7 }
 0x3cd   :  { %4958 = vmatmul.mubr.bf16.gmra.mrb[28].mxu1 %v1826_v35 }
 0x3ce   :  { %5923 = vmatmul.mubr.bf16.gmra.mrb[92].mxu0 %v1826_v35  ;;  %4967 = vmatprep.mubr.bf16.mxu1 %v1942_v1  ;;  %v6738_v35 = vld [vmem:[#allocation8 + $0xa0] sm:$0xff] }
 0x3cf   :  { %5932 = vmatprep.mubr.bf16.mxu0 %v1942_v1  ;;  %v6722_v1 = vld [vmem:[#allocation8 + $0x20] sm:$0xff] }
 0x3d0   :  { %v7949_v5 = vpack.c.bf16 %v6723_v23, %v6722_v1  ;;  %v6747_v23 = vld [vmem:[#allocation8 + $0xe8] sm:$0xff] }
 0x3d5   :  { %4968 = vmatmul.mubr.bf16.gmra.mrb[32].mxu1 %v1939_v42 }
 0x3d6   :  { %5933 = vmatmul.mubr.bf16.gmra.mrb[96].mxu0 %v1939_v42  ;;  %4977 = vmatprep.mubr.bf16.mxu1 %v1962_v33  ;;  %v6743_v42 = vld [vmem:[#allocation8 + $0xc8] sm:$0xff] }
 0x3d7   :  { %5942 = vmatprep.mubr.bf16.mxu0 %v1962_v33  ;;  %v6726_v33 = vld [vmem:[#allocation8 + $0x40] sm:$0xff]  ;;  %v7955_v56 = vpack.c.bf16 %v6743_v42, %v6742_v46 }
 0x3d8   :  { %v7957_v41 = vpack.c.bf16 %v6727_v39, %v6726_v33  ;;  %v6835_v39 = vld [vmem:[#allocation8 + $0x3a8] sm:$0xff] }
 0x3dd   :  { %4978 = vmatmul.mubr.bf16.gmra.mrb[36].mxu1 %v1960_v22 }
 0x3de   :  { %5943 = vmatmul.mubr.bf16.gmra.mrb[100].mxu0 %v1960_v22  ;;  %4987 = vmatprep.mubr.bf16.mxu1 %v1982_v59  ;;  %v8037_v22 = vpack.c.bf16 %v6815_v9, %v6814_v18 }
 0x3df   :  { %5952 = vmatprep.mubr.bf16.mxu0 %v1982_v59  ;;  %v6744_v59 = vld [vmem:[#allocation8 + $0xd0] sm:$0xff] }
 0x3e0   :  { %8038 = vmatpush3.bf16.msra.mxu0 %v8037_v22  ;;  %v7959_v54 = vpack.c.bf16 %v6745_v16, %v6744_v59 }
 0x3e5   :  { %4988 = vmatmul.mubr.bf16.gmra.mrb[40].mxu1 %v1980_v26 }
 0x3e6   :  { %5953 = vmatmul.mubr.bf16.gmra.mrb[104].mxu0 %v1980_v26  ;;  %4997 = vmatprep.mubr.bf16.mxu1 %v2002_v52  ;;  %v7961_v26 = vpack.c.bf16 %v6729_v28, %v6728_v30 }
 0x3e7   :  { %5962 = vmatprep.mubr.bf16.mxu0 %v2002_v52  ;;  %v8039_v52 = vpack.c.bf16 %v6833_v58, %v6832_v21 }
 0x3e9   :  { %8040 = vmatprep.subr.bf16.mxu0 %v8039_v52  ;;  %v8045_v52 = vpack.c.bf16 %v6819_v27, %v6818_v11 }
 0x3ea   :  { %8042 = vmatpush3.bf16.msra.mxu0 %v8041_v45 }
 0x3ed   :  { %4998 = vmatmul.mubr.bf16.gmra.mrb[44].mxu1 %v2000_v36 }
 0x3ee   :  { %5963 = vmatmul.mubr.bf16.gmra.mrb[108].mxu0 %v2000_v36  ;;  %5007 = vmatprep.mubr.bf16.mxu1 %v2022_v55  ;;  %v6029_v36 = vsub.s32 3, %v11782_v10 }
 0x3ef   :  { %5972 = vmatprep.mubr.bf16.mxu0 %v2022_v55  ;;  %v6163_v55 = vld [vmem:[#allocation14] sm:$0xf] }
 0x3f0   :  { %v11078_v0 = vrot.slane %v6163_v55, %v11783_v50  ;;  %v11085_v2 = vrot.slane %v6163_v55, %v6029_v36 }
 0x3f5   :  { %5008 = vmatmul.mubr.bf16.gmra.mrb[48].mxu1 %v2020_v29 }
 0x3f6   :  { %5973 = vmatmul.mubr.bf16.gmra.mrb[112].mxu0 %v2020_v29  ;;  %5017 = vmatprep.mubr.bf16.mxu1 %v2042_v15  ;;  %v11784_v29 = vld [vmem:[#allocation27_spill] sm:$0xff] }
 0x3f7   :  { %5982 = vmatprep.mubr.bf16.mxu0 %v2042_v15  ;;  %v11073_v47 = vrot.slane %v6013_v57, %v11784_v29  ;;  %v11075_v15 = vrot.slane %v6013_v57, %v6029_v36  ;;  %v11083_v61 = vrot.slane %v6163_v55, %v11784_v29 }
 0x3fd   :  { %5018 = vmatmul.mubr.bf16.gmra.mrb[52].mxu1 %v2040_v12 }
 0x3fe   :  { %5983 = vmatmul.mubr.bf16.gmra.mrb[116].mxu0 %v2040_v12  ;;  %5027 = vmatprep.mubr.bf16.mxu1 %v11779_v37  ;;  %v11080_v12 = vrot.slane %v6163_v55, %v6025_v7 }
 0x3ff   :  { %5992 = vmatprep.mubr.bf16.mxu0 %v11779_v37 }
 0x405   :  { %5028 = vmatmul.mubr.bf16.gmra.mrb[56].mxu1 %v10737_v53 }
 0x406   :  { %5993 = vmatmul.mubr.bf16.gmra.mrb[120].mxu0 %v10737_v53  ;;  %5037 = vmatprep.mubr.bf16.mxu1 %v11780_v32  ;;  %v6739_v53 = vld [vmem:[#allocation8 + $0xa8] sm:$0xff] }
 0x407   :  { %6002 = vmatprep.mubr.bf16.mxu0 %v11780_v32  ;;  %v7947_v8 = vpack.c.bf16 %v6739_v53, %v6738_v35 }
 0x409   :  { %7948 = vmatprep.subr.bf16.mxu1 %v7947_v8  ;;  %v6746_v8 = vld [vmem:[#allocation8 + $0xe0] sm:$0xff] }
 0x40a   :  { %7950 = vmatpush3.bf16.msra.mxu1 %v7949_v5  ;;  %v7963_v16 = vpack.c.bf16 %v6747_v23, %v6746_v8 }
 0x40b   :  { %7952 = vmatprep.subr.bf16.mxu1 %v7951_v25  ;;  %v6730_v25 = vld [vmem:[#allocation8 + $0x60] sm:$0xff] }
 0x40c   :  { %v7965_v30 = vpack.c.bf16 %v6731_v14, %v6730_v25 }
 0x40d   :  { %5038 = vmatmul.mubr.bf16.gmra.mrb[60].mxu1 %v11781_v60 }
 0x40e   :  { %6003 = vmatmul.mubr.bf16.gmra.mrb[124].mxu0 %v11781_v60  ;;  %7954 = vmatpush3.bf16.msra.mxu1 %v7953_v43  ;;  %v6834_v43 = vld [vmem:[#allocation8 + $0x3a0] sm:$0xff] }
 0x40f   :  { %7956 = vmatprep.subr.bf16.mxu1 %v7955_v56 }
 0x412   :  { %7958 = vmatpush3.bf16.msra.mxu1 %v7957_v41 }
 0x413   :  { %7960 = vmatprep.subr.bf16.mxu1 %v7959_v54 }
 0x416   :  { %7962 = vmatpush3.bf16.msra.mxu1 %v7961_v26  ;;  %v8043_v26 = vpack.c.bf16 %v6835_v39, %v6834_v43 }
 0x417   :  { %7964 = vmatprep.subr.bf16.mxu1 %v7963_v16 }
 0x418   :  { %8044 = vmatprep.subr.bf16.mxu0 %v8043_v26 }
 0x419   :  { %8046 = vmatpush3.bf16.msra.mxu0 %v8045_v52 }
 0x41a   :  { %7966 = vmatpush3.bf16.msra.mxu1 %v7965_v30 }
 0x468   :  { %v4889_v37 = vpop.f32.mrb[0].mxu1 }
 0x469   :  { %v5854_v4 = vpop.f32.mrb[64].mxu0  ;;  %v6035_v48 = vmul.f32 %v11068_v51, %v4889_v37  ;;  %v4891_v44 = vpop.f32.mrb[1].mxu1 }
 0x46a   :  { %v6037_v3 = vmul.f32 %v11070_v19, %v5854_v4  ;;  %v5856_v32 = vpop.f32.mrb[65].mxu0  ;;  %v6036_v60 = vmul.f32 %v11073_v47, %v4891_v44  ;;  %v4893_v34 = vpop.f32.mrb[2].mxu1 }
 0x46b   :  { %v6038_v20 = vmul.f32 %v11075_v15, %v5856_v32  ;;  %v5858_v17 = vpop.f32.mrb[66].mxu0  ;;  %v11092_v49 = vadd.f32 %v11078_v0, %v6035_v48  ;;  %v6039_v31 = vmul.f32 %v11068_v51, %v4893_v34  ;;  %v4895_v53 = vpop.f32.mrb[3].mxu1 }
 0x46c   :  { %v11095_v62 = vadd.f32 %v11080_v12, %v6037_v3  ;;  %v6041_v35 = vmul.f32 %v11070_v19, %v5858_v17  ;;  %v5860_v1 = vpop.f32.mrb[67].mxu0  ;;  %v11100_v5 = vadd.f32 %v11083_v61, %v6036_v60  ;;  %v6040_v38 = vmul.f32 %v11073_v47, %v4895_v53 }
 0x46d   :  { %v11103_v6 = vadd.f32 %v11085_v2, %v6038_v20  ;;  %v6042_v13 = vmul.f32 %v11075_v15, %v5860_v1  ;;  %v11656_v46 = vmax.f32 %v11092_v49, 0.0  ;;  %v6189_v33 = vadd.f32 %v11078_v0, %v6039_v31 }
 0x46e   :  { %v11660_v42 = vmax.f32 %v11095_v62, 0.0  ;;  %v6191_v56 = vadd.f32 %v11080_v12, %v6041_v35  ;;  %v11658_v41 = vmax.f32 %v11100_v5, 0.0  ;;  %v6190_v18 = vadd.f32 %v11083_v61, %v6040_v38 }
 0x46f   :  { %v6316_v40 = vmax.f32 %v11103_v6, 0.0  ;;  %v6192_v9 = vadd.f32 %v11085_v2, %v6042_v13  ;;  %v6317_v22 = vmax.f32 %v6189_v33, 0.0 }
 0x470   :  { %v6319_v59 = vmax.f32 %v6191_v56, 0.0  ;;  %v6318_v54 = vmax.f32 %v6190_v18, 0.0  ;;  %v4899_v21 = vpop.f32.mrb[4].mxu1 }
 0x471   :  { %v6320_v28 = vmax.f32 %v6192_v9, 0.0  ;;  %v5864_v58 = vpop.f32.mrb[68].mxu0  ;;  %v6441_v63 = vadd.f32 %v6317_v22, %v11656_v46  ;;  %v6043_v45 = vmul.f32 %v11068_v51, %v4899_v21  ;;  %v4901_v7 = vpop.f32.mrb[5].mxu1 }
 0x472   :  { %v6483_v24 = vadd.f32 %v6319_v59, %v11660_v42  ;;  %v6045_v10 = vmul.f32 %v11070_v19, %v5864_v58  ;;  %v5866_v57 = vpop.f32.mrb[69].mxu0  ;;  %v6462_v36 = vadd.f32 %v6318_v54, %v11658_v41  ;;  %v6044_v50 = vmul.f32 %v11073_v47, %v4901_v7  ;;  %v4903_v37 = vpop.f32.mrb[6].mxu1 }
 0x473   :  { %v6504_v55 = vadd.f32 %v6320_v28, %v6316_v40  ;;  %v6046_v29 = vmul.f32 %v11075_v15, %v5866_v57  ;;  %v5868_v4 = vpop.f32.mrb[70].mxu0  ;;  %v6193_v48 = vadd.f32 %v11078_v0, %v6043_v45  ;;  %v6047_v44 = vmul.f32 %v11068_v51, %v4903_v37  ;;  %v4905_v60 = vpop.f32.mrb[7].mxu1 }
 0x474   :  { %v6195_v3 = vadd.f32 %v11080_v12, %v6045_v10  ;;  %v6049_v32 = vmul.f32 %v11070_v19, %v5868_v4  ;;  %v5870_v20 = vpop.f32.mrb[71].mxu0  ;;  %v6194_v34 = vadd.f32 %v11083_v61, %v6044_v50  ;;  %v6048_v31 = vmul.f32 %v11073_v47, %v4905_v60 }
 0x475   :  { %v6196_v17 = vadd.f32 %v11085_v2, %v6046_v29  ;;  %v6050_v35 = vmul.f32 %v11075_v15, %v5870_v20  ;;  %v6321_v53 = vmax.f32 %v6193_v48, 0.0  ;;  %v6197_v8 = vadd.f32 %v11078_v0, %v6047_v44 }
 0x476   :  { %v6323_v1 = vmax.f32 %v6195_v3, 0.0  ;;  %v6199_v23 = vadd.f32 %v11080_v12, %v6049_v32  ;;  %v6322_v38 = vmax.f32 %v6194_v34, 0.0  ;;  %v6198_v25 = vadd.f32 %v11083_v61, %v6048_v31 }
 0x477   :  { %v6324_v13 = vmax.f32 %v6196_v17, 0.0  ;;  %v6200_v14 = vadd.f32 %v11085_v2, %v6050_v35  ;;  %v6442_v43 = vadd.f32 %v6441_v63, %v6321_v53  ;;  %v6325_v56 = vmax.f32 %v6197_v8, 0.0 }
 0x478   :  { %v6484_v33 = vadd.f32 %v6483_v24, %v6323_v1  ;;  %v6327_v39 = vmax.f32 %v6199_v23, 0.0  ;;  %v6463_v11 = vadd.f32 %v6462_v36, %v6322_v38  ;;  %v6326_v18 = vmax.f32 %v6198_v25, 0.0  ;;  %v4909_v22 = vpop.f32.mrb[8].mxu1 }
 0x479   :  { %v6505_v27 = vadd.f32 %v6504_v55, %v6324_v13  ;;  %v6328_v9 = vmax.f32 %v6200_v14, 0.0  ;;  %v5874_v59 = vpop.f32.mrb[72].mxu0  ;;  %v6443_v16 = vadd.f32 %v6442_v43, %v6325_v56  ;;  %v6051_v54 = vmul.f32 %v11068_v51, %v4909_v22  ;;  %v4911_v21 = vpop.f32.mrb[9].mxu1 }
 0x47a   :  { %v6485_v30 = vadd.f32 %v6484_v33, %v6327_v39  ;;  %v6053_v28 = vmul.f32 %v11070_v19, %v5874_v59  ;;  %v5876_v58 = vpop.f32.mrb[73].mxu0  ;;  %v6464_v26 = vadd.f32 %v6463_v11, %v6326_v18  ;;  %v6052_v63 = vmul.f32 %v11073_v47, %v4911_v21  ;;  %v4913_v45 = vpop.f32.mrb[10].mxu1 }
 0x47b   :  { %v6506_v52 = vadd.f32 %v6505_v27, %v6328_v9  ;;  %v6054_v24 = vmul.f32 %v11075_v15, %v5876_v58  ;;  %v5878_v10 = vpop.f32.mrb[74].mxu0  ;;  %v6201_v7 = vadd.f32 %v11078_v0, %v6051_v54  ;;  %v6055_v36 = vmul.f32 %v11068_v51, %v4913_v45  ;;  %v4915_v50 = vpop.f32.mrb[11].mxu1 }
 0x47c   :  { %v6203_v57 = vadd.f32 %v11080_v12, %v6053_v28  ;;  %v6057_v55 = vmul.f32 %v11070_v19, %v5878_v10  ;;  %v5880_v29 = vpop.f32.mrb[75].mxu0  ;;  %v6202_v37 = vadd.f32 %v11083_v61, %v6052_v63  ;;  %v6056_v48 = vmul.f32 %v11073_v47, %v4915_v50 }
 0x47d   :  { %v6204_v4 = vadd.f32 %v11085_v2, %v6054_v24  ;;  %v6058_v3 = vmul.f32 %v11075_v15, %v5880_v29  ;;  %v6329_v44 = vmax.f32 %v6201_v7, 0.0  ;;  %v6205_v60 = vadd.f32 %v11078_v0, %v6055_v36 }
 0x47e   :  { %v6331_v32 = vmax.f32 %v6203_v57, 0.0  ;;  %v6207_v20 = vadd.f32 %v11080_v12, %v6057_v55  ;;  %v6330_v34 = vmax.f32 %v6202_v37, 0.0  ;;  %v6206_v31 = vadd.f32 %v11083_v61, %v6056_v48 }
 0x47f   :  { %v6332_v17 = vmax.f32 %v6204_v4, 0.0  ;;  %v6208_v35 = vadd.f32 %v11085_v2, %v6058_v3  ;;  %v6444_v53 = vadd.f32 %v6443_v16, %v6329_v44  ;;  %v6333_v8 = vmax.f32 %v6205_v60, 0.0 }
 0x480   :  { %v6486_v1 = vadd.f32 %v6485_v30, %v6331_v32  ;;  %v6335_v23 = vmax.f32 %v6207_v20, 0.0  ;;  %v6465_v38 = vadd.f32 %v6464_v26, %v6330_v34  ;;  %v6334_v25 = vmax.f32 %v6206_v31, 0.0  ;;  %v4919_v43 = vpop.f32.mrb[12].mxu1 }
 0x481   :  { %v6507_v13 = vadd.f32 %v6506_v52, %v6332_v17  ;;  %v6336_v14 = vmax.f32 %v6208_v35, 0.0  ;;  %v5884_v33 = vpop.f32.mrb[76].mxu0  ;;  %v6445_v56 = vadd.f32 %v6444_v53, %v6333_v8  ;;  %v6059_v11 = vmul.f32 %v11068_v51, %v4919_v43  ;;  %v4921_v18 = vpop.f32.mrb[13].mxu1 }
 0x482   :  { %v6487_v39 = vadd.f32 %v6486_v1, %v6335_v23  ;;  %v6061_v27 = vmul.f32 %v11070_v19, %v5884_v33  ;;  %v5886_v9 = vpop.f32.mrb[77].mxu0  ;;  %v6466_v22 = vadd.f32 %v6465_v38, %v6334_v25  ;;  %v6060_v16 = vmul.f32 %v11073_v47, %v4921_v18  ;;  %v4923_v54 = vpop.f32.mrb[14].mxu1 }
 0x483   :  { %v6508_v59 = vadd.f32 %v6507_v13, %v6336_v14  ;;  %v6062_v30 = vmul.f32 %v11075_v15, %v5886_v9  ;;  %v5888_v28 = vpop.f32.mrb[78].mxu0  ;;  %v6209_v21 = vadd.f32 %v11078_v0, %v6059_v11  ;;  %v6063_v26 = vmul.f32 %v11068_v51, %v4923_v54  ;;  %v4925_v63 = vpop.f32.mrb[15].mxu1 }
 0x484   :  { %v6211_v58 = vadd.f32 %v11080_v12, %v6061_v27  ;;  %v6065_v52 = vmul.f32 %v11070_v19, %v5888_v28  ;;  %v5890_v24 = vpop.f32.mrb[79].mxu0  ;;  %v6210_v45 = vadd.f32 %v11083_v61, %v6060_v16  ;;  %v6064_v7 = vmul.f32 %v11073_v47, %v4925_v63 }
 0x485   :  { %v6212_v10 = vadd.f32 %v11085_v2, %v6062_v30  ;;  %v6066_v57 = vmul.f32 %v11075_v15, %v5890_v24  ;;  %v6337_v36 = vmax.f32 %v6209_v21, 0.0  ;;  %v6213_v50 = vadd.f32 %v11078_v0, %v6063_v26 }
 0x486   :  { %v6339_v55 = vmax.f32 %v6211_v58, 0.0  ;;  %v6215_v29 = vadd.f32 %v11080_v12, %v6065_v52  ;;  %v6338_v37 = vmax.f32 %v6210_v45, 0.0  ;;  %v6214_v48 = vadd.f32 %v11083_v61, %v6064_v7 }
 0x487   :  { %v6340_v4 = vmax.f32 %v6212_v10, 0.0  ;;  %v6216_v3 = vadd.f32 %v11085_v2, %v6066_v57  ;;  %v6446_v44 = vadd.f32 %v6445_v56, %v6337_v36  ;;  %v6341_v60 = vmax.f32 %v6213_v50, 0.0 }
 0x488   :  { %v6488_v32 = vadd.f32 %v6487_v39, %v6339_v55  ;;  %v6343_v20 = vmax.f32 %v6215_v29, 0.0  ;;  %v6467_v34 = vadd.f32 %v6466_v22, %v6338_v37  ;;  %v6342_v31 = vmax.f32 %v6214_v48, 0.0  ;;  %v4929_v53 = vpop.f32.mrb[16].mxu1 }
 0x489   :  { %v6509_v17 = vadd.f32 %v6508_v59, %v6340_v4  ;;  %v6344_v35 = vmax.f32 %v6216_v3, 0.0  ;;  %v5894_v1 = vpop.f32.mrb[80].mxu0  ;;  %v6447_v8 = vadd.f32 %v6446_v44, %v6341_v60  ;;  %v6067_v38 = vmul.f32 %v11068_v51, %v4929_v53  ;;  %v4931_v25 = vpop.f32.mrb[17].mxu1 }
 0x48a   :  { %v6489_v23 = vadd.f32 %v6488_v32, %v6343_v20  ;;  %v6069_v13 = vmul.f32 %v11070_v19, %v5894_v1  ;;  %v5896_v14 = vpop.f32.mrb[81].mxu0  ;;  %v6468_v43 = vadd.f32 %v6467_v34, %v6342_v31  ;;  %v6068_v56 = vmul.f32 %v11073_v47, %v4931_v25  ;;  %v4933_v11 = vpop.f32.mrb[18].mxu1 }
 0x48b   :  { %v6510_v33 = vadd.f32 %v6509_v17, %v6344_v35  ;;  %v6070_v39 = vmul.f32 %v11075_v15, %v5896_v14  ;;  %v5898_v27 = vpop.f32.mrb[82].mxu0  ;;  %v6217_v18 = vadd.f32 %v11078_v0, %v6067_v38  ;;  %v6071_v22 = vmul.f32 %v11068_v51, %v4933_v11  ;;  %v4935_v16 = vpop.f32.mrb[19].mxu1 }
 0x48c   :  { %v6219_v9 = vadd.f32 %v11080_v12, %v6069_v13  ;;  %v6073_v59 = vmul.f32 %v11070_v19, %v5898_v27  ;;  %v5900_v30 = vpop.f32.mrb[83].mxu0  ;;  %v6218_v54 = vadd.f32 %v11083_v61, %v6068_v56  ;;  %v6072_v21 = vmul.f32 %v11073_v47, %v4935_v16 }
 0x48d   :  { %v6220_v28 = vadd.f32 %v11085_v2, %v6070_v39  ;;  %v6074_v58 = vmul.f32 %v11075_v15, %v5900_v30  ;;  %v6345_v26 = vmax.f32 %v6217_v18, 0.0  ;;  %v6221_v63 = vadd.f32 %v11078_v0, %v6071_v22 }
 0x48e   :  { %v6347_v52 = vmax.f32 %v6219_v9, 0.0  ;;  %v6223_v24 = vadd.f32 %v11080_v12, %v6073_v59  ;;  %v6346_v45 = vmax.f32 %v6218_v54, 0.0  ;;  %v6222_v7 = vadd.f32 %v11083_v61, %v6072_v21 }
 0x48f   :  { %v6348_v10 = vmax.f32 %v6220_v28, 0.0  ;;  %v6224_v57 = vadd.f32 %v11085_v2, %v6074_v58  ;;  %v6448_v36 = vadd.f32 %v6447_v8, %v6345_v26  ;;  %v6349_v50 = vmax.f32 %v6221_v63, 0.0 }
 0x490   :  { %v6490_v55 = vadd.f32 %v6489_v23, %v6347_v52  ;;  %v6351_v29 = vmax.f32 %v6223_v24, 0.0  ;;  %v6469_v37 = vadd.f32 %v6468_v43, %v6346_v45  ;;  %v6350_v48 = vmax.f32 %v6222_v7, 0.0  ;;  %v4939_v44 = vpop.f32.mrb[20].mxu1 }
 0x491   :  { %v6511_v4 = vadd.f32 %v6510_v33, %v6348_v10  ;;  %v6352_v3 = vmax.f32 %v6224_v57, 0.0  ;;  %v5904_v32 = vpop.f32.mrb[84].mxu0  ;;  %v6449_v60 = vadd.f32 %v6448_v36, %v6349_v50  ;;  %v6075_v34 = vmul.f32 %v11068_v51, %v4939_v44  ;;  %v4941_v31 = vpop.f32.mrb[21].mxu1 }
 0x492   :  { %v6491_v20 = vadd.f32 %v6490_v55, %v6351_v29  ;;  %v6077_v17 = vmul.f32 %v11070_v19, %v5904_v32  ;;  %v5906_v35 = vpop.f32.mrb[85].mxu0  ;;  %v6470_v53 = vadd.f32 %v6469_v37, %v6350_v48  ;;  %v6076_v8 = vmul.f32 %v11073_v47, %v4941_v31  ;;  %v4943_v38 = vpop.f32.mrb[22].mxu1 }
 0x493   :  { %v6512_v1 = vadd.f32 %v6511_v4, %v6352_v3  ;;  %v6078_v23 = vmul.f32 %v11075_v15, %v5906_v35  ;;  %v5908_v13 = vpop.f32.mrb[86].mxu0  ;;  %v6225_v25 = vadd.f32 %v11078_v0, %v6075_v34  ;;  %v6079_v43 = vmul.f32 %v11068_v51, %v4943_v38  ;;  %v4945_v56 = vpop.f32.mrb[23].mxu1 }
 0x494   :  { %v6227_v14 = vadd.f32 %v11080_v12, %v6077_v17  ;;  %v6081_v33 = vmul.f32 %v11070_v19, %v5908_v13  ;;  %v5910_v39 = vpop.f32.mrb[87].mxu0  ;;  %v6226_v11 = vadd.f32 %v11083_v61, %v6076_v8  ;;  %v6080_v18 = vmul.f32 %v11073_v47, %v4945_v56 }
 0x495   :  { %v6228_v27 = vadd.f32 %v11085_v2, %v6078_v23  ;;  %v6082_v9 = vmul.f32 %v11075_v15, %v5910_v39  ;;  %v6353_v22 = vmax.f32 %v6225_v25, 0.0  ;;  %v6229_v16 = vadd.f32 %v11078_v0, %v6079_v43 }
 0x496   :  { %v6355_v59 = vmax.f32 %v6227_v14, 0.0  ;;  %v6231_v30 = vadd.f32 %v11080_v12, %v6081_v33  ;;  %v6354_v54 = vmax.f32 %v6226_v11, 0.0  ;;  %v6230_v21 = vadd.f32 %v11083_v61, %v6080_v18 }
 0x497   :  { %v6356_v28 = vmax.f32 %v6228_v27, 0.0  ;;  %v6232_v58 = vadd.f32 %v11085_v2, %v6082_v9  ;;  %v6450_v26 = vadd.f32 %v6449_v60, %v6353_v22  ;;  %v6357_v63 = vmax.f32 %v6229_v16, 0.0 }
 0x498   :  { %v6492_v52 = vadd.f32 %v6491_v20, %v6355_v59  ;;  %v6359_v24 = vmax.f32 %v6231_v30, 0.0  ;;  %v6471_v45 = vadd.f32 %v6470_v53, %v6354_v54  ;;  %v6358_v7 = vmax.f32 %v6230_v21, 0.0  ;;  %v4949_v36 = vpop.f32.mrb[24].mxu1 }
 0x499   :  { %v6513_v10 = vadd.f32 %v6512_v1, %v6356_v28  ;;  %v6360_v57 = vmax.f32 %v6232_v58, 0.0  ;;  %v5914_v55 = vpop.f32.mrb[88].mxu0  ;;  %v6451_v50 = vadd.f32 %v6450_v26, %v6357_v63  ;;  %v6083_v37 = vmul.f32 %v11068_v51, %v4949_v36  ;;  %v4951_v48 = vpop.f32.mrb[25].mxu1 }
 0x49a   :  { %v6493_v29 = vadd.f32 %v6492_v52, %v6359_v24  ;;  %v6085_v4 = vmul.f32 %v11070_v19, %v5914_v55  ;;  %v5916_v3 = vpop.f32.mrb[89].mxu0  ;;  %v6472_v44 = vadd.f32 %v6471_v45, %v6358_v7  ;;  %v6084_v60 = vmul.f32 %v11073_v47, %v4951_v48  ;;  %v4953_v34 = vpop.f32.mrb[26].mxu1 }
 0x49b   :  { %v6514_v32 = vadd.f32 %v6513_v10, %v6360_v57  ;;  %v6086_v20 = vmul.f32 %v11075_v15, %v5916_v3  ;;  %v5918_v17 = vpop.f32.mrb[90].mxu0  ;;  %v6233_v31 = vadd.f32 %v11078_v0, %v6083_v37  ;;  %v6087_v53 = vmul.f32 %v11068_v51, %v4953_v34  ;;  %v4955_v8 = vpop.f32.mrb[27].mxu1 }
 0x49c   :  { %v6235_v35 = vadd.f32 %v11080_v12, %v6085_v4  ;;  %v6089_v1 = vmul.f32 %v11070_v19, %v5918_v17  ;;  %v5920_v23 = vpop.f32.mrb[91].mxu0  ;;  %v6234_v38 = vadd.f32 %v11083_v61, %v6084_v60  ;;  %v6088_v25 = vmul.f32 %v11073_v47, %v4955_v8 }
 0x49d   :  { %v6236_v13 = vadd.f32 %v11085_v2, %v6086_v20  ;;  %v6090_v14 = vmul.f32 %v11075_v15, %v5920_v23  ;;  %v6361_v43 = vmax.f32 %v6233_v31, 0.0  ;;  %v6237_v56 = vadd.f32 %v11078_v0, %v6087_v53 }
 0x49e   :  { %v6363_v33 = vmax.f32 %v6235_v35, 0.0  ;;  %v6239_v39 = vadd.f32 %v11080_v12, %v6089_v1  ;;  %v6362_v11 = vmax.f32 %v6234_v38, 0.0  ;;  %v6238_v18 = vadd.f32 %v11083_v61, %v6088_v25 }
 0x49f   :  { %v6364_v27 = vmax.f32 %v6236_v13, 0.0  ;;  %v6240_v9 = vadd.f32 %v11085_v2, %v6090_v14  ;;  %v6452_v22 = vadd.f32 %v6451_v50, %v6361_v43  ;;  %v6365_v16 = vmax.f32 %v6237_v56, 0.0 }
 0x4a0   :  { %v6494_v59 = vadd.f32 %v6493_v29, %v6363_v33  ;;  %v6367_v30 = vmax.f32 %v6239_v39, 0.0  ;;  %v6473_v54 = vadd.f32 %v6472_v44, %v6362_v11  ;;  %v6366_v21 = vmax.f32 %v6238_v18, 0.0  ;;  %v4959_v26 = vpop.f32.mrb[28].mxu1 }
 0x4a1   :  { %v6515_v28 = vadd.f32 %v6514_v32, %v6364_v27  ;;  %v6368_v58 = vmax.f32 %v6240_v9, 0.0  ;;  %v5924_v52 = vpop.f32.mrb[92].mxu0  ;;  %v6453_v63 = vadd.f32 %v6452_v22, %v6365_v16  ;;  %v6091_v45 = vmul.f32 %v11068_v51, %v4959_v26  ;;  %v4961_v7 = vpop.f32.mrb[29].mxu1 }
 0x4a2   :  { %v6495_v24 = vadd.f32 %v6494_v59, %v6367_v30  ;;  %v6093_v10 = vmul.f32 %v11070_v19, %v5924_v52  ;;  %v5926_v57 = vpop.f32.mrb[93].mxu0  ;;  %v6474_v36 = vadd.f32 %v6473_v54, %v6366_v21  ;;  %v6092_v50 = vmul.f32 %v11073_v47, %v4961_v7  ;;  %v4963_v37 = vpop.f32.mrb[30].mxu1 }
 0x4a3   :  { %v6516_v55 = vadd.f32 %v6515_v28, %v6368_v58  ;;  %v6094_v29 = vmul.f32 %v11075_v15, %v5926_v57  ;;  %v5928_v4 = vpop.f32.mrb[94].mxu0  ;;  %v6241_v48 = vadd.f32 %v11078_v0, %v6091_v45  ;;  %v6095_v44 = vmul.f32 %v11068_v51, %v4963_v37  ;;  %v4965_v60 = vpop.f32.mrb[31].mxu1 }
 0x4a4   :  { %v6243_v3 = vadd.f32 %v11080_v12, %v6093_v10  ;;  %v6097_v32 = vmul.f32 %v11070_v19, %v5928_v4  ;;  %v5930_v20 = vpop.f32.mrb[95].mxu0  ;;  %v6242_v34 = vadd.f32 %v11083_v61, %v6092_v50  ;;  %v6096_v31 = vmul.f32 %v11073_v47, %v4965_v60 }
 0x4a5   :  { %v6244_v17 = vadd.f32 %v11085_v2, %v6094_v29  ;;  %v6098_v35 = vmul.f32 %v11075_v15, %v5930_v20  ;;  %v6369_v53 = vmax.f32 %v6241_v48, 0.0  ;;  %v11232_v8 = vadd.f32 %v11078_v0, %v6095_v44 }
 0x4a6   :  { %v6371_v1 = vmax.f32 %v6243_v3, 0.0  ;;  %v11235_v23 = vadd.f32 %v11080_v12, %v6097_v32  ;;  %v6370_v38 = vmax.f32 %v6242_v34, 0.0  ;;  %v11238_v25 = vadd.f32 %v11083_v61, %v6096_v31 }
 0x4a7   :  { %v6372_v13 = vmax.f32 %v6244_v17, 0.0  ;;  %v11241_v14 = vadd.f32 %v11085_v2, %v6098_v35  ;;  %v6454_v43 = vadd.f32 %v6453_v63, %v6369_v53  ;;  %v6373_v56 = vmax.f32 %v11232_v8, 0.0 }
 0x4a8   :  { %v6496_v33 = vadd.f32 %v6495_v24, %v6371_v1  ;;  %v6375_v39 = vmax.f32 %v11235_v23, 0.0  ;;  %v6475_v11 = vadd.f32 %v6474_v36, %v6370_v38  ;;  %v6374_v18 = vmax.f32 %v11238_v25, 0.0  ;;  %v4969_v22 = vpop.f32.mrb[32].mxu1  ;;  %v6828_v25 = vld [vmem:[#allocation8 + $0x370] sm:$0xff] }
 0x4a9   :  { %v6517_v27 = vadd.f32 %v6516_v55, %v6372_v13  ;;  %v6376_v9 = vmax.f32 %v11241_v14, 0.0  ;;  %v5934_v59 = vpop.f32.mrb[96].mxu0  ;;  %v6455_v16 = vadd.f32 %v6454_v43, %v6373_v56  ;;  %v4971_v54 = vpop.f32.mrb[33].mxu1  ;;  %v6099_v26 = vmul.f32 %v11068_v51, %v4969_v22 }
 0x4aa   :  { %v6497_v30 = vadd.f32 %v6496_v33, %v6375_v39  ;;  %v5936_v28 = vpop.f32.mrb[97].mxu0  ;;  %v6476_v21 = vadd.f32 %v6475_v11, %v6374_v18  ;;  %v4973_v52 = vpop.f32.mrb[34].mxu1  ;;  %v6101_v37 = vmul.f32 %v11070_v19, %v5934_v59  ;;  %v6100_v3 = vmul.f32 %v11073_v47, %v4971_v54 }
 0x4ab   :  { %v6518_v58 = vadd.f32 %v6517_v27, %v6376_v9  ;;  %v5938_v63 = vpop.f32.mrb[98].mxu0  ;;  %v6456_v24 = vrot.slane %v6455_v16, 4  ;;  %v6102_v10 = vmul.f32 %v11075_v15, %v5936_v28  ;;  %v4975_v7 = vpop.f32.mrb[35].mxu1  ;;  %v11259_v48 = vadd.f32 %v11078_v0, %v6099_v26 }
 0x4ac   :  { %v6498_v45 = vrot.slane %v6497_v30, 4  ;;  %v5940_v57 = vpop.f32.mrb[99].mxu0  ;;  %v6477_v36 = vrot.slane %v6476_v21, 4  ;;  %v6103_v60 = vmul.f32 %v11068_v51, %v4973_v52  ;;  %v6105_v20 = vmul.f32 %v11070_v19, %v5938_v63 }
 0x4ad   :  { %v6519_v55 = vrot.slane %v6518_v58, 4  ;;  %v6457_v50 = vadd.f32 %v6456_v24, %v6455_v16  ;;  %v11263_v32 = vadd.f32 %v11085_v2, %v6102_v10  ;;  %v6104_v31 = vmul.f32 %v11073_v47, %v4975_v7 }
 0x4ae   :  { %v6499_v29 = vadd.f32 %v6498_v45, %v6497_v30  ;;  %v6478_v34 = vadd.f32 %v6477_v36, %v6476_v21  ;;  %v6106_v35 = vmul.f32 %v11075_v15, %v5940_v57  ;;  %v11270_v43 = vadd.f32 %v11080_v12, %v6101_v37 }
 0x4af   :  { %v6520_v4 = vadd.f32 %v6519_v55, %v6518_v58  ;;  %v6458_v38 = vrot.slane %v6457_v50, 2  ;;  %v6253_v33 = vadd.f32 %v11078_v0, %v6103_v60  ;;  %v6255_v59 = vadd.f32 %v11080_v12, %v6105_v20 }
 0x4b0   :  { %v6500_v44 = vrot.slane %v6499_v29, 2  ;;  %v4979_v53 = vpop.f32.mrb[36].mxu1  ;;  %v6254_v16 = vadd.f32 %v11083_v61, %v6104_v31  ;;  %v6256_v30 = vadd.f32 %v11085_v2, %v6106_v35  ;;  %v11657_v58 = vmax.f32 %v11259_v48, 0.0 }
 0x4b1   :  { %v6521_v17 = vrot.slane %v6520_v4, 2  ;;  %v5944_v1 = vpop.f32.mrb[100].mxu0  ;;  %v4981_v11 = vpop.f32.mrb[37].mxu1  ;;  %v11278_v26 = vadd.f32 %v11083_v61, %v6100_v3  ;;  %v6479_v24 = vrot.slane %v6478_v34, 2  ;;  %v6380_v10 = vmax.f32 %v11263_v32, 0.0 }
 0x4b2   :  { %v6501_v13 = vadd.f32 %v6500_v44, %v6499_v29  ;;  %v5946_v27 = vpop.f32.mrb[101].mxu0  ;;  %v4983_v54 = vpop.f32.mrb[38].mxu1  ;;  %v6384_v7 = vmax.f32 %v6256_v30, 0.0  ;;  %v11281_v57 = vadd.f32 %v6458_v38, %v6457_v50  ;;  %v6379_v55 = vmax.f32 %v11270_v43, 0.0 }
 0x4b3   :  { %v6522_v22 = vadd.f32 %v6521_v17, %v6520_v4  ;;  %v5948_v28 = vpop.f32.mrb[102].mxu0  ;;  %v4985_v52 = vpop.f32.mrb[39].mxu1  ;;  %v6381_v29 = vmax.f32 %v6253_v33, 0.0  ;;  %v6383_v4 = vmax.f32 %v6255_v59, 0.0  ;;  %v6382_v44 = vmax.f32 %v6254_v16, 0.0 }
 0x4b4   :  { %v6502_v21 = vrot.slane %v6501_v13, 1  ;;  %v5950_v63 = vpop.f32.mrb[103].mxu0  ;;  %v6604_v3 = vadd.f32 %v6384_v7, %v6380_v10  ;;  %v11659_v50 = vmax.f32 %v11278_v26, 0.0  ;;  %v6107_v20 = vmul.f32 %v11068_v51, %v4979_v53 }
 0x4b5   :  { %v6523_v45 = vrot.slane %v6522_v22, 1  ;;  %v6109_v17 = vmul.f32 %v11070_v19, %v5944_v1  ;;  %v11298_v31 = vadd.f32 %v6479_v24, %v6478_v34  ;;  %v6108_v38 = vmul.f32 %v11073_v47, %v4981_v11 }
 0x4b6   :  { %v11283_v36 = vadd.f32 %v6502_v21, %v6501_v13  ;;  %v6110_v23 = vmul.f32 %v11075_v15, %v5946_v27  ;;  %v6460_v33 = vrot.slane %v11281_v57, 1  ;;  %v6541_v53 = vadd.f32 %v6381_v29, %v11657_v58 }
 0x4b7   :  { %v11286_v37 = vadd.f32 %v6523_v45, %v6522_v22  ;;  %v6257_v1 = vadd.f32 %v11078_v0, %v6107_v20  ;;  %v6259_v34 = vadd.f32 %v11080_v12, %v6109_v17  ;;  %v6562_v11 = vadd.f32 %v6382_v44, %v11659_v50 }
 0x4b8   :  { %v11293_v60 = vsub.f32 %v11283_v36, %v6375_v39  ;;  %v4989_v13 = vpop.f32.mrb[40].mxu1  ;;  %v6258_v27 = vadd.f32 %v11083_v61, %v6108_v38  ;;  %v6260_v59 = vadd.f32 %v11085_v2, %v6110_v23  ;;  %v6111_v45 = vmul.f32 %v11068_v51, %v4983_v54 }
 0x4b9   :  { %v11303_v35 = vsub.f32 %v11286_v37, %v6376_v9  ;;  %v5954_v39 = vpop.f32.mrb[104].mxu0  ;;  %v4991_v22 = vpop.f32.mrb[41].mxu1  ;;  %v6583_v9 = vadd.f32 %v6383_v4, %v6379_v55  ;;  %v6385_v21 = vmax.f32 %v6257_v1, 0.0  ;;  %v6387_v24 = vmax.f32 %v6259_v34, 0.0 }
 0x4ba   :  { %v5956_v14 = vpop.f32.mrb[105].mxu0  ;;  %v4993_v16 = vpop.f32.mrb[42].mxu1  ;;  %v6113_v7 = vmul.f32 %v11070_v19, %v5948_v28  ;;  %v6386_v17 = vmax.f32 %v6258_v27, 0.0  ;;  %v6388_v46 = vmax.f32 %v6260_v59, 0.0  ;;  %v6112_v4 = vmul.f32 %v11073_v47, %v4985_v52 }
 0x4bb   :  { %v5958_v30 = vpop.f32.mrb[106].mxu0  ;;  %v4995_v29 = vpop.f32.mrb[43].mxu1  ;;  %v6114_v44 = vmul.f32 %v11075_v15, %v5950_v63  ;;  %v6542_v58 = vadd.f32 %v6541_v53, %v6385_v21  ;;  %v6584_v38 = vadd.f32 %v6583_v9, %v6387_v24  ;;  %v6261_v23 = vadd.f32 %v11078_v0, %v6111_v45 }
 0x4bc   :  { %v5960_v20 = vpop.f32.mrb[107].mxu0  ;;  %v6263_v41 = vadd.f32 %v11080_v12, %v6113_v7  ;;  %v6563_v1 = vadd.f32 %v6562_v11, %v6386_v17  ;;  %v6605_v34 = vadd.f32 %v6604_v3, %v6388_v46  ;;  %v6262_v54 = vadd.f32 %v11083_v61, %v6112_v4 }
 0x4bd   :  { %v6264_v28 = vadd.f32 %v11085_v2, %v6114_v44  ;;  %v6389_v50 = vmax.f32 %v6261_v23, 0.0  ;;  %v6115_v27 = vmul.f32 %v11068_v51, %v4989_v13  ;;  %v6117_v52 = vmul.f32 %v11070_v19, %v5954_v39 }
 0x4be   :  { %v6391_v42 = vmax.f32 %v6263_v41, 0.0  ;;  %v6390_v59 = vmax.f32 %v6262_v54, 0.0  ;;  %v6116_v53 = vmul.f32 %v11073_v47, %v4991_v22  ;;  %v6118_v9 = vmul.f32 %v11075_v15, %v5956_v14 }
 0x4bf   :  { %v6392_v63 = vmax.f32 %v6264_v28, 0.0  ;;  %v6543_v11 = vadd.f32 %v6542_v58, %v6389_v50  ;;  %v6265_v3 = vadd.f32 %v11078_v0, %v6115_v27  ;;  %v6267_v45 = vadd.f32 %v11080_v12, %v6117_v52 }
 0x4c0   :  { %v4999_v21 = vpop.f32.mrb[44].mxu1  ;;  %v6585_v46 = vadd.f32 %v6584_v38, %v6391_v42  ;;  %v6564_v17 = vadd.f32 %v6563_v1, %v6390_v59  ;;  %v6266_v39 = vadd.f32 %v11083_v61, %v6116_v53  ;;  %v6268_v4 = vadd.f32 %v11085_v2, %v6118_v9 }
 0x4c1   :  { %v5964_v24 = vpop.f32.mrb[108].mxu0  ;;  %v5001_v7 = vpop.f32.mrb[45].mxu1  ;;  %v6606_v13 = vadd.f32 %v6605_v34, %v6392_v63  ;;  %v6393_v23 = vmax.f32 %v6265_v3, 0.0  ;;  %v6395_v14 = vmax.f32 %v6267_v45, 0.0  ;;  %v6119_v54 = vmul.f32 %v11068_v51, %v4993_v16 }
 0x4c2   :  { %v5966_v41 = vpop.f32.mrb[109].mxu0  ;;  %v5003_v44 = vpop.f32.mrb[46].mxu1  ;;  %v6121_v42 = vmul.f32 %v11070_v19, %v5958_v30  ;;  %v6394_v38 = vmax.f32 %v6266_v39, 0.0  ;;  %v6396_v28 = vmax.f32 %v6268_v4, 0.0  ;;  %v6120_v27 = vmul.f32 %v11073_v47, %v4995_v29 }
 0x4c3   :  { %v5968_v22 = vpop.f32.mrb[110].mxu0  ;;  %v5005_v58 = vpop.f32.mrb[47].mxu1  ;;  %v6122_v1 = vmul.f32 %v11075_v15, %v5960_v20  ;;  %v6544_v34 = vadd.f32 %v6543_v11, %v6393_v23  ;;  %v6586_v52 = vadd.f32 %v6585_v46, %v6395_v14  ;;  %v6269_v59 = vadd.f32 %v11078_v0, %v6119_v54 }
 0x4c4   :  { %v5970_v50 = vpop.f32.mrb[111].mxu0  ;;  %v6271_v63 = vadd.f32 %v11080_v12, %v6121_v42  ;;  %v6565_v53 = vadd.f32 %v6564_v17, %v6394_v38  ;;  %v6607_v9 = vadd.f32 %v6606_v13, %v6396_v28  ;;  %v6270_v16 = vadd.f32 %v11083_v61, %v6120_v27 }
 0x4c5   :  { %v6272_v30 = vadd.f32 %v11085_v2, %v6122_v1  ;;  %v6397_v3 = vmax.f32 %v6269_v59, 0.0  ;;  %v6123_v39 = vmul.f32 %v11068_v51, %v4999_v21  ;;  %v6125_v29 = vmul.f32 %v11070_v19, %v5964_v24 }
 0x4c6   :  { %v6399_v45 = vmax.f32 %v6271_v63, 0.0  ;;  %v6398_v4 = vmax.f32 %v6270_v16, 0.0  ;;  %v6124_v11 = vmul.f32 %v11073_v47, %v5001_v7  ;;  %v6126_v46 = vmul.f32 %v11075_v15, %v5966_v41 }
 0x4c7   :  { %v6400_v20 = vmax.f32 %v6272_v30, 0.0  ;;  %v6545_v17 = vadd.f32 %v6544_v34, %v6397_v3  ;;  %v6273_v54 = vadd.f32 %v11078_v0, %v6123_v39  ;;  %v6275_v42 = vadd.f32 %v11080_v12, %v6125_v29 }
 0x4c8   :  { %v5009_v23 = vpop.f32.mrb[48].mxu1  ;;  %v6587_v13 = vadd.f32 %v6586_v52, %v6399_v45  ;;  %v6566_v27 = vadd.f32 %v6565_v53, %v6398_v4  ;;  %v6274_v24 = vadd.f32 %v11083_v61, %v6124_v11  ;;  %v6276_v1 = vadd.f32 %v11085_v2, %v6126_v46 }
 0x4c9   :  { %v5974_v14 = vpop.f32.mrb[112].mxu0  ;;  %v5011_v38 = vpop.f32.mrb[49].mxu1  ;;  %v6608_v21 = vadd.f32 %v6607_v9, %v6400_v20  ;;  %v6401_v63 = vmax.f32 %v6273_v54, 0.0  ;;  %v6403_v41 = vmax.f32 %v6275_v42, 0.0  ;;  %v6127_v16 = vmul.f32 %v11068_v51, %v5003_v44 }
 0x4ca   :  { %v5976_v28 = vpop.f32.mrb[113].mxu0  ;;  %v5013_v59 = vpop.f32.mrb[50].mxu1  ;;  %v6129_v34 = vmul.f32 %v11070_v19, %v5968_v22  ;;  %v6402_v3 = vmax.f32 %v6274_v24, 0.0  ;;  %v6404_v45 = vmax.f32 %v6276_v1, 0.0  ;;  %v6128_v39 = vmul.f32 %v11073_v47, %v5005_v58 }
 0x4cb   :  { %v5978_v7 = vpop.f32.mrb[114].mxu0  ;;  %v5015_v52 = vpop.f32.mrb[51].mxu1  ;;  %v6130_v53 = vmul.f32 %v11075_v15, %v5970_v50  ;;  %v6546_v9 = vadd.f32 %v6545_v17, %v6401_v63  ;;  %v6588_v29 = vadd.f32 %v6587_v13, %v6403_v41  ;;  %v6277_v4 = vadd.f32 %v11078_v0, %v6127_v16 }
 0x4cc   :  { %v5980_v30 = vpop.f32.mrb[115].mxu0  ;;  %v6279_v20 = vadd.f32 %v11080_v12, %v6129_v34  ;;  %v6567_v11 = vadd.f32 %v6566_v27, %v6402_v3  ;;  %v6609_v46 = vadd.f32 %v6608_v21, %v6404_v45  ;;  %v6278_v44 = vadd.f32 %v11083_v61, %v6128_v39 }
 0x4cd   :  { %v6280_v22 = vadd.f32 %v11085_v2, %v6130_v53  ;;  %v6405_v54 = vmax.f32 %v6277_v4, 0.0  ;;  %v6131_v24 = vmul.f32 %v11068_v51, %v5009_v23  ;;  %v6133_v58 = vmul.f32 %v11070_v19, %v5974_v14 }
 0x4ce   :  { %v6407_v42 = vmax.f32 %v6279_v20, 0.0  ;;  %v6406_v1 = vmax.f32 %v6278_v44, 0.0  ;;  %v6132_v17 = vmul.f32 %v11073_v47, %v5011_v38  ;;  %v6134_v13 = vmul.f32 %v11075_v15, %v5976_v28 }
 0x4cf   :  { %v6408_v50 = vmax.f32 %v6280_v22, 0.0  ;;  %v6547_v27 = vadd.f32 %v6546_v9, %v6405_v54  ;;  %v6281_v16 = vadd.f32 %v11078_v0, %v6131_v24  ;;  %v6283_v34 = vadd.f32 %v11080_v12, %v6133_v58 }
 0x4d0   :  { %v5019_v63 = vpop.f32.mrb[52].mxu1  ;;  %v6589_v21 = vadd.f32 %v6588_v29, %v6407_v42  ;;  %v6568_v39 = vadd.f32 %v6567_v11, %v6406_v1  ;;  %v6282_v14 = vadd.f32 %v11083_v61, %v6132_v17  ;;  %v6284_v53 = vadd.f32 %v11085_v2, %v6134_v13 }
 0x4d1   :  { %v5984_v41 = vpop.f32.mrb[116].mxu0  ;;  %v5021_v3 = vpop.f32.mrb[53].mxu1  ;;  %v6610_v23 = vadd.f32 %v6609_v46, %v6408_v50  ;;  %v6409_v20 = vmax.f32 %v6281_v16, 0.0  ;;  %v6411_v28 = vmax.f32 %v6283_v34, 0.0  ;;  %v6135_v44 = vmul.f32 %v11068_v51, %v5013_v59 }
 0x4d2   :  { %v5986_v45 = vpop.f32.mrb[117].mxu0  ;;  %v5023_v4 = vpop.f32.mrb[54].mxu1  ;;  %v6137_v9 = vmul.f32 %v11070_v19, %v5978_v7  ;;  %v6410_v54 = vmax.f32 %v6282_v14, 0.0  ;;  %v6412_v42 = vmax.f32 %v6284_v53, 0.0  ;;  %v6136_v24 = vmul.f32 %v11073_v47, %v5015_v52 }
 0x4d3   :  { %v5988_v38 = vpop.f32.mrb[118].mxu0  ;;  %v5025_v29 = vpop.f32.mrb[55].mxu1  ;;  %v6138_v11 = vmul.f32 %v11075_v15, %v5980_v30  ;;  %v6548_v46 = vadd.f32 %v6547_v27, %v6409_v20  ;;  %v6590_v58 = vadd.f32 %v6589_v21, %v6411_v28  ;;  %v6285_v1 = vadd.f32 %v11078_v0, %v6135_v44 }
 0x4d4   :  { %v5990_v22 = vpop.f32.mrb[119].mxu0  ;;  %v6287_v50 = vadd.f32 %v11080_v12, %v6137_v9  ;;  %v6569_v17 = vadd.f32 %v6568_v39, %v6410_v54  ;;  %v6611_v13 = vadd.f32 %v6610_v23, %v6412_v42  ;;  %v6286_v59 = vadd.f32 %v11083_v61, %v6136_v24 }
 0x4d5   :  { %v6288_v7 = vadd.f32 %v11085_v2, %v6138_v11  ;;  %v6413_v16 = vmax.f32 %v6285_v1, 0.0  ;;  %v6139_v14 = vmul.f32 %v11068_v51, %v5019_v63  ;;  %v6141_v52 = vmul.f32 %v11070_v19, %v5984_v41 }
 0x4d6   :  { %v6415_v34 = vmax.f32 %v6287_v50, 0.0  ;;  %v6414_v53 = vmax.f32 %v6286_v59, 0.0  ;;  %v6140_v27 = vmul.f32 %v11073_v47, %v5021_v3  ;;  %v6142_v21 = vmul.f32 %v11075_v15, %v5986_v45 }
 0x4d7   :  { %v6416_v30 = vmax.f32 %v6288_v7, 0.0  ;;  %v6549_v39 = vadd.f32 %v6548_v46, %v6413_v16  ;;  %v6289_v44 = vadd.f32 %v11078_v0, %v6139_v14  ;;  %v6291_v9 = vadd.f32 %v11080_v12, %v6141_v52 }
 0x4d8   :  { %v5029_v20 = vpop.f32.mrb[56].mxu1  ;;  %v6591_v23 = vadd.f32 %v6590_v58, %v6415_v34  ;;  %v6570_v24 = vadd.f32 %v6569_v17, %v6414_v53  ;;  %v6290_v41 = vadd.f32 %v11083_v61, %v6140_v27  ;;  %v6292_v11 = vadd.f32 %v11085_v2, %v6142_v21 }
 0x4d9   :  { %v5994_v28 = vpop.f32.mrb[120].mxu0  ;;  %v5031_v54 = vpop.f32.mrb[57].mxu1  ;;  %v6612_v63 = vadd.f32 %v6611_v13, %v6416_v30  ;;  %v6417_v50 = vmax.f32 %v6289_v44, 0.0  ;;  %v6419_v45 = vmax.f32 %v6291_v9, 0.0  ;;  %v6143_v59 = vmul.f32 %v11068_v51, %v5023_v4 }
 0x4da   :  { %v5996_v42 = vpop.f32.mrb[121].mxu0  ;;  %v5033_v1 = vpop.f32.mrb[58].mxu1  ;;  %v6145_v46 = vmul.f32 %v11070_v19, %v5988_v38  ;;  %v6418_v16 = vmax.f32 %v6290_v41, 0.0  ;;  %v6420_v34 = vmax.f32 %v6292_v11, 0.0  ;;  %v6144_v14 = vmul.f32 %v11073_v47, %v5025_v29 }
 0x4db   :  { %v5998_v3 = vpop.f32.mrb[122].mxu0  ;;  %v5035_v58 = vpop.f32.mrb[59].mxu1  ;;  %v6146_v17 = vmul.f32 %v11075_v15, %v5990_v22  ;;  %v6550_v13 = vadd.f32 %v6549_v39, %v6417_v50  ;;  %v6592_v52 = vadd.f32 %v6591_v23, %v6419_v45  ;;  %v6293_v53 = vadd.f32 %v11078_v0, %v6143_v59 }
 0x4dc   :  { %v6000_v7 = vpop.f32.mrb[123].mxu0  ;;  %v6295_v30 = vadd.f32 %v11080_v12, %v6145_v46  ;;  %v6571_v27 = vadd.f32 %v6570_v24, %v6418_v16  ;;  %v6613_v21 = vadd.f32 %v6612_v63, %v6420_v34  ;;  %v6294_v4 = vadd.f32 %v11083_v61, %v6144_v14 }
 0x4dd   :  { %v6296_v38 = vadd.f32 %v11085_v2, %v6146_v17  ;;  %v6421_v44 = vmax.f32 %v6293_v53, 0.0  ;;  %v6147_v41 = vmul.f32 %v11068_v51, %v5029_v20  ;;  %v6149_v29 = vmul.f32 %v11070_v19, %v5994_v28 }
 0x4de   :  { %v6423_v9 = vmax.f32 %v6295_v30, 0.0  ;;  %v6422_v11 = vmax.f32 %v6294_v4, 0.0  ;;  %v6148_v39 = vmul.f32 %v11073_v47, %v5031_v54  ;;  %v6150_v23 = vmul.f32 %v11075_v15, %v5996_v42 }
 0x4df   :  { %v6424_v22 = vmax.f32 %v6296_v38, 0.0  ;;  %v6551_v24 = vadd.f32 %v6550_v13, %v6421_v44  ;;  %v6297_v59 = vadd.f32 %v11078_v0, %v6147_v41  ;;  %v6299_v46 = vadd.f32 %v11080_v12, %v6149_v29 }
 0x4e0   :  { %v5039_v50 = vpop.f32.mrb[60].mxu1  ;;  %v6593_v63 = vadd.f32 %v6592_v52, %v6423_v9  ;;  %v6572_v14 = vadd.f32 %v6571_v27, %v6422_v11  ;;  %v6298_v28 = vadd.f32 %v11083_v61, %v6148_v39  ;;  %v6300_v17 = vadd.f32 %v11085_v2, %v6150_v23 }
 0x4e1   :  { %v6004_v45 = vpop.f32.mrb[124].mxu0  ;;  %v5041_v16 = vpop.f32.mrb[61].mxu1  ;;  %v6614_v20 = vadd.f32 %v6613_v21, %v6424_v22  ;;  %v6425_v30 = vmax.f32 %v6297_v59, 0.0  ;;  %v6427_v42 = vmax.f32 %v6299_v46, 0.0  ;;  %v6151_v4 = vmul.f32 %v11068_v51, %v5033_v1 }
 0x4e2   :  { %v6006_v34 = vpop.f32.mrb[125].mxu0  ;;  %v5043_v53 = vpop.f32.mrb[62].mxu1  ;;  %v6153_v13 = vmul.f32 %v11070_v19, %v5998_v3  ;;  %v6426_v44 = vmax.f32 %v6298_v28, 0.0  ;;  %v6428_v9 = vmax.f32 %v6300_v17, 0.0  ;;  %v6152_v41 = vmul.f32 %v11073_v47, %v5035_v58 }
 0x4e3   :  { %v6008_v54 = vpop.f32.mrb[126].mxu0  ;;  %v5045_v52 = vpop.f32.mrb[63].mxu1  ;;  %v6154_v27 = vmul.f32 %v11075_v15, %v6000_v7  ;;  %v6552_v21 = vadd.f32 %v6551_v24, %v6425_v30  ;;  %v6594_v29 = vadd.f32 %v6593_v63, %v6427_v42  ;;  %v6301_v11 = vadd.f32 %v11078_v0, %v6151_v4 }
 0x4e4   :  { %v6010_v38 = vpop.f32.mrb[127].mxu0  ;;  %v6303_v22 = vadd.f32 %v11080_v12, %v6153_v13  ;;  %v6573_v39 = vadd.f32 %v6572_v14, %v6426_v44  ;;  %v6615_v23 = vadd.f32 %v6614_v20, %v6428_v9  ;;  %v6302_v1 = vadd.f32 %v11083_v61, %v6152_v41 }
 0x4e5   :  { %v6304_v3 = vadd.f32 %v11085_v2, %v6154_v27  ;;  %v6429_v59 = vmax.f32 %v6301_v11, 0.0  ;;  %v6155_v28 = vmul.f32 %v11068_v51, %v5039_v50  ;;  %v6157_v58 = vmul.f32 %v11070_v19, %v6004_v45  ;;  %v6836_v27 = vld [vmem:[#allocation8 + $0x3b0] sm:$0xff] }
 0x4e6   :  { %v6431_v46 = vmax.f32 %v6303_v22, 0.0  ;;  %v6430_v17 = vmax.f32 %v6302_v1, 0.0  ;;  %v6156_v24 = vmul.f32 %v11073_v47, %v5041_v16  ;;  %v6158_v63 = vmul.f32 %v11075_v15, %v6006_v34  ;;  %v6837_v22 = vld [vmem:[#allocation8 + $0x3b8] sm:$0xff] }
 0x4e7   :  { %v6432_v7 = vmax.f32 %v6304_v3, 0.0  ;;  %v6553_v30 = vadd.f32 %v6552_v21, %v6429_v59  ;;  %v6305_v14 = vadd.f32 %v11078_v0, %v6155_v28  ;;  %v6307_v20 = vadd.f32 %v11080_v12, %v6157_v58  ;;  %v6733_v58 = vld [vmem:[#allocation8 + $0x78] sm:$0xff] }
 0x4e8   :  { %v6595_v42 = vadd.f32 %v6594_v29, %v6431_v46  ;;  %v6574_v4 = vadd.f32 %v6573_v39, %v6430_v17  ;;  %v6306_v44 = vadd.f32 %v11083_v61, %v6156_v24  ;;  %v6308_v50 = vadd.f32 %v11085_v2, %v6158_v63  ;;  %v6820_v39 = vld [vmem:[#allocation8 + $0x330] sm:$0xff]  ;;  %v6822_v24 = vld [vmem:[#allocation8 + $0x340] sm:$0xff]  ;;  %v6823_v63 = vld [vmem:[#allocation8 + $0x348] sm:$0xff] }
 0x4e9   :  { %v6616_v13 = vadd.f32 %v6615_v23, %v6432_v7  ;;  %v6433_v9 = vmax.f32 %v6305_v14, 0.0  ;;  %v6435_v45 = vmax.f32 %v6307_v20, 0.0  ;;  %v6159_v41 = vmul.f32 %v11068_v51, %v5043_v53  ;;  %v6821_v23 = vld [vmem:[#allocation8 + $0x338] sm:$0xff]  ;;  %v6838_v51 = vld [vmem:[#allocation8 + $0x3c0] sm:$0xff]  ;;  %v6748_v53 = vld [vmem:[#allocation8 + $0xf0] sm:$0xff] }
 0x4ea   :  { %v6161_v16 = vmul.f32 %v11070_v19, %v6008_v54  ;;  %v6434_v34 = vmax.f32 %v6306_v44, 0.0  ;;  %v6436_v21 = vmax.f32 %v6308_v50, 0.0  ;;  %v6160_v29 = vmul.f32 %v11073_v47, %v5045_v52  ;;  %v6839_v19 = vld [vmem:[#allocation8 + $0x3c8] sm:$0xff]  ;;  %v6749_v52 = vld [vmem:[#allocation8 + $0xf8] sm:$0xff] }
 0x4eb   :  { %v6162_v11 = vmul.f32 %v11075_v15, %v6010_v38  ;;  %v6554_v1 = vadd.f32 %v6553_v30, %v6433_v9  ;;  %v6596_v3 = vadd.f32 %v6595_v42, %v6435_v45  ;;  %v11419_v59 = vadd.f32 %v11078_v0, %v6159_v41  ;;  %v6732_v38 = vld [vmem:[#allocation8 + $0x70] sm:$0xff]  ;;  %v6841_v20 = vld [vmem:[#allocation8 + $0x3d8] sm:$0xff] }
 0x4ec   :  { %v11422_v46 = vadd.f32 %v11080_v12, %v6161_v16  ;;  %v6575_v54 = vadd.f32 %v6574_v4, %v6434_v34  ;;  %v6617_v28 = vadd.f32 %v6616_v13, %v6436_v21  ;;  %v11425_v47 = vadd.f32 %v11083_v61, %v6160_v29  ;;  %v6824_v29 = vld [vmem:[#allocation8 + $0x350] sm:$0xff] }
 0x4ed   :  { %v11428_v15 = vadd.f32 %v11085_v2, %v6162_v11  ;;  %v6437_v0 = vmax.f32 %v11419_v59, 0.0  ;;  %v8047_v12 = vpack.c.bf16 %v6837_v22, %v6836_v27  ;;  %v8049_v7 = vpack.c.bf16 %v6821_v23, %v6820_v39  ;;  %v6840_v2 = vld [vmem:[#allocation8 + $0x3d0] sm:$0xff]  ;;  %v6825_v11 = vld [vmem:[#allocation8 + $0x358] sm:$0xff]  ;;  %v6842_v22 = vld [vmem:[#allocation8 + $0x3e0] sm:$0xff] }
 0x4ee   :  { %v6439_v17 = vmax.f32 %v11422_v46, 0.0  ;;  %v6481_v30 = vrot.slane %v11298_v31, 1  ;;  %v6438_v42 = vmax.f32 %v11425_v47, 0.0  ;;  %v8051_v14 = vpack.c.bf16 %v6839_v19, %v6838_v51  ;;  %v6843_v23 = vld [vmem:[#allocation8 + $0x3e8] sm:$0xff]  ;;  %v6896_v46 = vld [vmem:[#allocation8 + $0x590] sm:$0xff] }
 0x4ef   :  { %v6440_v61 = vmax.f32 %v11428_v15, 0.0  ;;  %v6555_v4 = vadd.f32 %v6554_v1, %v6437_v0  ;;  %8048 = vmatprep.subr.bf16.mxu0 %v8047_v12  ;;  %v7967_v44 = vpack.c.bf16 %v6749_v52, %v6748_v53  ;;  %v7969_v50 = vpack.c.bf16 %v6733_v58, %v6732_v38  ;;  %v6766_v1 = vld [vmem:[#allocation8 + $0x180] sm:$0xff] }
 0x4f0   :  { %v6597_v13 = vadd.f32 %v6596_v3, %v6439_v17  ;;  %v11442_v9 = vadd.f32 %v6460_v33, %v11281_v57  ;;  %v6576_v45 = vadd.f32 %v6575_v54, %v6438_v42  ;;  %8050 = vmatpush3.bf16.msra.mxu0 %v8049_v7  ;;  %v8053_v16 = vpack.c.bf16 %v6823_v63, %v6822_v24  ;;  %v6767_v3 = vld [vmem:[#allocation8 + $0x188] sm:$0xff]  ;;  %v6826_v12 = vld [vmem:[#allocation8 + $0x360] sm:$0xff] }
 0x4f1   :  { %v6618_v41 = vadd.f32 %v6617_v28, %v6440_v61  ;;  %v6556_v27 = vrot.slane %v6555_v4, 4  ;;  %8052 = vmatprep.subr.bf16.mxu0 %v8051_v14  ;;  %7968 = vmatprep.subr.bf16.mxu1 %v7967_v44  ;;  %v8055_v21 = vpack.c.bf16 %v6841_v20, %v6840_v2  ;;  %v11449_v39 = vadd.f32 %v6481_v30, %v11298_v31  ;;  %v6827_v7 = vld [vmem:[#allocation8 + $0x368] sm:$0xff]  ;;  %v6845_v14 = vld [vmem:[#allocation8 + $0x3f8] sm:$0xff] }
 0x4f2   :  { %v6598_v34 = vrot.slane %v6597_v13, 4  ;;  %v6577_v57 = vrot.slane %v6576_v45, 4  ;;  %7970 = vmatpush3.bf16.msra.mxu1 %v7969_v50  ;;  %v11454_v53 = vsub.f32 %v11442_v9, %v6373_v56  ;;  %v8057_v52 = vpack.c.bf16 %v6825_v11, %v6824_v29  ;;  %v6844_v56 = vld [vmem:[#allocation8 + $0x3f0] sm:$0xff] }
 0x4f3   :  { %v6619_v33 = vrot.slane %v6618_v41, 4  ;;  %v6557_v51 = vadd.f32 %v6556_v27, %v6555_v4  ;;  %v8059_v58 = vpack.c.bf16 %v6843_v23, %v6842_v22  ;;  %v7971_v24 = vpack.c.bf16 %v6767_v3, %v6766_v1  ;;  %v6894_v27 = vld [vmem:[#allocation8 + $0x580] sm:$0xff] }
 0x4f4   :  { %v6599_v19 = vadd.f32 %v6598_v34, %v6597_v13  ;;  %v6578_v54 = vadd.f32 %v6577_v57, %v6576_v45  ;;  %8054 = vmatpush3.bf16.msra.mxu0 %v8053_v16  ;;  %v11459_v63 = vsub.f32 %v11449_v39, %v6374_v18  ;;  %v11464_v2 = vsub.f32 %v11286_v37, %v6316_v40  ;;  %v6829_v45 = vld [vmem:[#allocation8 + $0x378] sm:$0xff]  ;;  %v6895_v34 = vld [vmem:[#allocation8 + $0x588] sm:$0xff] }
 0x4f5   :  { %v6620_v28 = vadd.f32 %v6619_v33, %v6618_v41  ;;  %v6558_v38 = vrot.slane %v6557_v51, 2  ;;  %8056 = vmatprep.subr.bf16.mxu0 %v8055_v21  ;;  %7972 = vmatprep.subr.bf16.mxu1 %v7971_v24  ;;  %v8061_v50 = vpack.c.bf16 %v6827_v7, %v6826_v12  ;;  %v8063_v16 = vpack.c.bf16 %v6845_v14, %v6844_v56  ;;  %v6750_v24 = vld [vmem:[#allocation8 + $0x100] sm:$0xff]  ;;  %v6881_v56 = vld [vmem:[#allocation8 + $0x518] sm:$0xff] }
 0x4f6   :  { %v6600_v31 = vrot.slane %v6599_v19, 2  ;;  %v6579_v8 = vrot.slane %v6578_v54, 2  ;;  %v6649_v6 = vrot.slane %v11454_v53, 7  ;;  %v6650_v40 = vrot.slane %v11459_v63, 7  ;;  %v6751_v63 = vld [vmem:[#allocation8 + $0x108] sm:$0xff] }
 0x4f7   :  { %v6621_v30 = vrot.slane %v6620_v28, 2  ;;  %v6559_v20 = vadd.f32 %v6558_v38, %v6557_v51  ;;  %v8065_v57 = vpack.c.bf16 %v6829_v45, %v6828_v25  ;;  %v6656_v33 = vrot.slane %v11286_v37, 7  ;;  %v6878_v51 = vld [vmem:[#allocation8 + $0x500] sm:$0xff] }
 0x4f8   :  { %v6601_v4 = vadd.f32 %v6600_v31, %v6599_v19  ;;  %v6580_v13 = vadd.f32 %v6579_v8, %v6578_v54  ;;  %8058 = vmatpush3.bf16.msra.mxu0 %v8057_v52  ;;  %v8099_v3 = vpack.c.bf16 %v6895_v34, %v6894_v27  ;;  %v6879_v19 = vld [vmem:[#allocation8 + $0x508] sm:$0xff]  ;;  %v6655_v37 = vrot.slane %v11283_v36, 7  ;;  %v6897_v31 = vld [vmem:[#allocation8 + $0x598] sm:$0xff]  ;;  %v6770_v27 = vld [vmem:[#allocation8 + $0x1a0] sm:$0xff] }
 0x4f9   :  { %v6622_v44 = vadd.f32 %v6621_v30, %v6620_v28  ;;  %v6560_v18 = vrot.slane %v6559_v20, 1  ;;  %8060 = vmatprep.subr.bf16.mxu0 %v8059_v58  ;;  %v8101_v7 = vpack.c.bf16 %v6879_v19, %v6878_v51  ;;  %v6769_v30 = vld [vmem:[#allocation8 + $0x198] sm:$0xff]  ;;  %v6771_v34 = vld [vmem:[#allocation8 + $0x1a8] sm:$0xff] }
 0x4fa   :  { %v6602_v41 = vrot.slane %v6601_v4, 1  ;;  %v6581_v21 = vrot.slane %v6580_v13, 1  ;;  %v6755_v51 = vld [vmem:[#allocation8 + $0x128] sm:$0xff] }
 0x4fb   :  { %v6623_v29 = vrot.slane %v6622_v44, 1  ;;  %v11468_v11 = vadd.f32 %v6560_v18, %v6559_v20  ;;  %v6752_v18 = vld [vmem:[#allocation8 + $0x110] sm:$0xff] }
 0x4fc   :  { %v11470_v22 = vadd.f32 %v6602_v41, %v6601_v4  ;;  %v11473_v23 = vadd.f32 %v6581_v21, %v6580_v13  ;;  %8062 = vmatpush3.bf16.msra.mxu0 %v8061_v50  ;;  %v7973_v4 = vpack.c.bf16 %v6751_v63, %v6750_v24  ;;  %v6899_v50 = vld [vmem:[#allocation8 + $0x5a8] sm:$0xff]  ;;  %v6753_v41 = vld [vmem:[#allocation8 + $0x118] sm:$0xff] }
 0x4fd   :  { %v6624_v1 = vadd.f32 %v6623_v29, %v6622_v44  ;;  %v6625_v53 = vsub.f32 %v11468_v11, %v6437_v0  ;;  %8064 = vmatprep.subr.bf16.mxu0 %v8063_v16  ;;  %v6898_v44 = vld [vmem:[#allocation8 + $0x5a0] sm:$0xff]  ;;  %v6883_v21 = vld [vmem:[#allocation8 + $0x528] sm:$0xff]  ;;  %v7977_v29 = vpack.c.bf16 %v6753_v41, %v6752_v18  ;;  %v6888_v18 = vld [vmem:[#allocation8 + $0x550] sm:$0xff] }
 0x4fe   :  { %v11481_v54 = vsub.f32 %v11470_v22, %v6439_v17  ;;  %v6687_v28 = vrot.slane %v11470_v22, 6  ;;  %v6626_v52 = vsub.f32 %v11473_v23, %v6438_v42  ;;  %v6652_v17 = vrot.slane %v11303_v35, 7  ;;  %v6880_v35 = vld [vmem:[#allocation8 + $0x510] sm:$0xff]  ;;  %v6889_v41 = vld [vmem:[#allocation8 + $0x558] sm:$0xff] }
 0x4ff   :  { %v6628_v38 = vsub.f32 %v6624_v1, %v6440_v61  ;;  %v6688_v59 = vrot.slane %v6624_v1, 6  ;;  %v6632_v0 = vsub.f32 %v6624_v1, %v6380_v10  ;;  %v6681_v58 = vrot.slane %v6625_v53, 6  ;;  %v6768_v61 = vld [vmem:[#allocation8 + $0x190] sm:$0xff] }
 0x500   :  { %v6712_v12 = vsel %vm6705_vm7, %v6655_v37, %v6687_v28  ;;  %v6682_v47 = vrot.slane %v6626_v52, 6  ;;  %8066 = vmatpush3.bf16.msra.mxu0 %v8065_v57  ;;  %v8103_v10 = vpack.c.bf16 %v6897_v31, %v6896_v46  ;;  %v6683_v25 = vrot.slane %v11481_v54, 6  ;;  %v6900_v57 = vld [vmem:[#allocation8 + $0x5b0] sm:$0xff]  ;;  %v6773_v37 = vld [vmem:[#allocation8 + $0x1b8] sm:$0xff]  ;;  %v6903_v31 = vld [vmem:[#allocation8 + $0x5c8] sm:$0xff] }
 0x501   :  { %v6684_v8 = vrot.slane %v6628_v38, 6  ;;  %v6713_v15 = vsel %vm6705_vm7, %v6656_v33, %v6688_v59  ;;  %v7726_v42 = vrot.slane %v6632_v0, 7  ;;  %8100 = vmatprep.subr.bf16.mxu0 %v8099_v3  ;;  %v6706_v32 = vsel %vm6705_vm7, %v6649_v6, %v6681_v58  ;;  %v6901_v33 = vld [vmem:[#allocation8 + $0x5b8] sm:$0xff]  ;;  %v6754_v3 = vld [vmem:[#allocation8 + $0x120] sm:$0xff]  ;;  %v6772_v54 = vld [vmem:[#allocation8 + $0x1b0] sm:$0xff] }
 0x502   :  { %7184 = vmatprep.mubr.f32.mxu0 %v6713_v15  ;;  %v6707_v14 = vsel %vm6705_vm7, %v6650_v40, %v6682_v47  ;;  %v7975_v45 = vpack.c.bf16 %v6769_v30, %v6768_v61  ;;  %v8105_v16 = vpack.c.bf16 %v6881_v56, %v6880_v35  ;;  %v6651_v6 = vrot.slane %v11293_v60, 7  ;;  %v6882_v40 = vld [vmem:[#allocation8 + $0x520] sm:$0xff]  ;;  %v6884_v38 = vld [vmem:[#allocation8 + $0x530] sm:$0xff]  ;;  %v6885_v59 = vld [vmem:[#allocation8 + $0x538] sm:$0xff] }
 0x503   :  { %v6717_v20 = vsel %vm6705_vm7, %v11464_v2, %v7726_v42  ;;  %v6709_v13 = vsel %vm6705_vm7, %v6652_v17, %v6684_v8  ;;  %7185 = vmatmul.mubr.f32.vlgmr.msra.gmra.mrb[128].mxu0 %v6712_v12  ;;  %6974 = vmatprep.mubr.f32.mxu1 %v6707_v14  ;;  %v8107_v2 = vpack.c.bf16 %v6899_v50, %v6898_v44  ;;  %v6685_v28 = vrot.slane %v11468_v11, 6  ;;  %v6756_v12 = vld [vmem:[#allocation8 + $0x130] sm:$0xff]  ;;  %v6774_v47 = vld [vmem:[#allocation8 + $0x1c0] sm:$0xff]  ;;  %v6887_v42 = vld [vmem:[#allocation8 + $0x548] sm:$0xff] }
 0x504   :  { %8102 = vmatpush3.bf16.msra.mxu0 %v8101_v7  ;;  %7324 = vmatprep.mubr.f32.mxu0 %v6717_v20  ;;  %v7979_v1 = vpack.c.bf16 %v6771_v34, %v6770_v27  ;;  %v6631_v19 = vsub.f32 %v11470_v22, %v6379_v55  ;;  %v11506_v60 = vsel %vm6705_vm7, %v6651_v6, %v6683_v25  ;;  %v11785_v0 = vmax.f32 %v11095_v62, 0.0  ;;  %v6902_v22 = vld [vmem:[#allocation8 + $0x5c0] sm:$0xff]  ;;  %v6757_v7 = vld [vmem:[#allocation8 + $0x138] sm:$0xff]  ;;  %v6775_v62 = vld [vmem:[#allocation8 + $0x1c8] sm:$0xff] }
 0x505   :  { %6975 = vmatmul.mubr.f32.vlgmr.msra.gmra.mrb[64].mxu1 %v6706_v32  ;;  %8104 = vmatprep.subr.bf16.mxu0 %v8103_v10  ;;  %v8109_v53 = vpack.c.bf16 %v6883_v21, %v6882_v40  ;;  %v8111_v52 = vpack.c.bf16 %v6901_v33, %v6900_v57  ;;  %v7981_v55 = vpack.c.bf16 %v6755_v51, %v6754_v3  ;;  %v6653_v17 = vrot.slane %v11442_v9, 7  ;;  %v6886_v15 = vld [vmem:[#allocation8 + $0x540] sm:$0xff]  ;;  %v6904_v10 = vld [vmem:[#allocation8 + $0x5d0] sm:$0xff]  ;;  %v6905_v35 = vld [vmem:[#allocation8 + $0x5d8] sm:$0xff] }
 0x506   :  { %7974 = vmatpush3.bf16.msra.mxu1 %v7973_v4  ;;  %7044 = vmatprep.mubr.f32.mxu1 %v6709_v13  ;;  %v6531_v46 = vsub.f32 %v11283_v36, %v11785_v0  ;;  %v7725_v43 = vrot.slane %v6631_v19, 7  ;;  %v7983_v58 = vpack.c.bf16 %v6773_v37, %v6772_v54  ;;  %v8113_v63 = vpack.c.bf16 %v6885_v59, %v6884_v38  ;;  %v6758_v14 = vld [vmem:[#allocation8 + $0x140] sm:$0xff]  ;;  %v6759_v20 = vld [vmem:[#allocation8 + $0x148] sm:$0xff]  ;;  %v6776_v25 = vld [vmem:[#allocation8 + $0x1d0] sm:$0xff] }
 0x507   :  { %7976 = vmatprep.subr.bf16.mxu1 %v7975_v45  ;;  %v11517_v36 = vsel %vm6705_vm7, %v6653_v17, %v6685_v28  ;;  %v8115_v8 = vpack.c.bf16 %v6903_v31, %v6902_v22  ;;  %v11786_v61 = vmax.f32 %v11278_v26, 0.0  ;;  %v7985_v32 = vpack.c.bf16 %v6757_v7, %v6756_v12  ;;  %v6777_v45 = vld [vmem:[#allocation8 + $0x1d8] sm:$0xff]  ;;  %v6906_v6 = vld [vmem:[#allocation8 + $0x5e0] sm:$0xff]  ;;  %v6760_v21 = vld [vmem:[#allocation8 + $0x150] sm:$0xff] }
 0x508   :  { %8106 = vmatpush3.bf16.msra.mxu0 %v8105_v16  ;;  %v11514_v24 = vsel %vm6705_vm7, %v6531_v46, %v7725_v43  ;;  %v7987_v56 = vpack.c.bf16 %v6775_v62, %v6774_v47  ;;  %v11787_v4 = vmax.f32 %v11100_v5, 0.0  ;;  %v8117_v50 = vpack.c.bf16 %v6887_v42, %v6886_v15  ;;  %v6778_v51 = vld [vmem:[#allocation8 + $0x1e0] sm:$0xff]  ;;  %v6779_v19 = vld [vmem:[#allocation8 + $0x1e8] sm:$0xff]  ;;  %v6908_v28 = vld [vmem:[#allocation8 + $0x5f0] sm:$0xff] }
 0x509   :  { %8108 = vmatprep.subr.bf16.mxu0 %v8107_v2  ;;  %v6630_v30 = vsub.f32 %v11473_v23, %v11786_v61  ;;  %v8119_v26 = vpack.c.bf16 %v6905_v35, %v6904_v10  ;;  %v11788_v27 = vmax.f32 %v11259_v48, 0.0  ;;  %v7989_v5 = vpack.c.bf16 %v6759_v20, %v6758_v14  ;;  %v6907_v2 = vld [vmem:[#allocation8 + $0x5e8] sm:$0xff]  ;;  %v6762_v38 = vld [vmem:[#allocation8 + $0x160] sm:$0xff]  ;;  %v6780_v0 = vld [vmem:[#allocation8 + $0x1f0] sm:$0xff] }
 0x50a   :  { %7978 = vmatpush3.bf16.msra.mxu1 %v7977_v29  ;;  %v6530_v13 = vsub.f32 %v11449_v39, %v11787_v4  ;;  %v7991_v40 = vpack.c.bf16 %v6777_v45, %v6776_v25  ;;  %v6761_v29 = vld [vmem:[#allocation8 + $0x158] sm:$0xff]  ;;  %v11789_v57 = vmax.f32 %v11092_v49, 0.0  ;;  %v8121_v3 = vpack.c.bf16 %v6889_v41, %v6888_v18  ;;  %v6799_v47 = vld [vmem:[#allocation8 + $0x288] sm:$0xff]  ;;  %v6782_v15 = vld [vmem:[#allocation8 + $0x200] sm:$0xff] }
 0x50b   :  { %7980 = vmatprep.subr.bf16.mxu1 %v7979_v1  ;;  %v7724_v44 = vrot.slane %v6630_v30, 7  ;;  %v6629_v34 = vsub.f32 %v11468_v11, %v11788_v27  ;;  %v8123_v48 = vpack.c.bf16 %v6907_v2, %v6906_v6  ;;  %v6890_v11 = vld [vmem:[#allocation8 + $0x560] sm:$0xff]  ;;  %v7993_v37 = vpack.c.bf16 %v6761_v29, %v6760_v21  ;;  %v6781_v46 = vld [vmem:[#allocation8 + $0x1f8] sm:$0xff]  ;;  %v6783_v42 = vld [vmem:[#allocation8 + $0x208] sm:$0xff] }
 0x50c   :  { %8110 = vmatpush3.bf16.msra.mxu0 %v8109_v53  ;;  %v6529_v33 = vsub.f32 %v11442_v9, %v11789_v57  ;;  %v6891_v53 = vld [vmem:[#allocation8 + $0x568] sm:$0xff]  ;;  %v7995_v49 = vpack.c.bf16 %v6779_v19, %v6778_v51  ;;  %v6893_v22 = vld [vmem:[#allocation8 + $0x578] sm:$0xff]  ;;  %v7999_v17 = vpack.c.bf16 %v6781_v46, %v6780_v0  ;;  %v6800_v61 = vld [vmem:[#allocation8 + $0x290] sm:$0xff]  ;;  %v8005_v10 = vpack.c.bf16 %v6783_v42, %v6782_v15 }
 0x50d   :  { %8112 = vmatprep.subr.bf16.mxu0 %v8111_v52  ;;  %v11526_v16 = vsel %vm6705_vm7, %v6530_v13, %v7724_v44  ;;  %v7723_v1 = vrot.slane %v6629_v34, 7  ;;  %v6909_v52 = vld [vmem:[#allocation8 + $0x5f8] sm:$0xff]  ;;  %v6763_v9 = vld [vmem:[#allocation8 + $0x168] sm:$0xff]  ;;  %v8125_v59 = vpack.c.bf16 %v6891_v53, %v6890_v11  ;;  %v6654_v35 = vrot.slane %v11449_v39, 7  ;;  %v6784_v14 = vld [vmem:[#allocation8 + $0x210] sm:$0xff] }
 0x50e   :  { %7982 = vmatpush3.bf16.msra.mxu1 %v7981_v55  ;;  %v8127_v43 = vpack.c.bf16 %v6909_v52, %v6908_v28  ;;  %v6892_v55 = vld [vmem:[#allocation8 + $0x570] sm:$0xff]  ;;  %v7997_v31 = vpack.c.bf16 %v6763_v9, %v6762_v38  ;;  %v6765_v12 = vld [vmem:[#allocation8 + $0x178] sm:$0xff]  ;;  %v6802_v4 = vld [vmem:[#allocation8 + $0x2a0] sm:$0xff] }
 0x50f   :  { %7984 = vmatprep.subr.bf16.mxu1 %v7983_v58  ;;  %v11535_v54 = vsel %vm6705_vm7, %v6529_v33, %v7723_v1  ;;  %v6764_v58 = vld [vmem:[#allocation8 + $0x170] sm:$0xff]  ;;  %v8129_v7 = vpack.c.bf16 %v6893_v22, %v6892_v55  ;;  %v6801_v30 = vld [vmem:[#allocation8 + $0x298] sm:$0xff]  ;;  %v6803_v13 = vld [vmem:[#allocation8 + $0x2a8] sm:$0xff] }
 0x510   :  { %8114 = vmatpush3.bf16.msra.mxu0 %v8113_v63  ;;  %v6798_v63 = vld [vmem:[#allocation8 + $0x280] sm:$0xff]  ;;  %v8001_v62 = vpack.c.bf16 %v6765_v12, %v6764_v58  ;;  %v6785_v20 = vld [vmem:[#allocation8 + $0x218] sm:$0xff]  ;;  %v6787_v45 = vld [vmem:[#allocation8 + $0x228] sm:$0xff] }
 0x511   :  { %8116 = vmatprep.subr.bf16.mxu0 %v8115_v8  ;;  %v8003_v8 = vpack.c.bf16 %v6799_v47, %v6798_v63  ;;  %v6786_v25 = vld [vmem:[#allocation8 + $0x220] sm:$0xff]  ;;  %v6788_v41 = vld [vmem:[#allocation8 + $0x230] sm:$0xff]  ;;  %v6789_v27 = vld [vmem:[#allocation8 + $0x238] sm:$0xff] }
 0x512   :  { %7986 = vmatpush3.bf16.msra.mxu1 %v7985_v32  ;;  %v6686_v32 = vrot.slane %v11473_v23, 6  ;;  %v8011_v23 = vpack.c.bf16 %v6803_v13, %v6802_v4  ;;  %v8013_v39 = vpack.c.bf16 %v6787_v45, %v6786_v25  ;;  %v6806_v34 = vld [vmem:[#allocation8 + $0x2c0] sm:$0xff]  ;;  %v6808_v21 = vld [vmem:[#allocation8 + $0x2d0] sm:$0xff]  ;;  %v6809_v29 = vld [vmem:[#allocation8 + $0x2d8] sm:$0xff] }
 0x513   :  { %7988 = vmatprep.subr.bf16.mxu1 %v7987_v56  ;;  %v8007_v56 = vpack.c.bf16 %v6801_v30, %v6800_v61  ;;  %v6790_v2 = vld [vmem:[#allocation8 + $0x240] sm:$0xff]  ;;  %v8023_v33 = vpack.c.bf16 %v6809_v29, %v6808_v21  ;;  %v6792_v1 = vld [vmem:[#allocation8 + $0x250] sm:$0xff]  ;;  %v6811_v19 = vld [vmem:[#allocation8 + $0x2e8] sm:$0xff] }
 0x514   :  { %8118 = vmatpush3.bf16.msra.mxu0 %v8117_v50  ;;  %v6711_v44 = vsel %vm6705_vm7, %v6654_v35, %v6686_v32  ;;  %v8009_v50 = vpack.c.bf16 %v6785_v20, %v6784_v14  ;;  %v6810_v51 = vld [vmem:[#allocation8 + $0x2e0] sm:$0xff]  ;;  %v6812_v28 = vld [vmem:[#allocation8 + $0x2f0] sm:$0xff]  ;;  %v6813_v52 = vld [vmem:[#allocation8 + $0x2f8] sm:$0xff] }
 0x515   :  { %8120 = vmatprep.subr.bf16.mxu0 %v8119_v26  ;;  %v6805_v26 = vld [vmem:[#allocation8 + $0x2b8] sm:$0xff]  ;;  %v8027_v11 = vpack.c.bf16 %v6811_v19, %v6810_v51  ;;  %v6794_v53 = vld [vmem:[#allocation8 + $0x260] sm:$0xff]  ;;  %v8031_v38 = vpack.c.bf16 %v6813_v52, %v6812_v28  ;;  %v6796_v9 = vld [vmem:[#allocation8 + $0x270] sm:$0xff] }
 0x516   :  { %7990 = vmatpush3.bf16.msra.mxu1 %v7989_v5  ;;  %v6807_v5 = vld [vmem:[#allocation8 + $0x2c8] sm:$0xff]  ;;  %v6862_v0 = vld [vmem:[#allocation8 + $0x480] sm:$0xff]  ;;  %v6865_v58 = vld [vmem:[#allocation8 + $0x498] sm:$0xff] }
 0x517   :  { %7992 = vmatprep.subr.bf16.mxu1 %v7991_v40  ;;  %v8019_v6 = vpack.c.bf16 %v6807_v5, %v6806_v34  ;;  %v6791_v40 = vld [vmem:[#allocation8 + $0x248] sm:$0xff]  ;;  %v6846_v22 = vld [vmem:[#allocation8 + $0x400] sm:$0xff]  ;;  %v6848_v63 = vld [vmem:[#allocation8 + $0x410] sm:$0xff] }
 0x518   :  { %8122 = vmatpush3.bf16.msra.mxu0 %v8121_v3  ;;  %v8021_v57 = vpack.c.bf16 %v6791_v40, %v6790_v2  ;;  %v6793_v3 = vld [vmem:[#allocation8 + $0x258] sm:$0xff]  ;;  %v6863_v46 = vld [vmem:[#allocation8 + $0x488] sm:$0xff]  ;;  %v6850_v61 = vld [vmem:[#allocation8 + $0x420] sm:$0xff] }
 0x519   :  { %8124 = vmatprep.subr.bf16.mxu0 %v8123_v48  ;;  %v8025_v48 = vpack.c.bf16 %v6793_v3, %v6792_v1  ;;  %v8067_v55 = vpack.c.bf16 %v6863_v46, %v6862_v0  ;;  %v6849_v47 = vld [vmem:[#allocation8 + $0x418] sm:$0xff]  ;;  %v6851_v30 = vld [vmem:[#allocation8 + $0x428] sm:$0xff]  ;;  %v6868_v32 = vld [vmem:[#allocation8 + $0x4b0] sm:$0xff] }
 0x51a   :  { %7994 = vmatpush3.bf16.msra.mxu1 %v7993_v37  ;;  %v6795_v37 = vld [vmem:[#allocation8 + $0x268] sm:$0xff]  ;;  %v8073_v15 = vpack.c.bf16 %v6849_v47, %v6848_v63  ;;  %v8077_v35 = vpack.c.bf16 %v6851_v30, %v6850_v61  ;;  %v6852_v14 = vld [vmem:[#allocation8 + $0x430] sm:$0xff]  ;;  %v6853_v20 = vld [vmem:[#allocation8 + $0x438] sm:$0xff] }
 0x51b   :  { %7996 = vmatprep.subr.bf16.mxu1 %v7995_v49  ;;  %v8029_v49 = vpack.c.bf16 %v6795_v37, %v6794_v53  ;;  %v6870_v4 = vld [vmem:[#allocation8 + $0x4c0] sm:$0xff]  ;;  %v6871_v13 = vld [vmem:[#allocation8 + $0x4c8] sm:$0xff]  ;;  %v6873_v25 = vld [vmem:[#allocation8 + $0x4d8] sm:$0xff] }
 0x51c   :  { %8126 = vmatpush3.bf16.msra.mxu0 %v8125_v59  ;;  %v6797_v59 = vld [vmem:[#allocation8 + $0x278] sm:$0xff]  ;;  %v6858_v5 = vld [vmem:[#allocation8 + $0x460] sm:$0xff]  ;;  %v6860_v29 = vld [vmem:[#allocation8 + $0x470] sm:$0xff] }
 0x51d   :  { %8128 = vmatprep.subr.bf16.mxu0 %v8127_v43  ;;  %v8033_v43 = vpack.c.bf16 %v6797_v59, %v6796_v9  ;;  %v6877_v2 = vld [vmem:[#allocation8 + $0x4f8] sm:$0xff]  ;;  %v7728_v63 = vld [vmem:[#allocation17] ss:$0 sm:$0xff] }
 0x51e   :  { %7998 = vmatpush3.bf16.msra.mxu1 %v7997_v31  ;;  %v6847_v31 = vld [vmem:[#allocation8 + $0x408] sm:$0xff] }
 0x51f   :  { %8000 = vmatprep.subr.bf16.mxu1 %v7999_v17  ;;  %v6864_v17 = vld [vmem:[#allocation8 + $0x490] sm:$0xff]  ;;  %v8069_v12 = vpack.c.bf16 %v6847_v31, %v6846_v22 }
 0x520   :  { %8130 = vmatpush3.bf16.msra.mxu0 %v8129_v7  ;;  %v8071_v7 = vpack.c.bf16 %v6865_v58, %v6864_v17 }
 0x522   :  { %8002 = vmatpush3.bf16.msra.mxu1 %v8001_v62  ;;  %v6866_v62 = vld [vmem:[#allocation8 + $0x4a0] sm:$0xff] }
 0x523   :  { %7325 = vmatmul.mubr.f32.vlgmr.msra.gmra.mrb[130].mxu0 %v11514_v24  ;;  %8004 = vmatprep.subr.bf16.mxu1 %v8003_v8  ;;  %v6804_v24 = vld [vmem:[#allocation8 + $0x2b0] sm:$0xff]  ;;  %v6867_v8 = vld [vmem:[#allocation8 + $0x4a8] sm:$0xff] }
 0x524   :  { %v8015_v18 = vpack.c.bf16 %v6805_v26, %v6804_v24  ;;  %v8075_v42 = vpack.c.bf16 %v6867_v8, %v6866_v62  ;;  %v6856_v26 = vld [vmem:[#allocation8 + $0x450] sm:$0xff] }
 0x525   :  { %7045 = vmatmul.mubr.f32.vlgmr.msra.gmra.mrb[66].mxu1 %v11506_v60  ;;  %v8017_v60 = vpack.c.bf16 %v6789_v27, %v6788_v41  ;;  %v6875_v41 = vld [vmem:[#allocation8 + $0x4e8] sm:$0xff] }
 0x526   :  { %8006 = vmatpush3.bf16.msra.mxu1 %v8005_v10  ;;  %7114 = vmatprep.mubr.f32.mxu1 %v6711_v44  ;;  %v6869_v10 = vld [vmem:[#allocation8 + $0x4b8] sm:$0xff]  ;;  %v8083_v44 = vpack.c.bf16 %v6871_v13, %v6870_v4 }
 0x527   :  { %8008 = vmatprep.subr.bf16.mxu1 %v8007_v56  ;;  %v8079_v56 = vpack.c.bf16 %v6869_v10, %v6868_v32 }
 0x52a   :  { %8010 = vmatpush3.bf16.msra.mxu1 %v8009_v50  ;;  %v6855_v50 = vld [vmem:[#allocation8 + $0x448] sm:$0xff] }
 0x52b   :  { %8012 = vmatprep.subr.bf16.mxu1 %v8011_v23  ;;  %v6872_v23 = vld [vmem:[#allocation8 + $0x4d0] sm:$0xff] }
 0x52c   :  { %v8087_v24 = vpack.c.bf16 %v6873_v25, %v6872_v23 }
 0x52e   :  { %8014 = vmatpush3.bf16.msra.mxu1 %v8013_v39  ;;  %v6857_v39 = vld [vmem:[#allocation8 + $0x458] sm:$0xff] }
 0x52f   :  { %8016 = vmatprep.subr.bf16.mxu1 %v8015_v18  ;;  %v6874_v18 = vld [vmem:[#allocation8 + $0x4e0] sm:$0xff]  ;;  %v8089_v27 = vpack.c.bf16 %v6857_v39, %v6856_v26 }
 0x530   :  { %v8091_v34 = vpack.c.bf16 %v6875_v41, %v6874_v18 }
 0x532   :  { %8018 = vmatpush3.bf16.msra.mxu1 %v8017_v60  ;;  %v6859_v60 = vld [vmem:[#allocation8 + $0x468] sm:$0xff] }
 0x533   :  { %8020 = vmatprep.subr.bf16.mxu1 %v8019_v6  ;;  %v6876_v6 = vld [vmem:[#allocation8 + $0x4f0] sm:$0xff]  ;;  %v8093_v40 = vpack.c.bf16 %v6859_v60, %v6858_v5 }
 0x534   :  { %v8095_v21 = vpack.c.bf16 %v6877_v2, %v6876_v6 }
 0x536   :  { %8022 = vmatpush3.bf16.msra.mxu1 %v8021_v57  ;;  %v6861_v57 = vld [vmem:[#allocation8 + $0x478] sm:$0xff] }
 0x537   :  { %8024 = vmatprep.subr.bf16.mxu1 %v8023_v33  ;;  %v8097_v33 = vpack.c.bf16 %v6861_v57, %v6860_v29 }
 0x53a   :  { %8026 = vmatpush3.bf16.msra.mxu1 %v8025_v48 }
 0x53b   :  { %8028 = vmatprep.subr.bf16.mxu1 %v8027_v11 }
 0x53e   :  { %8030 = vmatpush3.bf16.msra.mxu1 %v8029_v49 }
 0x53f   :  { %8032 = vmatprep.subr.bf16.mxu1 %v8031_v38 }
 0x542   :  { %8034 = vmatpush3.bf16.msra.mxu1 %v8033_v43 }
 0x543   :  { %8068 = vmatprep.subr.bf16.mxu1 %v8067_v55 }
 0x545   :  { %7115 = vmatmul.mubr.f32.vlgmr.msra.gmra.mrb[68].mxu1 %v11517_v36  ;;  %v8081_v36 = vpack.c.bf16 %v6853_v20, %v6852_v14 }
 0x546   :  { %8070 = vmatpush3.bf16.msra.mxu1 %v8069_v12  ;;  %7254 = vmatprep.mubr.f32.mxu1 %v11526_v16  ;;  %v6854_v16 = vld [vmem:[#allocation8 + $0x440] sm:$0xff]  ;;  %v7727_v12 = vld [vmem:[#allocation15] ss:$0 sm:$0xff] }
 0x547   :  { %8072 = vmatprep.subr.bf16.mxu1 %v8071_v7  ;;  %v8085_v45 = vpack.c.bf16 %v6855_v50, %v6854_v16 }
 0x54a   :  { %8074 = vmatpush3.bf16.msra.mxu1 %v8073_v15 }
 0x54b   :  { %8076 = vmatprep.subr.bf16.mxu1 %v8075_v42 }
 0x54e   :  { %8078 = vmatpush3.bf16.msra.mxu1 %v8077_v35 }
 0x54f   :  { %8080 = vmatprep.subr.bf16.mxu1 %v8079_v56 }
 0x552   :  { %8082 = vmatpush3.bf16.msra.mxu1 %v8081_v36 }
 0x553   :  { %8084 = vmatprep.subr.bf16.mxu1 %v8083_v44 }
 0x556   :  { %8086 = vmatpush3.bf16.msra.mxu1 %v8085_v45 }
 0x557   :  { %8088 = vmatprep.subr.bf16.mxu1 %v8087_v24 }
 0x55a   :  { %8090 = vmatpush3.bf16.msra.mxu1 %v8089_v27 }
 0x55b   :  { %8092 = vmatprep.subr.bf16.mxu1 %v8091_v34 }
 0x55e   :  { %8094 = vmatpush3.bf16.msra.mxu1 %v8093_v40 }
 0x55f   :  { %8096 = vmatprep.subr.bf16.mxu1 %v8095_v21 }
 0x562   :  { %8098 = vmatpush3.bf16.msra.mxu1 %v8097_v33 }
 0x565   :  { %7255 = vmatmul.mubr.f32.vlgmr.msra.gmra.mrb[70].mxu1 %v11535_v54 }
 0x5d6   :  { %v7866_v1 = vpop.f32.mrb[128].mxu0 }
 0x5d7   :  { %v7867_v3 = vpop.f32.mrb[129].mxu0 }
 0x5d8   :  { %v7868_v51 = vadd.f32 %v7867_v3, %v7866_v1  ;;  %v7761_v19 = vpop.f32.mrb[64].mxu1 }
 0x5d9   :  { %v7762_v48 = vpop.f32.mrb[65].mxu1 }
 0x5da   :  { %v7763_v11 = vadd.f32 %v7762_v48, %v7761_v19 }
 0x5f6   :  { %v7936_v53 = vpop.f32.mrb[130].mxu0 }
 0x5f7   :  { %v7937_v37 = vpop.f32.mrb[131].mxu0 }
 0x5f8   :  { %v7938_v28 = vadd.f32 %v7937_v37, %v7936_v53  ;;  %v7796_v52 = vpop.f32.mrb[66].mxu1 }
 0x5f9   :  { %v7797_v49 = vpop.f32.mrb[67].mxu1 }
 0x5fa   :  { %v7798_v38 = vadd.f32 %v7797_v49, %v7796_v52 }
 0x5fc   :  { %v7047_v9 = vadd.f32 %v7798_v38, %v7763_v11 }
 0x618   :  { %v7831_v59 = vpop.f32.mrb[68].mxu1 }
 0x619   :  { %v7832_v0 = vpop.f32.mrb[69].mxu1 }
 0x61a   :  { %v7833_v46 = vadd.f32 %v7832_v0, %v7831_v59 }
 0x61c   :  { %v7117_v43 = vadd.f32 %v7833_v46, %v7047_v9 }
 0x61e   :  { %v7187_v55 = vadd.f32 %v7868_v51, %v7117_v43 }
 0x638   :  { %v7901_v22 = vpop.f32.mrb[70].mxu1 }
 0x639   :  { %v7902_v54 = vpop.f32.mrb[71].mxu1 }
 0x63a   :  { %v7903_v31 = vadd.f32 %v7902_v54, %v7901_v22 }
 0x63c   :  { %v7257_v17 = vadd.f32 %v7903_v31, %v7187_v55 }
 0x63e   :  { %v7327_v58 = vadd.f32 %v7938_v28, %v7257_v17 }
 0x640   :  { %v7330_v7 = vmul.f32 0.0078125, %v7327_v58 }
 0x642   :  { %v7338_v47 = vmul.f32 %v7727_v12, %v7330_v7 }
 0x644   :  { %v7346_v62 = vadd.f32 %v7728_v63, %v7338_v47 }
 0x646   :  { %7347 = vst [vmem:[#allocation18] sm:$0x3] %v7346_v62 }
 0x647   :  { %9411 = shalt.err (!%p9408_p6)
}
 0x648   :  { %s9412_s2 = scalar_lea.hbm %s11567_s10, 32 }
 0x649   :  { %p9413_p7 = scmp.ne.s32.totalorder %s11567_s10, %s9412_s2  ;;  %p9416_p8 = scmp.lt.u32.totalorder %s9412_s2, %s11567_s10 }
 0x64b   :  { %p9418_p9 = pnand %p9416_p8, %p9413_p7 }
 0x64d   :  { %9421 = shalt.err (!%p9418_p9)
}
 0x64e   :  { %7357 = dma.vmem_to_hbm [thread:$0]  %s7355_s15, 32, %s11567_s10, [#allocation5]  }
 0x64f   :  { %9432 = dma.done.wait [#allocation5], 32  }
 0x650   :  { %9433 = vsyncadd [#allocation5], 4294967264 }
 0x651   :  { %7361 = vsyncpa [#allocation4], 1 }
 0x652   :  { %7362 = vsyncpa [#allocation7], 1 }
 0x653   :  { %7363 = vsyncpa [#allocation10], 1 }
 0x654   :  { %7364 = vsyncpa [#allocation13], 1 }
 0x655   :  { %7365 = vsyncpa [#allocation16], 1 }
 0x656   :  { %7366 = vsyncpa [#allocation5], 1 }

</bundles_post_ra>
